<compile_context>
chip_gen: v7x
topology: tpu7x:2x2x1
jax: 0.10.0
libtpu: 0.0.40
codegen_flags: <defaults>
</compile_context>

<pallas_src>
import functools

import jax
import jax.numpy as jnp
from jax import lax
from jax.experimental import pallas as pl
from jax.experimental.pallas import tpu as pltpu

EPS = 1e-5  # PyTorch BatchNorm2d default eps


# ----------------------------------------------------------------------------
# Host-side weight repacking: 3x3 OIHW conv weights -> 3 band matrices
# ----------------------------------------------------------------------------
def _band_weights(w_oihw, Wt, C):
    """(Cout,Cin,3,3) -> 3 band matrices B_dh, each ((Wt+2)*C, Wt*C) bf16.

    B_dh[j*C + cin, r*C + cout] = w[cout, cin, dh, j - r] when j - r in {0,1,2},
    else 0.  Output width position r (within a Wt-wide tile) reads input
    positions r..r+2 of the (Wt+2)-wide overlapping LHS window, so the same
    band matrix serves every width tile (translation invariance).
    """
    wt = jnp.transpose(w_oihw, (2, 3, 1, 0)).astype(jnp.float32)  # (kh,kw,Cin,Cout)
    mats = []
    for dh in range(3):
        b = jnp.zeros(((Wt + 2) * C, Wt * C), jnp.float32)
        for dw in range(3):
            sel = jnp.zeros((Wt + 2, Wt), jnp.float32)
            sel = sel.at[jnp.arange(Wt) + dw, jnp.arange(Wt)].set(1.0)
            b = b + jnp.kron(sel, wt[dh, dw])
        mats.append(b.astype(jnp.bfloat16))
    return mats


# ----------------------------------------------------------------------------
# Kernel
# ----------------------------------------------------------------------------
def _residual_block_kernel(params_ref,                       # SMEM f32[2]: alphas
                           x_ref,                            # VMEM (N*H, W*C) f32
                           t1a, t1b, t1c,                    # VMEM (Kb, Nb) bf16
                           t2a, t2b, t2c,                    # VMEM (Kb, Nb) bf16
                           g1_ref, b1_ref, g2_ref, b2_ref,   # VMEM (1, C) f32
                           out_ref,                          # VMEM (N*H, W*C) f32
                           pad_ref,                          # VMEM (N, R, Wp*C) bf16
                           *, N, H, W, C, Wt, r0):
    nT = W // Wt
    Kb = (Wt + 2) * C          # contraction dim per kh tap
    Nb = Wt * C                # output width per tile (256 for Wt=4, C=64)
    NH = N * H
    Wp = W + 2
    inv_cnt = 1.0 / float(N * H * W)
    alpha1 = params_ref[0]
    alpha2 = params_ref[1]

    def conv(taps):
        # 3 MXU matmuls (bf16 operands, f32 accumulate), one per kh tap.
        # LHS rows are ordered (width-tile, n, h); windows overlap by 2*C cols.
        acc = None
        for dh, t in enumerate(taps):
            pieces = [
                pad_ref[:, r0 - 1 + dh:r0 - 1 + dh + H, ti * Nb:ti * Nb + Kb]
                .reshape(NH, Kb)
                for ti in range(nT)
            ]
            slab = jnp.concatenate(pieces, axis=0)           # (nT*NH, Kb) bf16
            d = jnp.dot(slab, t[...], preferred_element_type=jnp.float32)
            acc = d if acc is None else acc + d              # first tap inits acc
        return acc                                           # (nT*NH, Nb) f32

    def lane_fold(v):
        # (1, Nb) -> (1, C): sum the Wt width positions (tiny VPU/XLU work).
        acc = v[:, 0:C]
        for r in range(1, Wt):
            acc = acc + v[:, r * C:(r + 1) * C]
        return acc

    def bn_scale_shift(y, g_ref, b_ref):
        # Training-mode BN, single-pass biased variance, folded into one
        # per-channel scale/shift.  No M=1 matmuls: row reduction + lane fold.
        s1 = jnp.sum(y, axis=0, keepdims=True)               # (1, Nb)
        s2 = jnp.sum(y * y, axis=0, keepdims=True)           # (1, Nb)
        mean = lane_fold(s1) * inv_cnt                       # (1, C)
        ex2 = lane_fold(s2) * inv_cnt                        # (1, C)
        var = ex2 - mean * mean
        scale = g_ref[...] * lax.rsqrt(var + EPS)            # (1, C)
        shift = b_ref[...] - mean * scale                    # (1, C)
        # Tile per-channel scale/shift across the Wt width positions.
        scale_full = jnp.concatenate([scale] * Wt, axis=1)   # (1, Nb)
        shift_full = jnp.concatenate([shift] * Wt, axis=1)   # (1, Nb)
        return scale_full, shift_full

    # ---- zero only the halo of the shared padded scratch (it stays zero for
    #      both convs; the interior is always fully overwritten).
    pad_ref[:, r0 - 1:r0, :] = jnp.zeros((N, 1, Wp * C), jnp.bfloat16)
    pad_ref[:, r0 + H:r0 + H + 1, :] = jnp.zeros((N, 1, Wp * C), jnp.bfloat16)
    pad_ref[:, r0:r0 + H, 0:C] = jnp.zeros((N, H, C), jnp.bfloat16)
    pad_ref[:, r0:r0 + H, (W + 1) * C:Wp * C] = jnp.zeros((N, H, C), jnp.bfloat16)

    # ---- conv1 input: write x (bf16) into the interior of the padded scratch.
    #      x is NOT kept live; the residual re-reads x_ref later.
    pad_ref[:, r0:r0 + H, C:(W + 1) * C] = \
        x_ref[...].astype(jnp.bfloat16).reshape(N, H, W * C)

    # ---- conv1 -> BN1 -> PReLU
    y = conv((t1a, t1b, t1c))                                # (nT*NH, Nb) f32
    sc, sh = bn_scale_shift(y, g1_ref, b1_ref)
    y = y * sc + sh
    y = jnp.where(y >= 0, y, alpha1 * y)

    # ---- activations become conv2's padded input (interior cols only;
    #      the zero halo is never touched, so conv2's padding stays exact).
    for ti in range(nT):
        c0 = (ti * Wt + 1) * C
        pad_ref[:, r0:r0 + H, c0:c0 + Nb] = \
            y[ti * NH:(ti + 1) * NH, :].astype(jnp.bfloat16).reshape(N, H, Nb)

    # ---- conv2 -> BN2 -> residual add -> outer PReLU (per width tile so the
    #      residual read and the output store are 256-lane aligned).
    y = conv((t2a, t2b, t2c))
    sc, sh = bn_scale_shift(y, g2_ref, b2_ref)
    for ti in range(nT):
        z = y[ti * NH:(ti + 1) * NH, :] * sc + sh \
            + x_ref[:, ti * Nb:(ti + 1) * Nb]
        z = jnp.where(z >= 0, z, alpha2 * z)
        out_ref[:, ti * Nb:(ti + 1) * Nb] = z


# ----------------------------------------------------------------------------
# Wrapper (PyTorch-style NCHW interface)
# ----------------------------------------------------------------------------
def residual_block_pallas(x_nchw, w1, w2, g1, b1, g2, b2, alpha1, alpha2, *, Wt=4):
    """x_nchw: (N, C, H, W); w1/w2: (C, C, 3, 3) PyTorch OIHW conv weights."""
    N, C, H, W = x_nchw.shape
    assert W % Wt == 0, "width must be divisible by the width tile"
    r0 = 16  # interior rows start on a bf16 sublane-tile boundary (halos at 15, 16+H)

    # NCHW -> lane-dense (N*H, W*C); padding happens inside the kernel.
    x = jnp.transpose(x_nchw, (0, 2, 3, 1)).astype(jnp.float32).reshape(N * H, W * C)
    t1 = _band_weights(w1, Wt, C)                   # 3 x ((Wt+2)*C, Wt*C) bf16
    t2 = _band_weights(w2, Wt, C)
    params = jnp.array([alpha1, alpha2], jnp.float32)

    kernel = functools.partial(_residual_block_kernel,
                               N=N, H=H, W=W, C=C, Wt=Wt, r0=r0)
    vmem = pl.BlockSpec(memory_space=pltpu.MemorySpace.VMEM)
    smem = pl.BlockSpec(memory_space=pltpu.MemorySpace.SMEM)

    out = pl.pallas_call(
        kernel,
        out_shape=jax.ShapeDtypeStruct((N * H, W * C), jnp.float32),
        in_specs=[smem] + [vmem] * 11,
        out_specs=vmem,
        scratch_shapes=[pltpu.VMEM((N, r0 + H + 1, (W + 2) * C), jnp.bfloat16)],
        compiler_params=pltpu.CompilerParams(vmem_limit_bytes=16 * 1024 * 1024),
    )(params, x, t1[0], t1[1], t1[2], t2[0], t2[1], t2[2],
      g1.reshape(1, C).astype(jnp.float32), b1.reshape(1, C).astype(jnp.float32),
      g2.reshape(1, C).astype(jnp.float32), b2.reshape(1, C).astype(jnp.float32))

    out = out.reshape(N, H, W, C)
    return jnp.transpose(out, (0, 3, 1, 2))         # back to NCHW


# ----------------------------------------------------------------------------
# Pure-JAX reference (f32), mirrors the PyTorch forward
# ----------------------------------------------------------------------------
def residual_block_ref(x, w1, w2, g1, b1, g2, b2, a1, a2):
    def conv(y, w):
        return lax.conv_general_dilated(
            y, w, window_strides=(1, 1), padding=((1, 1), (1, 1)),
            dimension_numbers=("NCHW", "OIHW", "NCHW"))

    def bn(y, g, b):
        mean = jnp.mean(y, axis=(0, 2, 3), keepdims=True)
        var = jnp.mean((y - mean) ** 2, axis=(0, 2, 3), keepdims=True)
        return ((y - mean) / jnp.sqrt(var + EPS)) * g.reshape(1, -1, 1, 1) \
               + b.reshape(1, -1, 1, 1)

    def prelu(y, a):
        return jnp.where(y >= 0, y, a * y)

    y = conv(x, w1); y = bn(y, g1, b1); y = prelu(y, a1)
    y = conv(y, w2); y = bn(y, g2, b2)
    return prelu(y + x, a2)


if __name__ == "__main__":
    N, C, H, W = 2, 64, 16, 16     # in_features=64 (module default)
    key = jax.random.PRNGKey(0)
    kx, kw1, kw2 = jax.random.split(key, 3)

    x = jax.random.normal(kx, (N, C, H, W), jnp.float32)
    w1 = jax.random.normal(kw1, (C, C, 3, 3), jnp.float32) * 0.05
    w2 = jax.random.normal(kw2, (C, C, 3, 3), jnp.float32) * 0.05
    # BatchNorm affine params at PyTorch defaults (gamma=1, beta=0)
    g1 = jnp.ones((C,), jnp.float32); b1 = jnp.zeros((C,), jnp.float32)
    g2 = jnp.ones((C,), jnp.float32); b2 = jnp.zeros((C,), jnp.float32)
    # PReLU single-parameter defaults
    alpha_block, alpha_out = 0.25, 0.25

    out = residual_block_pallas(x, w1, w2, g1, b1, g2, b2, alpha_block, alpha_out)
    out = jax.block_until_ready(out)

    ref = residual_block_ref(x, w1, w2, g1, b1, g2, b2, alpha_block, alpha_out)
    ref = jax.block_until_ready(ref)

    assert out.shape == (N, C, H, W)
    # tolerance accounts for bf16 MXU operands (f32 accumulation + BN renorm)
    assert jnp.allclose(out, ref, atol=2e-2, rtol=2e-2), \
        float(jnp.max(jnp.abs(out - ref)))
    print("KERNEL_OK")
</pallas_src>

<mosaic_0001>
module attributes {stable_mosaic.version = 11 : i64} {
  func.func @_residual_block_kernel(%arg0: memref<2xf32, #tpu.memory_space<smem>>, %arg1: memref<32x1024xf32, #tpu.memory_space<vmem>>, %arg2: memref<384x256xbf16, #tpu.memory_space<vmem>>, %arg3: memref<384x256xbf16, #tpu.memory_space<vmem>>, %arg4: memref<384x256xbf16, #tpu.memory_space<vmem>>, %arg5: memref<384x256xbf16, #tpu.memory_space<vmem>>, %arg6: memref<384x256xbf16, #tpu.memory_space<vmem>>, %arg7: memref<384x256xbf16, #tpu.memory_space<vmem>>, %arg8: memref<1x64xf32, #tpu.memory_space<vmem>>, %arg9: memref<1x64xf32, #tpu.memory_space<vmem>>, %arg10: memref<1x64xf32, #tpu.memory_space<vmem>>, %arg11: memref<1x64xf32, #tpu.memory_space<vmem>>, %arg12: memref<32x1024xf32, #tpu.memory_space<vmem>>, %arg13: memref<2x33x1152xbf16, #tpu.memory_space<vmem>>) attributes {dimension_semantics = [], scalar_prefetch = 0 : i64, scratch_operands = 1 : i64, tpu.core_type = #tpu.core_type<tc>} {
    %c0 = arith.constant 0 : index
    %0 = memref.load %arg0[%c0] : memref<2xf32, #tpu.memory_space<smem>>
    %c1 = arith.constant 1 : index
    %1 = memref.load %arg0[%c1] : memref<2xf32, #tpu.memory_space<smem>>
    %cst = arith.constant 0.000000e+00 : bf16
    %2 = vector.broadcast %cst : bf16 to vector<2x1x1152xbf16>
    %c0_0 = arith.constant 0 : index
    %c15 = arith.constant 15 : index
    %c0_1 = arith.constant 0 : index
    %3 = vector.load %arg13[%c0_0, %c15, %c0_1] : memref<2x33x1152xbf16, #tpu.memory_space<vmem>>, vector<2x1x1152xbf16>
    tpu.vector_store %arg13[%c0_0, %c15, %c0_1], %2 {strides = array<i32>} : memref<2x33x1152xbf16, #tpu.memory_space<vmem>>, vector<2x1x1152xbf16>,
    %cst_2 = arith.constant 0.000000e+00 : bf16
    %4 = vector.broadcast %cst_2 : bf16 to vector<2x1x1152xbf16>
    %c0_3 = arith.constant 0 : index
    %c32 = arith.constant 32 : index
    %c0_4 = arith.constant 0 : index
    %5 = vector.load %arg13[%c0_3, %c32, %c0_4] : memref<2x33x1152xbf16, #tpu.memory_space<vmem>>, vector<2x1x1152xbf16>
    tpu.vector_store %arg13[%c0_3, %c32, %c0_4], %4 {strides = array<i32>} : memref<2x33x1152xbf16, #tpu.memory_space<vmem>>, vector<2x1x1152xbf16>,
    %cst_5 = arith.constant 0.000000e+00 : bf16
    %6 = vector.broadcast %cst_5 : bf16 to vector<2x16x64xbf16>
    %c0_6 = arith.constant 0 : index
    %c16 = arith.constant 16 : index
    %c0_7 = arith.constant 0 : index
    %7 = vector.load %arg13[%c0_6, %c16, %c0_7] : memref<2x33x1152xbf16, #tpu.memory_space<vmem>>, vector<2x16x64xbf16>
    tpu.vector_store %arg13[%c0_6, %c16, %c0_7], %6 {strides = array<i32>} : memref<2x33x1152xbf16, #tpu.memory_space<vmem>>, vector<2x16x64xbf16>,
    %cst_8 = arith.constant 0.000000e+00 : bf16
    %8 = vector.broadcast %cst_8 : bf16 to vector<2x16x64xbf16>
    %c0_9 = arith.constant 0 : index
    %c16_10 = arith.constant 16 : index
    %c1088 = arith.constant 1088 : index
    %9 = vector.load %arg13[%c0_9, %c16_10, %c1088] : memref<2x33x1152xbf16, #tpu.memory_space<vmem>>, vector<2x16x64xbf16>
    tpu.vector_store %arg13[%c0_9, %c16_10, %c1088], %8 {strides = array<i32>} : memref<2x33x1152xbf16, #tpu.memory_space<vmem>>, vector<2x16x64xbf16>,
    %c0_11 = arith.constant 0 : index
    %c0_12 = arith.constant 0 : index
    %10 = vector.load %arg1[%c0_11, %c0_12] : memref<32x1024xf32, #tpu.memory_space<vmem>>, vector<32x1024xf32>
    %11 = arith.truncf %10 : vector<32x1024xf32> to vector<32x1024xbf16>
    %12 = vector.shape_cast %11 : vector<32x1024xbf16> to vector<2x16x1024xbf16>
    %c0_13 = arith.constant 0 : index
    %c16_14 = arith.constant 16 : index
    %c64 = arith.constant 64 : index
    %13 = vector.load %arg13[%c0_13, %c16_14, %c64] : memref<2x33x1152xbf16, #tpu.memory_space<vmem>>, vector<2x16x1024xbf16>
    tpu.vector_store %arg13[%c0_13, %c16_14, %c64], %12 {strides = array<i32>} : memref<2x33x1152xbf16, #tpu.memory_space<vmem>>, vector<2x16x1024xbf16>,
    %c0_15 = arith.constant 0 : index
    %c15_16 = arith.constant 15 : index
    %c0_17 = arith.constant 0 : index
    %14 = vector.load %arg13[%c0_15, %c15_16, %c0_17] : memref<2x33x1152xbf16, #tpu.memory_space<vmem>>, vector<2x16x384xbf16>
    %15 = vector.shape_cast %14 : vector<2x16x384xbf16> to vector<32x384xbf16>
    %c0_18 = arith.constant 0 : index
    %c15_19 = arith.constant 15 : index
    %c256 = arith.constant 256 : index
    %16 = vector.load %arg13[%c0_18, %c15_19, %c256] : memref<2x33x1152xbf16, #tpu.memory_space<vmem>>, vector<2x16x384xbf16>
    %17 = vector.shape_cast %16 : vector<2x16x384xbf16> to vector<32x384xbf16>
    %c0_20 = arith.constant 0 : index
    %c15_21 = arith.constant 15 : index
    %c512 = arith.constant 512 : index
    %18 = vector.load %arg13[%c0_20, %c15_21, %c512] : memref<2x33x1152xbf16, #tpu.memory_space<vmem>>, vector<2x16x384xbf16>
    %19 = vector.shape_cast %18 : vector<2x16x384xbf16> to vector<32x384xbf16>
    %c0_22 = arith.constant 0 : index
    %c15_23 = arith.constant 15 : index
    %c768 = arith.constant 768 : index
    %20 = vector.load %arg13[%c0_22, %c15_23, %c768] : memref<2x33x1152xbf16, #tpu.memory_space<vmem>>, vector<2x16x384xbf16>
    %21 = vector.shape_cast %20 : vector<2x16x384xbf16> to vector<32x384xbf16>
    %22 = tpu.concatenate %15, %17, %19, %21 in 0 : vector<32x384xbf16>, vector<32x384xbf16>, vector<32x384xbf16>, vector<32x384xbf16> -> vector<128x384xbf16>
    %c0_24 = arith.constant 0 : index
    %c0_25 = arith.constant 0 : index
    %23 = vector.load %arg2[%c0_24, %c0_25] : memref<384x256xbf16, #tpu.memory_space<vmem>>, vector<384x256xbf16>
    %cst_26 = arith.constant dense<0.000000e+00> : vector<128x256xf32>
    %24 = tpu.matmul %22, %23, %cst_26 {dimension_numbers = #tpu.dot_dimension_numbers<[1], [0], [0], [1], [0, 0, 1, 1], [], []>} : vector<128x384xbf16>, vector<384x256xbf16>, vector<128x256xf32> -> vector<128x256xf32>
    %c0_27 = arith.constant 0 : index
    %c16_28 = arith.constant 16 : index
    %c0_29 = arith.constant 0 : index
    %25 = vector.load %arg13[%c0_27, %c16_28, %c0_29] : memref<2x33x1152xbf16, #tpu.memory_space<vmem>>, vector<2x16x384xbf16>
    %26 = vector.shape_cast %25 : vector<2x16x384xbf16> to vector<32x384xbf16>
    %c0_30 = arith.constant 0 : index
    %c16_31 = arith.constant 16 : index
    %c256_32 = arith.constant 256 : index
    %27 = vector.load %arg13[%c0_30, %c16_31, %c256_32] : memref<2x33x1152xbf16, #tpu.memory_space<vmem>>, vector<2x16x384xbf16>
    %28 = vector.shape_cast %27 : vector<2x16x384xbf16> to vector<32x384xbf16>
    %c0_33 = arith.constant 0 : index
    %c16_34 = arith.constant 16 : index
    %c512_35 = arith.constant 512 : index
    %29 = vector.load %arg13[%c0_33, %c16_34, %c512_35] : memref<2x33x1152xbf16, #tpu.memory_space<vmem>>, vector<2x16x384xbf16>
    %30 = vector.shape_cast %29 : vector<2x16x384xbf16> to vector<32x384xbf16>
    %c0_36 = arith.constant 0 : index
    %c16_37 = arith.constant 16 : index
    %c768_38 = arith.constant 768 : index
    %31 = vector.load %arg13[%c0_36, %c16_37, %c768_38] : memref<2x33x1152xbf16, #tpu.memory_space<vmem>>, vector<2x16x384xbf16>
    %32 = vector.shape_cast %31 : vector<2x16x384xbf16> to vector<32x384xbf16>
    %33 = tpu.concatenate %26, %28, %30, %32 in 0 : vector<32x384xbf16>, vector<32x384xbf16>, vector<32x384xbf16>, vector<32x384xbf16> -> vector<128x384xbf16>
    %c0_39 = arith.constant 0 : index
    %c0_40 = arith.constant 0 : index
    %34 = vector.load %arg3[%c0_39, %c0_40] : memref<384x256xbf16, #tpu.memory_space<vmem>>, vector<384x256xbf16>
    %cst_41 = arith.constant dense<0.000000e+00> : vector<128x256xf32>
    %35 = tpu.matmul %33, %34, %cst_41 {dimension_numbers = #tpu.dot_dimension_numbers<[1], [0], [0], [1], [0, 0, 1, 1], [], []>} : vector<128x384xbf16>, vector<384x256xbf16>, vector<128x256xf32> -> vector<128x256xf32>
    %36 = arith.addf %24, %35 : vector<128x256xf32>
    %c0_42 = arith.constant 0 : index
    %c17 = arith.constant 17 : index
    %c0_43 = arith.constant 0 : index
    %37 = vector.load %arg13[%c0_42, %c17, %c0_43] : memref<2x33x1152xbf16, #tpu.memory_space<vmem>>, vector<2x16x384xbf16>
    %38 = vector.shape_cast %37 : vector<2x16x384xbf16> to vector<32x384xbf16>
    %c0_44 = arith.constant 0 : index
    %c17_45 = arith.constant 17 : index
    %c256_46 = arith.constant 256 : index
    %39 = vector.load %arg13[%c0_44, %c17_45, %c256_46] : memref<2x33x1152xbf16, #tpu.memory_space<vmem>>, vector<2x16x384xbf16>
    %40 = vector.shape_cast %39 : vector<2x16x384xbf16> to vector<32x384xbf16>
    %c0_47 = arith.constant 0 : index
    %c17_48 = arith.constant 17 : index
    %c512_49 = arith.constant 512 : index
    %41 = vector.load %arg13[%c0_47, %c17_48, %c512_49] : memref<2x33x1152xbf16, #tpu.memory_space<vmem>>, vector<2x16x384xbf16>
    %42 = vector.shape_cast %41 : vector<2x16x384xbf16> to vector<32x384xbf16>
    %c0_50 = arith.constant 0 : index
    %c17_51 = arith.constant 17 : index
    %c768_52 = arith.constant 768 : index
    %43 = vector.load %arg13[%c0_50, %c17_51, %c768_52] : memref<2x33x1152xbf16, #tpu.memory_space<vmem>>, vector<2x16x384xbf16>
    %44 = vector.shape_cast %43 : vector<2x16x384xbf16> to vector<32x384xbf16>
    %45 = tpu.concatenate %38, %40, %42, %44 in 0 : vector<32x384xbf16>, vector<32x384xbf16>, vector<32x384xbf16>, vector<32x384xbf16> -> vector<128x384xbf16>
    %c0_53 = arith.constant 0 : index
    %c0_54 = arith.constant 0 : index
    %46 = vector.load %arg4[%c0_53, %c0_54] : memref<384x256xbf16, #tpu.memory_space<vmem>>, vector<384x256xbf16>
    %cst_55 = arith.constant dense<0.000000e+00> : vector<128x256xf32>
    %47 = tpu.matmul %45, %46, %cst_55 {dimension_numbers = #tpu.dot_dimension_numbers<[1], [0], [0], [1], [0, 0, 1, 1], [], []>} : vector<128x384xbf16>, vector<384x256xbf16>, vector<128x256xf32> -> vector<128x256xf32>
    %48 = arith.addf %36, %47 : vector<128x256xf32>
    %cst_56 = arith.constant dense<0.000000e+00> : vector<256xf32>
    %49 = vector.multi_reduction <add>, %48, %cst_56 [0] : vector<128x256xf32> to vector<256xf32>
    %50 = vector.shape_cast %49 : vector<256xf32> to vector<1x256xf32>
    %51 = arith.mulf %48, %48 : vector<128x256xf32>
    %cst_57 = arith.constant dense<0.000000e+00> : vector<256xf32>
    %52 = vector.multi_reduction <add>, %51, %cst_57 [0] : vector<128x256xf32> to vector<256xf32>
    %53 = vector.shape_cast %52 : vector<256xf32> to vector<1x256xf32>
    %54 = vector.extract_strided_slice %50 {offsets = [0, 0], sizes = [1, 64], strides = [1, 1]} : vector<1x256xf32> to vector<1x64xf32>
    %55 = vector.extract_strided_slice %50 {offsets = [0, 64], sizes = [1, 64], strides = [1, 1]} : vector<1x256xf32> to vector<1x64xf32>
    %56 = arith.addf %54, %55 : vector<1x64xf32>
    %57 = vector.extract_strided_slice %50 {offsets = [0, 128], sizes = [1, 64], strides = [1, 1]} : vector<1x256xf32> to vector<1x64xf32>
    %58 = arith.addf %56, %57 : vector<1x64xf32>
    %59 = vector.extract_strided_slice %50 {offsets = [0, 192], sizes = [1, 64], strides = [1, 1]} : vector<1x256xf32> to vector<1x64xf32>
    %60 = arith.addf %58, %59 : vector<1x64xf32>
    %cst_58 = arith.constant 0.001953125 : f32
    %61 = vector.broadcast %cst_58 : f32 to vector<1x64xf32>
    %62 = arith.mulf %60, %61 : vector<1x64xf32>
    %63 = vector.extract_strided_slice %53 {offsets = [0, 0], sizes = [1, 64], strides = [1, 1]} : vector<1x256xf32> to vector<1x64xf32>
    %64 = vector.extract_strided_slice %53 {offsets = [0, 64], sizes = [1, 64], strides = [1, 1]} : vector<1x256xf32> to vector<1x64xf32>
    %65 = arith.addf %63, %64 : vector<1x64xf32>
    %66 = vector.extract_strided_slice %53 {offsets = [0, 128], sizes = [1, 64], strides = [1, 1]} : vector<1x256xf32> to vector<1x64xf32>
    %67 = arith.addf %65, %66 : vector<1x64xf32>
    %68 = vector.extract_strided_slice %53 {offsets = [0, 192], sizes = [1, 64], strides = [1, 1]} : vector<1x256xf32> to vector<1x64xf32>
    %69 = arith.addf %67, %68 : vector<1x64xf32>
    %cst_59 = arith.constant 0.001953125 : f32
    %70 = vector.broadcast %cst_59 : f32 to vector<1x64xf32>
    %71 = arith.mulf %69, %70 : vector<1x64xf32>
    %72 = arith.mulf %62, %62 : vector<1x64xf32>
    %73 = arith.subf %71, %72 : vector<1x64xf32>
    %c0_60 = arith.constant 0 : index
    %c0_61 = arith.constant 0 : index
    %74 = vector.load %arg8[%c0_60, %c0_61] : memref<1x64xf32, #tpu.memory_space<vmem>>, vector<1x64xf32>
    %cst_62 = arith.constant 9.99999974E-6 : f32
    %75 = vector.broadcast %cst_62 : f32 to vector<1x64xf32>
    %76 = arith.addf %73, %75 : vector<1x64xf32>
    %77 = math.rsqrt %76 : vector<1x64xf32>
    %78 = arith.mulf %74, %77 : vector<1x64xf32>
    %c0_63 = arith.constant 0 : index
    %c0_64 = arith.constant 0 : index
    %79 = vector.load %arg9[%c0_63, %c0_64] : memref<1x64xf32, #tpu.memory_space<vmem>>, vector<1x64xf32>
    %80 = arith.mulf %62, %78 : vector<1x64xf32>
    %81 = arith.subf %79, %80 : vector<1x64xf32>
    %82 = tpu.concatenate %78, %78, %78, %78 in 1 : vector<1x64xf32>, vector<1x64xf32>, vector<1x64xf32>, vector<1x64xf32> -> vector<1x256xf32>
    %83 = tpu.concatenate %81, %81, %81, %81 in 1 : vector<1x64xf32>, vector<1x64xf32>, vector<1x64xf32>, vector<1x64xf32> -> vector<1x256xf32>
    %84 = vector.broadcast %82 : vector<1x256xf32> to vector<128x256xf32>
    %85 = arith.mulf %48, %84 : vector<128x256xf32>
    %86 = vector.broadcast %83 : vector<1x256xf32> to vector<128x256xf32>
    %87 = arith.addf %85, %86 : vector<128x256xf32>
    %cst_65 = arith.constant 0.000000e+00 : f32
    %88 = vector.broadcast %cst_65 : f32 to vector<128x256xf32>
    %89 = arith.cmpf oge, %87, %88 : vector<128x256xf32>
    %90 = vector.broadcast %0 : f32 to vector<128x256xf32>
    %91 = arith.mulf %90, %87 : vector<128x256xf32>
    %92 = arith.select %89, %87, %91 : vector<128x256xi1>, vector<128x256xf32>
    %93 = vector.extract_strided_slice %92 {offsets = [0, 0], sizes = [32, 256], strides = [1, 1]} : vector<128x256xf32> to vector<32x256xf32>
    %94 = arith.truncf %93 : vector<32x256xf32> to vector<32x256xbf16>
    %95 = vector.shape_cast %94 : vector<32x256xbf16> to vector<2x16x256xbf16>
    %c0_66 = arith.constant 0 : index
    %c16_67 = arith.constant 16 : index
    %c64_68 = arith.constant 64 : index
    %96 = vector.load %arg13[%c0_66, %c16_67, %c64_68] : memref<2x33x1152xbf16, #tpu.memory_space<vmem>>, vector<2x16x256xbf16>
    tpu.vector_store %arg13[%c0_66, %c16_67, %c64_68], %95 {strides = array<i32>} : memref<2x33x1152xbf16, #tpu.memory_space<vmem>>, vector<2x16x256xbf16>,
    %97 = vector.extract_strided_slice %92 {offsets = [32, 0], sizes = [32, 256], strides = [1, 1]} : vector<128x256xf32> to vector<32x256xf32>
    %98 = arith.truncf %97 : vector<32x256xf32> to vector<32x256xbf16>
    %99 = vector.shape_cast %98 : vector<32x256xbf16> to vector<2x16x256xbf16>
    %c0_69 = arith.constant 0 : index
    %c16_70 = arith.constant 16 : index
    %c320 = arith.constant 320 : index
    %100 = vector.load %arg13[%c0_69, %c16_70, %c320] : memref<2x33x1152xbf16, #tpu.memory_space<vmem>>, vector<2x16x256xbf16>
    tpu.vector_store %arg13[%c0_69, %c16_70, %c320], %99 {strides = array<i32>} : memref<2x33x1152xbf16, #tpu.memory_space<vmem>>, vector<2x16x256xbf16>,
    %101 = vector.extract_strided_slice %92 {offsets = [64, 0], sizes = [32, 256], strides = [1, 1]} : vector<128x256xf32> to vector<32x256xf32>
    %102 = arith.truncf %101 : vector<32x256xf32> to vector<32x256xbf16>
    %103 = vector.shape_cast %102 : vector<32x256xbf16> to vector<2x16x256xbf16>
    %c0_71 = arith.constant 0 : index
    %c16_72 = arith.constant 16 : index
    %c576 = arith.constant 576 : index
    %104 = vector.load %arg13[%c0_71, %c16_72, %c576] : memref<2x33x1152xbf16, #tpu.memory_space<vmem>>, vector<2x16x256xbf16>
    tpu.vector_store %arg13[%c0_71, %c16_72, %c576], %103 {strides = array<i32>} : memref<2x33x1152xbf16, #tpu.memory_space<vmem>>, vector<2x16x256xbf16>,
    %105 = vector.extract_strided_slice %92 {offsets = [96, 0], sizes = [32, 256], strides = [1, 1]} : vector<128x256xf32> to vector<32x256xf32>
    %106 = arith.truncf %105 : vector<32x256xf32> to vector<32x256xbf16>
    %107 = vector.shape_cast %106 : vector<32x256xbf16> to vector<2x16x256xbf16>
    %c0_73 = arith.constant 0 : index
    %c16_74 = arith.constant 16 : index
    %c832 = arith.constant 832 : index
    %108 = vector.load %arg13[%c0_73, %c16_74, %c832] : memref<2x33x1152xbf16, #tpu.memory_space<vmem>>, vector<2x16x256xbf16>
    tpu.vector_store %arg13[%c0_73, %c16_74, %c832], %107 {strides = array<i32>} : memref<2x33x1152xbf16, #tpu.memory_space<vmem>>, vector<2x16x256xbf16>,
    %c0_75 = arith.constant 0 : index
    %c15_76 = arith.constant 15 : index
    %c0_77 = arith.constant 0 : index
    %109 = vector.load %arg13[%c0_75, %c15_76, %c0_77] : memref<2x33x1152xbf16, #tpu.memory_space<vmem>>, vector<2x16x384xbf16>
    %110 = vector.shape_cast %109 : vector<2x16x384xbf16> to vector<32x384xbf16>
    %c0_78 = arith.constant 0 : index
    %c15_79 = arith.constant 15 : index
    %c256_80 = arith.constant 256 : index
    %111 = vector.load %arg13[%c0_78, %c15_79, %c256_80] : memref<2x33x1152xbf16, #tpu.memory_space<vmem>>, vector<2x16x384xbf16>
    %112 = vector.shape_cast %111 : vector<2x16x384xbf16> to vector<32x384xbf16>
    %c0_81 = arith.constant 0 : index
    %c15_82 = arith.constant 15 : index
    %c512_83 = arith.constant 512 : index
    %113 = vector.load %arg13[%c0_81, %c15_82, %c512_83] : memref<2x33x1152xbf16, #tpu.memory_space<vmem>>, vector<2x16x384xbf16>
    %114 = vector.shape_cast %113 : vector<2x16x384xbf16> to vector<32x384xbf16>
    %c0_84 = arith.constant 0 : index
    %c15_85 = arith.constant 15 : index
    %c768_86 = arith.constant 768 : index
    %115 = vector.load %arg13[%c0_84, %c15_85, %c768_86] : memref<2x33x1152xbf16, #tpu.memory_space<vmem>>, vector<2x16x384xbf16>
    %116 = vector.shape_cast %115 : vector<2x16x384xbf16> to vector<32x384xbf16>
    %117 = tpu.concatenate %110, %112, %114, %116 in 0 : vector<32x384xbf16>, vector<32x384xbf16>, vector<32x384xbf16>, vector<32x384xbf16> -> vector<128x384xbf16>
    %c0_87 = arith.constant 0 : index
    %c0_88 = arith.constant 0 : index
    %118 = vector.load %arg5[%c0_87, %c0_88] : memref<384x256xbf16, #tpu.memory_space<vmem>>, vector<384x256xbf16>
    %cst_89 = arith.constant dense<0.000000e+00> : vector<128x256xf32>
    %119 = tpu.matmul %117, %118, %cst_89 {dimension_numbers = #tpu.dot_dimension_numbers<[1], [0], [0], [1], [0, 0, 1, 1], [], []>} : vector<128x384xbf16>, vector<384x256xbf16>, vector<128x256xf32> -> vector<128x256xf32>
    %c0_90 = arith.constant 0 : index
    %c16_91 = arith.constant 16 : index
    %c0_92 = arith.constant 0 : index
    %120 = vector.load %arg13[%c0_90, %c16_91, %c0_92] : memref<2x33x1152xbf16, #tpu.memory_space<vmem>>, vector<2x16x384xbf16>
    %121 = vector.shape_cast %120 : vector<2x16x384xbf16> to vector<32x384xbf16>
    %c0_93 = arith.constant 0 : index
    %c16_94 = arith.constant 16 : index
    %c256_95 = arith.constant 256 : index
    %122 = vector.load %arg13[%c0_93, %c16_94, %c256_95] : memref<2x33x1152xbf16, #tpu.memory_space<vmem>>, vector<2x16x384xbf16>
    %123 = vector.shape_cast %122 : vector<2x16x384xbf16> to vector<32x384xbf16>
    %c0_96 = arith.constant 0 : index
    %c16_97 = arith.constant 16 : index
    %c512_98 = arith.constant 512 : index
    %124 = vector.load %arg13[%c0_96, %c16_97, %c512_98] : memref<2x33x1152xbf16, #tpu.memory_space<vmem>>, vector<2x16x384xbf16>
    %125 = vector.shape_cast %124 : vector<2x16x384xbf16> to vector<32x384xbf16>
    %c0_99 = arith.constant 0 : index
    %c16_100 = arith.constant 16 : index
    %c768_101 = arith.constant 768 : index
    %126 = vector.load %arg13[%c0_99, %c16_100, %c768_101] : memref<2x33x1152xbf16, #tpu.memory_space<vmem>>, vector<2x16x384xbf16>
    %127 = vector.shape_cast %126 : vector<2x16x384xbf16> to vector<32x384xbf16>
    %128 = tpu.concatenate %121, %123, %125, %127 in 0 : vector<32x384xbf16>, vector<32x384xbf16>, vector<32x384xbf16>, vector<32x384xbf16> -> vector<128x384xbf16>
    %c0_102 = arith.constant 0 : index
    %c0_103 = arith.constant 0 : index
    %129 = vector.load %arg6[%c0_102, %c0_103] : memref<384x256xbf16, #tpu.memory_space<vmem>>, vector<384x256xbf16>
    %cst_104 = arith.constant dense<0.000000e+00> : vector<128x256xf32>
    %130 = tpu.matmul %128, %129, %cst_104 {dimension_numbers = #tpu.dot_dimension_numbers<[1], [0], [0], [1], [0, 0, 1, 1], [], []>} : vector<128x384xbf16>, vector<384x256xbf16>, vector<128x256xf32> -> vector<128x256xf32>
    %131 = arith.addf %119, %130 : vector<128x256xf32>
    %c0_105 = arith.constant 0 : index
    %c17_106 = arith.constant 17 : index
    %c0_107 = arith.constant 0 : index
    %132 = vector.load %arg13[%c0_105, %c17_106, %c0_107] : memref<2x33x1152xbf16, #tpu.memory_space<vmem>>, vector<2x16x384xbf16>
    %133 = vector.shape_cast %132 : vector<2x16x384xbf16> to vector<32x384xbf16>
    %c0_108 = arith.constant 0 : index
    %c17_109 = arith.constant 17 : index
    %c256_110 = arith.constant 256 : index
    %134 = vector.load %arg13[%c0_108, %c17_109, %c256_110] : memref<2x33x1152xbf16, #tpu.memory_space<vmem>>, vector<2x16x384xbf16>
    %135 = vector.shape_cast %134 : vector<2x16x384xbf16> to vector<32x384xbf16>
    %c0_111 = arith.constant 0 : index
    %c17_112 = arith.constant 17 : index
    %c512_113 = arith.constant 512 : index
    %136 = vector.load %arg13[%c0_111, %c17_112, %c512_113] : memref<2x33x1152xbf16, #tpu.memory_space<vmem>>, vector<2x16x384xbf16>
    %137 = vector.shape_cast %136 : vector<2x16x384xbf16> to vector<32x384xbf16>
    %c0_114 = arith.constant 0 : index
    %c17_115 = arith.constant 17 : index
    %c768_116 = arith.constant 768 : index
    %138 = vector.load %arg13[%c0_114, %c17_115, %c768_116] : memref<2x33x1152xbf16, #tpu.memory_space<vmem>>, vector<2x16x384xbf16>
    %139 = vector.shape_cast %138 : vector<2x16x384xbf16> to vector<32x384xbf16>
    %140 = tpu.concatenate %133, %135, %137, %139 in 0 : vector<32x384xbf16>, vector<32x384xbf16>, vector<32x384xbf16>, vector<32x384xbf16> -> vector<128x384xbf16>
    %c0_117 = arith.constant 0 : index
    %c0_118 = arith.constant 0 : index
    %141 = vector.load %arg7[%c0_117, %c0_118] : memref<384x256xbf16, #tpu.memory_space<vmem>>, vector<384x256xbf16>
    %cst_119 = arith.constant dense<0.000000e+00> : vector<128x256xf32>
    %142 = tpu.matmul %140, %141, %cst_119 {dimension_numbers = #tpu.dot_dimension_numbers<[1], [0], [0], [1], [0, 0, 1, 1], [], []>} : vector<128x384xbf16>, vector<384x256xbf16>, vector<128x256xf32> -> vector<128x256xf32>
    %143 = arith.addf %131, %142 : vector<128x256xf32>
    %cst_120 = arith.constant dense<0.000000e+00> : vector<256xf32>
    %144 = vector.multi_reduction <add>, %143, %cst_120 [0] : vector<128x256xf32> to vector<256xf32>
    %145 = vector.shape_cast %144 : vector<256xf32> to vector<1x256xf32>
    %146 = arith.mulf %143, %143 : vector<128x256xf32>
    %cst_121 = arith.constant dense<0.000000e+00> : vector<256xf32>
    %147 = vector.multi_reduction <add>, %146, %cst_121 [0] : vector<128x256xf32> to vector<256xf32>
    %148 = vector.shape_cast %147 : vector<256xf32> to vector<1x256xf32>
    %149 = vector.extract_strided_slice %145 {offsets = [0, 0], sizes = [1, 64], strides = [1, 1]} : vector<1x256xf32> to vector<1x64xf32>
    %150 = vector.extract_strided_slice %145 {offsets = [0, 64], sizes = [1, 64], strides = [1, 1]} : vector<1x256xf32> to vector<1x64xf32>
    %151 = arith.addf %149, %150 : vector<1x64xf32>
    %152 = vector.extract_strided_slice %145 {offsets = [0, 128], sizes = [1, 64], strides = [1, 1]} : vector<1x256xf32> to vector<1x64xf32>
    %153 = arith.addf %151, %152 : vector<1x64xf32>
    %154 = vector.extract_strided_slice %145 {offsets = [0, 192], sizes = [1, 64], strides = [1, 1]} : vector<1x256xf32> to vector<1x64xf32>
    %155 = arith.addf %153, %154 : vector<1x64xf32>
    %cst_122 = arith.constant 0.001953125 : f32
    %156 = vector.broadcast %cst_122 : f32 to vector<1x64xf32>
    %157 = arith.mulf %155, %156 : vector<1x64xf32>
    %158 = vector.extract_strided_slice %148 {offsets = [0, 0], sizes = [1, 64], strides = [1, 1]} : vector<1x256xf32> to vector<1x64xf32>
    %159 = vector.extract_strided_slice %148 {offsets = [0, 64], sizes = [1, 64], strides = [1, 1]} : vector<1x256xf32> to vector<1x64xf32>
    %160 = arith.addf %158, %159 : vector<1x64xf32>
    %161 = vector.extract_strided_slice %148 {offsets = [0, 128], sizes = [1, 64], strides = [1, 1]} : vector<1x256xf32> to vector<1x64xf32>
    %162 = arith.addf %160, %161 : vector<1x64xf32>
    %163 = vector.extract_strided_slice %148 {offsets = [0, 192], sizes = [1, 64], strides = [1, 1]} : vector<1x256xf32> to vector<1x64xf32>
    %164 = arith.addf %162, %163 : vector<1x64xf32>
    %cst_123 = arith.constant 0.001953125 : f32
    %165 = vector.broadcast %cst_123 : f32 to vector<1x64xf32>
    %166 = arith.mulf %164, %165 : vector<1x64xf32>
    %167 = arith.mulf %157, %157 : vector<1x64xf32>
    %168 = arith.subf %166, %167 : vector<1x64xf32>
    %c0_124 = arith.constant 0 : index
    %c0_125 = arith.constant 0 : index
    %169 = vector.load %arg10[%c0_124, %c0_125] : memref<1x64xf32, #tpu.memory_space<vmem>>, vector<1x64xf32>
    %cst_126 = arith.constant 9.99999974E-6 : f32
    %170 = vector.broadcast %cst_126 : f32 to vector<1x64xf32>
    %171 = arith.addf %168, %170 : vector<1x64xf32>
    %172 = math.rsqrt %171 : vector<1x64xf32>
    %173 = arith.mulf %169, %172 : vector<1x64xf32>
    %c0_127 = arith.constant 0 : index
    %c0_128 = arith.constant 0 : index
    %174 = vector.load %arg11[%c0_127, %c0_128] : memref<1x64xf32, #tpu.memory_space<vmem>>, vector<1x64xf32>
    %175 = arith.mulf %157, %173 : vector<1x64xf32>
    %176 = arith.subf %174, %175 : vector<1x64xf32>
    %177 = tpu.concatenate %173, %173, %173, %173 in 1 : vector<1x64xf32>, vector<1x64xf32>, vector<1x64xf32>, vector<1x64xf32> -> vector<1x256xf32>
    %178 = tpu.concatenate %176, %176, %176, %176 in 1 : vector<1x64xf32>, vector<1x64xf32>, vector<1x64xf32>, vector<1x64xf32> -> vector<1x256xf32>
    %179 = vector.extract_strided_slice %143 {offsets = [0, 0], sizes = [32, 256], strides = [1, 1]} : vector<128x256xf32> to vector<32x256xf32>
    %180 = vector.broadcast %177 : vector<1x256xf32> to vector<32x256xf32>
    %181 = arith.mulf %179, %180 : vector<32x256xf32>
    %182 = vector.broadcast %178 : vector<1x256xf32> to vector<32x256xf32>
    %183 = arith.addf %181, %182 : vector<32x256xf32>
    %c0_129 = arith.constant 0 : index
    %c0_130 = arith.constant 0 : index
    %184 = vector.load %arg1[%c0_129, %c0_130] : memref<32x1024xf32, #tpu.memory_space<vmem>>, vector<32x256xf32>
    %185 = arith.addf %183, %184 : vector<32x256xf32>
    %cst_131 = arith.constant 0.000000e+00 : f32
    %186 = vector.broadcast %cst_131 : f32 to vector<32x256xf32>
    %187 = arith.cmpf oge, %185, %186 : vector<32x256xf32>
    %188 = vector.broadcast %1 : f32 to vector<32x256xf32>
    %189 = arith.mulf %188, %185 : vector<32x256xf32>
    %190 = arith.select %187, %185, %189 : vector<32x256xi1>, vector<32x256xf32>
    %c0_132 = arith.constant 0 : index
    %c0_133 = arith.constant 0 : index
    %191 = vector.load %arg12[%c0_132, %c0_133] : memref<32x1024xf32, #tpu.memory_space<vmem>>, vector<32x256xf32>
    tpu.vector_store %arg12[%c0_132, %c0_133], %190 {strides = array<i32>} : memref<32x1024xf32, #tpu.memory_space<vmem>>, vector<32x256xf32>,
    %192 = vector.extract_strided_slice %143 {offsets = [32, 0], sizes = [32, 256], strides = [1, 1]} : vector<128x256xf32> to vector<32x256xf32>
    %193 = vector.broadcast %177 : vector<1x256xf32> to vector<32x256xf32>
    %194 = arith.mulf %192, %193 : vector<32x256xf32>
    %195 = vector.broadcast %178 : vector<1x256xf32> to vector<32x256xf32>
    %196 = arith.addf %194, %195 : vector<32x256xf32>
    %c0_134 = arith.constant 0 : index
    %c256_135 = arith.constant 256 : index
    %197 = vector.load %arg1[%c0_134, %c256_135] : memref<32x1024xf32, #tpu.memory_space<vmem>>, vector<32x256xf32>
    %198 = arith.addf %196, %197 : vector<32x256xf32>
    %cst_136 = arith.constant 0.000000e+00 : f32
    %199 = vector.broadcast %cst_136 : f32 to vector<32x256xf32>
    %200 = arith.cmpf oge, %198, %199 : vector<32x256xf32>
    %201 = vector.broadcast %1 : f32 to vector<32x256xf32>
    %202 = arith.mulf %201, %198 : vector<32x256xf32>
    %203 = arith.select %200, %198, %202 : vector<32x256xi1>, vector<32x256xf32>
    %c0_137 = arith.constant 0 : index
    %c256_138 = arith.constant 256 : index
    %204 = vector.load %arg12[%c0_137, %c256_138] : memref<32x1024xf32, #tpu.memory_space<vmem>>, vector<32x256xf32>
    tpu.vector_store %arg12[%c0_137, %c256_138], %203 {strides = array<i32>} : memref<32x1024xf32, #tpu.memory_space<vmem>>, vector<32x256xf32>,
    %205 = vector.extract_strided_slice %143 {offsets = [64, 0], sizes = [32, 256], strides = [1, 1]} : vector<128x256xf32> to vector<32x256xf32>
    %206 = vector.broadcast %177 : vector<1x256xf32> to vector<32x256xf32>
    %207 = arith.mulf %205, %206 : vector<32x256xf32>
    %208 = vector.broadcast %178 : vector<1x256xf32> to vector<32x256xf32>
    %209 = arith.addf %207, %208 : vector<32x256xf32>
    %c0_139 = arith.constant 0 : index
    %c512_140 = arith.constant 512 : index
    %210 = vector.load %arg1[%c0_139, %c512_140] : memref<32x1024xf32, #tpu.memory_space<vmem>>, vector<32x256xf32>
    %211 = arith.addf %209, %210 : vector<32x256xf32>
    %cst_141 = arith.constant 0.000000e+00 : f32
    %212 = vector.broadcast %cst_141 : f32 to vector<32x256xf32>
    %213 = arith.cmpf oge, %211, %212 : vector<32x256xf32>
    %214 = vector.broadcast %1 : f32 to vector<32x256xf32>
    %215 = arith.mulf %214, %211 : vector<32x256xf32>
    %216 = arith.select %213, %211, %215 : vector<32x256xi1>, vector<32x256xf32>
    %c0_142 = arith.constant 0 : index
    %c512_143 = arith.constant 512 : index
    %217 = vector.load %arg12[%c0_142, %c512_143] : memref<32x1024xf32, #tpu.memory_space<vmem>>, vector<32x256xf32>
    tpu.vector_store %arg12[%c0_142, %c512_143], %216 {strides = array<i32>} : memref<32x1024xf32, #tpu.memory_space<vmem>>, vector<32x256xf32>,
    %218 = vector.extract_strided_slice %143 {offsets = [96, 0], sizes = [32, 256], strides = [1, 1]} : vector<128x256xf32> to vector<32x256xf32>
    %219 = vector.broadcast %177 : vector<1x256xf32> to vector<32x256xf32>
    %220 = arith.mulf %218, %219 : vector<32x256xf32>
    %221 = vector.broadcast %178 : vector<1x256xf32> to vector<32x256xf32>
    %222 = arith.addf %220, %221 : vector<32x256xf32>
    %c0_144 = arith.constant 0 : index
    %c768_145 = arith.constant 768 : index
    %223 = vector.load %arg1[%c0_144, %c768_145] : memref<32x1024xf32, #tpu.memory_space<vmem>>, vector<32x256xf32>
    %224 = arith.addf %222, %223 : vector<32x256xf32>
    %cst_146 = arith.constant 0.000000e+00 : f32
    %225 = vector.broadcast %cst_146 : f32 to vector<32x256xf32>
    %226 = arith.cmpf oge, %224, %225 : vector<32x256xf32>
    %227 = vector.broadcast %1 : f32 to vector<32x256xf32>
    %228 = arith.mulf %227, %224 : vector<32x256xf32>
    %229 = arith.select %226, %224, %228 : vector<32x256xi1>, vector<32x256xf32>
    %c0_147 = arith.constant 0 : index
    %c768_148 = arith.constant 768 : index
    %230 = vector.load %arg12[%c0_147, %c768_148] : memref<32x1024xf32, #tpu.memory_space<vmem>>, vector<32x256xf32>
    tpu.vector_store %arg12[%c0_147, %c768_148], %229 {strides = array<i32>} : memref<32x1024xf32, #tpu.memory_space<vmem>>, vector<32x256xf32>,
    return
  }
}

</mosaic_0001>

<bundles_post_ra>
// kernel: tpu_custom_call.1
= control target key start
LH: loop header
LB: loop body
LE: loop exit
PB: predicated region body
PF: predicated region fallthrough
CT: control target
= control target key end

     0   :  { %17 = vsyncpa [#allocation6], 0  ;;  %s10723_s0 = inlined_call_operand.hbm [shape: f32[2], index: 0, kind: input, shape index: {}]   ;;  %s10724_s1 = inlined_call_operand.hbm [shape: f32[32,1024], index: 1, kind: input, shape index: {}]   ;;  %s10725_s2 = inlined_call_operand.hbm [shape: bf16[384,256], index: 2, kind: input, shape index: {}]   ;;  %s10726_s3 = inlined_call_operand.hbm [shape: bf16[384,256], index: 3, kind: input, shape index: {}]   ;;  %s10727_s4 = inlined_call_operand.hbm [shape: bf16[384,256], index: 4, kind: input, shape index: {}]   ;;  %s10728_s5 = inlined_call_operand.hbm [shape: bf16[384,256], index: 5, kind: input, shape index: {}]   ;;  %s10729_s6 = inlined_call_operand.hbm [shape: bf16[384,256], index: 6, kind: input, shape index: {}]   ;;  %s10730_s7 = inlined_call_operand.hbm [shape: bf16[384,256], index: 7, kind: input, shape index: {}]   ;;  %s10731_s8 = inlined_call_operand.vmem [shape: f32[1,64], index: 8, kind: input, shape index: {}]   ;;  %s10732_s9 = inlined_call_operand.vmem [shape: f32[1,64], index: 9, kind: input, shape index: {}]   ;;  %s10733_s10 = inlined_call_operand.vmem [shape: f32[1,64], index: 10, kind: input, shape index: {}]   ;;  %s10734_s11 = inlined_call_operand.vmem [shape: f32[1,64], index: 11, kind: input, shape index: {}]   ;;  %s10735_s12 = inlined_call_operand.hbm [shape: f32[32,1024], index: 12, kind: output, shape index: {}]  }
   0x1   :  { %18 = vsyncpa [#allocation4], 0 }
   0x2   :  { %19 = vsyncpa [#allocation9], 0 }
   0x3   :  { %20 = vsyncpa [#allocation12], 0 }
   0x4   :  { %21 = vsyncpa [#allocation15], 0 }
   0x5   :  { %22 = vsyncpa [#allocation5], 0  ;;  %s8453_s21 = smov [#allocation8]   ;;  %s8255_s25 = scalar_lea.hbm %s10725_s2, 6144 }
   0x6   :  { %s48_s22 = sshll.u32 %s8453_s21, 4  ;;  %p8256_p0 = scmp.ne.s32.totalorder %s10725_s2, %s8255_s25  ;;  %s49_s22 = int_to_ptr.vmem [resolvable:$true] %s48_s22 }
   0x7   :  { %p8259_p1 = scmp.lt.u32.totalorder %s8255_s25, %s10725_s2 }
   0x9   :  { %p8261_p2 = pnand %p8259_p1, %p8256_p0 }
   0xb   :  { %8264 = shalt.err (!%p8261_p2)
}
   0xc   :  { %s8265_s30 = scalar_lea.vmem %s49_s22, 6144  ;;  %p8270_p4 = scmp.lt.s32.totalorder %s49_s22, %s49_s22 }
   0xd   :  { %p8266_p3 = scmp.ne.s32.totalorder %s49_s22, %s8265_s30  ;;  %p8271_p5 = scmp.lt.s32.totalorder %s8265_s30, %s8265_s30 }
   0xf   :  { %p8272_p6 = por %p8271_p5, %p8270_p4 }
  0x11   :  { %p8273_p7 = pnand %p8272_p6, %p8266_p3 }
  0x13   :  { %8276 = shalt.err (!%p8273_p7)
}
  0x14   :  { %s8454_s13 = smov 128   ;;  %s8455_s14 = smov 8  }
  0x15   :  { %54 = dma.hbm_to_vmem [thread:$0]  %s10725_s2, 6144, %s49_s22, [#allocation9], %s8454_s13, %s8454_s13, %s8455_s14  }
  0x16   :  { %s8456_s17 = smov [#allocation11]   ;;  %s8457_s19 = smov [#allocation14]  }
  0x17   :  { %s72_s18 = sshll.u32 %s8456_s17, 4  ;;  %s96_s20 = sshll.u32 %s8457_s19, 4  ;;  %s73_s18 = int_to_ptr.vmem [resolvable:$true] %s72_s18  ;;  %s97_s20 = int_to_ptr.vmem [resolvable:$true] %s96_s20 }
  0x18   :  { %s8277_s24 = scalar_lea.hbm %s10727_s4, 6144 }
  0x19   :  { %p8278_p8 = scmp.ne.s32.totalorder %s10727_s4, %s8277_s24  ;;  %p8281_p9 = scmp.lt.u32.totalorder %s8277_s24, %s10727_s4 }
  0x1b   :  { %p8283_p10 = pnand %p8281_p9, %p8278_p8 }
  0x1d   :  { %8286 = shalt.err (!%p8283_p10)
}
  0x1e   :  { %s8287_s2 = scalar_lea.vmem %s73_s18, 6144  ;;  %p8292_p12 = scmp.lt.s32.totalorder %s73_s18, %s73_s18 }
  0x1f   :  { %p8288_p11 = scmp.ne.s32.totalorder %s73_s18, %s8287_s2  ;;  %p8293_p13 = scmp.lt.s32.totalorder %s8287_s2, %s8287_s2 }
  0x21   :  { %p8294_p0 = por %p8293_p13, %p8292_p12 }
  0x23   :  { %p8295_p1 = pnand %p8294_p0, %p8288_p11 }
  0x25   :  { %8298 = shalt.err (!%p8295_p1)
}
  0x26   :  { %78 = dma.hbm_to_vmem [thread:$0]  %s10727_s4, 6144, %s73_s18, [#allocation12], %s8454_s13, %s8454_s13, %s8455_s14  }
  0x27   :  { %s8299_s16 = scalar_lea.hbm %s10729_s6, 6144 }
  0x28   :  { %p8300_p2 = scmp.ne.s32.totalorder %s10729_s6, %s8299_s16  ;;  %p8303_p3 = scmp.lt.u32.totalorder %s8299_s16, %s10729_s6 }
  0x2a   :  { %p8305_p4 = pnand %p8303_p3, %p8300_p2 }
  0x2c   :  { %8308 = shalt.err (!%p8305_p4)
}
  0x2d   :  { %s8309_s24 = scalar_lea.vmem %s97_s20, 6144  ;;  %p8314_p6 = scmp.lt.s32.totalorder %s97_s20, %s97_s20 }
  0x2e   :  { %p8310_p5 = scmp.ne.s32.totalorder %s97_s20, %s8309_s24  ;;  %p8315_p7 = scmp.lt.s32.totalorder %s8309_s24, %s8309_s24 }
  0x30   :  { %p8316_p8 = por %p8315_p7, %p8314_p6 }
  0x32   :  { %p8317_p9 = pnand %p8316_p8, %p8310_p5 }
  0x34   :  { %8320 = shalt.err (!%p8317_p9)
}
  0x35   :  { %102 = dma.hbm_to_vmem [thread:$0]  %s10729_s6, 6144, %s97_s20, [#allocation15], %s8454_s13, %s8454_s13, %s8455_s14  }
  0x36   :  { %s8321_s27 = scalar_lea.hbm %s10723_s0, 16 }
  0x37   :  { %p8322_p10 = scmp.ne.s32.totalorder %s10723_s0, %s8321_s27  ;;  %p8325_p11 = scmp.lt.u32.totalorder %s8321_s27, %s10723_s0 }
  0x39   :  { %p8327_p12 = pnand %p8325_p11, %p8322_p10 }
  0x3b   :  { %8330 = shalt.err (!%p8327_p12)
}
  0x3c   :  { %s8458_s30 = smov [#allocation3]   ;;  %s8459_s6 = smov [#allocation7]  }
  0x3d   :  { %30 = dma.hbm_to_smem %s10723_s0, 16, %s8458_s30, [#allocation6]  }
  0x3e   :  { %s36_s20 = sshll.u32 %s8459_s6, 4  ;;  %s8331_s21 = scalar_lea.hbm %s10724_s1, 4096  ;;  %s37_s20 = int_to_ptr.vmem [resolvable:$true] %s36_s20 }
  0x3f   :  { %p8332_p13 = scmp.ne.s32.totalorder %s10724_s1, %s8331_s21  ;;  %p8335_p0 = scmp.lt.u32.totalorder %s8331_s21, %s10724_s1 }
  0x41   :  { %p8337_p1 = pnand %p8335_p0, %p8332_p13 }
  0x43   :  { %8340 = shalt.err (!%p8337_p1)
}
  0x44   :  { %s8341_s25 = scalar_lea.vmem %s37_s20, 4096  ;;  %p8346_p3 = scmp.lt.s32.totalorder %s37_s20, %s37_s20 }
  0x45   :  { %p8342_p2 = scmp.ne.s32.totalorder %s37_s20, %s8341_s25  ;;  %p8347_p4 = scmp.lt.s32.totalorder %s8341_s25, %s8341_s25 }
  0x47   :  { %p8348_p5 = por %p8347_p4, %p8346_p3 }
  0x49   :  { %p8349_p6 = pnand %p8348_p5, %p8342_p2 }
  0x4b   :  { %8352 = shalt.err (!%p8349_p6)
}
  0x4c   :  { %s8460_s0 = smov 1024   ;;  %s8461_s26 = smov 64  }
  0x4d   :  { %42 = dma.hbm_to_vmem [thread:$0]  %s10724_s1, 4096, %s37_s20, [#allocation4], %s8460_s0, %s8460_s0, %s8461_s26  }
  0x4e   :  { %s8462_s2 = smov [#allocation10]   ;;  %s8463_s29 = smov [#allocation13]  }
  0x4f   :  { %s60_s22 = sshll.u32 %s8462_s2, 4  ;;  %s84_s30 = sshll.u32 %s8463_s29, 4  ;;  %s61_s22 = int_to_ptr.vmem [resolvable:$true] %s60_s22  ;;  %s85_s30 = int_to_ptr.vmem [resolvable:$true] %s84_s30 }
  0x50   :  { %s8353_s6 = scalar_lea.hbm %s10726_s3, 6144 }
  0x51   :  { %p8354_p7 = scmp.ne.s32.totalorder %s10726_s3, %s8353_s6  ;;  %p8357_p8 = scmp.lt.u32.totalorder %s8353_s6, %s10726_s3 }
  0x53   :  { %p8359_p9 = pnand %p8357_p8, %p8354_p7 }
  0x55   :  { %8362 = shalt.err (!%p8359_p9)
}
  0x56   :  { %s8363_s1 = scalar_lea.vmem %s61_s22, 6144  ;;  %p8368_p11 = scmp.lt.s32.totalorder %s61_s22, %s61_s22 }
  0x57   :  { %p8364_p10 = scmp.ne.s32.totalorder %s61_s22, %s8363_s1  ;;  %p8369_p12 = scmp.lt.s32.totalorder %s8363_s1, %s8363_s1 }
  0x59   :  { %p8370_p13 = por %p8369_p12, %p8368_p11 }
  0x5b   :  { %p8371_p0 = pnand %p8370_p13, %p8364_p10 }
  0x5d   :  { %8374 = shalt.err (!%p8371_p0)
}
  0x5e   :  { %66 = dma.hbm_to_vmem [thread:$0]  %s10726_s3, 6144, %s61_s22, [#allocation9], %s8454_s13, %s8454_s13, %s8455_s14  }
  0x5f   :  { %s8375_s25 = scalar_lea.hbm %s10728_s5, 6144 }
  0x60   :  { %p8376_p1 = scmp.ne.s32.totalorder %s10728_s5, %s8375_s25  ;;  %p8379_p2 = scmp.lt.u32.totalorder %s8375_s25, %s10728_s5 }
  0x62   :  { %p8381_p3 = pnand %p8379_p2, %p8376_p1 }
  0x64   :  { %8384 = shalt.err (!%p8381_p3)
}
  0x65   :  { %s8385_s15 = scalar_lea.vmem %s85_s30, 6144  ;;  %p8390_p5 = scmp.lt.s32.totalorder %s85_s30, %s85_s30 }
  0x66   :  { %p8386_p4 = scmp.ne.s32.totalorder %s85_s30, %s8385_s15  ;;  %p8391_p6 = scmp.lt.s32.totalorder %s8385_s15, %s8385_s15 }
  0x68   :  { %p8392_p7 = por %p8391_p6, %p8390_p5 }
  0x6a   :  { %p8393_p8 = pnand %p8392_p7, %p8386_p4 }
  0x6c   :  { %8396 = shalt.err (!%p8393_p8)
}
  0x6d   :  { %90 = dma.hbm_to_vmem [thread:$0]  %s10728_s5, 6144, %s85_s30, [#allocation12], %s8454_s13, %s8454_s13, %s8455_s14  }
  0x6e   :  { %s8464_s16 = smov [#allocation16]   ;;  %s8397_s21 = scalar_lea.hbm %s10730_s7, 6144 }
  0x6f   :  { %s108_s6 = sshll.u32 %s8464_s16, 4  ;;  %p8398_p9 = scmp.ne.s32.totalorder %s10730_s7, %s8397_s21  ;;  %s109_s6 = int_to_ptr.vmem [resolvable:$true] %s108_s6 }
  0x70   :  { %p8401_p10 = scmp.lt.u32.totalorder %s8397_s21, %s10730_s7 }
  0x72   :  { %p8403_p11 = pnand %p8401_p10, %p8398_p9 }
  0x74   :  { %8406 = shalt.err (!%p8403_p11)
}
  0x75   :  { %s8407_s4 = scalar_lea.vmem %s109_s6, 6144  ;;  %p8412_p13 = scmp.lt.s32.totalorder %s109_s6, %s109_s6 }
  0x76   :  { %p8408_p12 = scmp.ne.s32.totalorder %s109_s6, %s8407_s4  ;;  %p8413_p0 = scmp.lt.s32.totalorder %s8407_s4, %s8407_s4 }
  0x78   :  { %p8414_p1 = por %p8413_p0, %p8412_p13 }
  0x7a   :  { %p8415_p2 = pnand %p8414_p1, %p8408_p12 }
  0x7c   :  { %8418 = shalt.err (!%p8415_p2)
}
  0x7d   :  { %114 = dma.hbm_to_vmem [thread:$0]  %s10730_s7, 6144, %s109_s6, [#allocation15], %s8454_s13, %s8454_s13, %s8455_s14  }
  0x7e   :  { %8441 = dma.done.wait [#allocation6], 16  }
  0x7f   :  { %8442 = vsyncadd [#allocation6], 4294967280 }
  0x80   :  { %8443 = dma.done.wait [#allocation4], 4096  }
  0x81   :  { %8444 = vsyncadd [#allocation4], 4294963200 }
  0x82   :  { %8445 = dma.done.wait [#allocation9], 12288  }
  0x83   :  { %8446 = vsyncadd [#allocation9], 4294955008 }
  0x84   :  { %8447 = dma.done.wait [#allocation12], 12288  }
  0x85   :  { %8448 = vsyncadd [#allocation12], 4294955008 }
  0x86   :  { %8449 = dma.done.wait [#allocation15], 12288  }
  0x87   :  { %8450 = vsyncadd [#allocation15], 4294955008 }
  0x88   :  { %147 = sfence }
  0x89   :  { %v251_v0 = vld [vmem:[#allocation7 + $0x80] sm:$0xff]  ;;  %v252_v1 = vld [vmem:[#allocation7 + $0x88] sm:$0xff]  ;;  %vm225_vm0 = vcmask 519168   ;;  %vm230_vm1 = vcmask 1043968   ;;  %v10736_v10 = vmov 0   ;;  %v245_v13 = vld [vmem:[#allocation7 + $0x50] sm:$0xff] }
  0x8a   :  { %v235_v2 = vld [vmem:[#allocation7] sm:$0xff]  ;;  %v7427_v3 = vpack.c.bf16 %v252_v1, %v251_v0  ;;  %v236_v4 = vld [vmem:[#allocation7 + $0x8] sm:$0xff]  ;;  %228 = vst.msk [vmem:[#allocation2 + $0xfc] sm:$0xf] %vm225_vm0, %v10736_v10  ;;  %226 = vst.msk [vmem:[#allocation2 + $0x48] sm:$0xf] %vm225_vm0, %v10736_v10 }
  0x8b   :  { %v259_v5 = vld [vmem:[#allocation7 + $0xc0] sm:$0xff]  ;;  %v260_v6 = vld [vmem:[#allocation7 + $0xc8] sm:$0xff]  ;;  %v7419_v7 = vpack.c.bf16 %v236_v4, %v235_v2  ;;  %227 = vst.msk [vmem:[#allocation2 + $0x6c] sm:$0xf] %vm225_vm0, %v10736_v10  ;;  %229 = vst.msk [vmem:[#allocation2 + $0x120] sm:$0xf] %vm225_vm0, %v10736_v10 }
  0x8c   :  { %v243_v8 = vld [vmem:[#allocation7 + $0x40] sm:$0xff]  ;;  %v244_v9 = vld [vmem:[#allocation7 + $0x48] sm:$0xff]  ;;  %231 = vst.msk [vmem:[#allocation2 + $0x68] sm:$0xf] %vm230_vm1, %v10736_v10  ;;  %232 = vst.msk [vmem:[#allocation2 + $0x8c] sm:$0xf] %vm230_vm1, %v10736_v10  ;;  %363 = vrot.lane.b32.xlu1 %v7427_v3, %s8461_s26  ;;  %v7431_v11 = vpack.c.bf16 %v260_v6, %v259_v5 }
  0x8d   :  { %233 = vst.msk [vmem:[#allocation2 + $0x11c] sm:$0xf] %vm230_vm1, %v10736_v10  ;;  %234 = vst.msk [vmem:[#allocation2 + $0x140] sm:$0xf] %vm230_vm1, %v10736_v10  ;;  %347 = vrot.lane.b32.xlu0 %v7419_v7, %s8461_s26  ;;  %v7423_v12 = vpack.c.bf16 %v244_v9, %v243_v8  ;;  %v246_v14 = vld [vmem:[#allocation7 + $0x58] sm:$0xff]  ;;  %v237_v15 = vld [vmem:[#allocation7 + $0x10] sm:$0xff] }
  0x8e   :  { %v238_v16 = vld [vmem:[#allocation7 + $0x18] sm:$0xff]  ;;  %v7424_v17 = vpack.c.bf16 %v246_v14, %v245_v13  ;;  %v261_v19 = vld [vmem:[#allocation7 + $0xd0] sm:$0xff]  ;;  %v247_v23 = vld [vmem:[#allocation7 + $0x60] sm:$0xff]  ;;  %vm152_vm2 = vsmask.f32 7950  ;;  %vm151_vm3 = vcmask 1043459  }
  0x8f   :  { %v7420_v18 = vpack.c.bf16 %v238_v16, %v237_v15  ;;  %v262_v20 = vld [vmem:[#allocation7 + $0xd8] sm:$0xff]  ;;  %v253_v21 = vld [vmem:[#allocation7 + $0x90] sm:$0xff]  ;;  %v248_v24 = vld [vmem:[#allocation7 + $0x68] sm:$0xff]  ;;  %vm155_vm4 = vsmask.f32 7966  ;;  %vm154_vm5 = vcmask 1047559  }
  0x90   :  { %371 = vrot.lane.b32.xlu1 %v7431_v11, %s8461_s26  ;;  %v254_v22 = vld [vmem:[#allocation7 + $0x98] sm:$0xff]  ;;  %v7432_v25 = vpack.c.bf16 %v262_v20, %v261_v19  ;;  %v239_v26 = vld [vmem:[#allocation7 + $0x20] sm:$0xff]  ;;  %v240_v31 = vld [vmem:[#allocation7 + $0x28] sm:$0xff]  ;;  %v7425_v34 = vpack.c.bf16 %v248_v24, %v247_v23  ;;  %vm189_vm9 = vsmask.f32 256  ;;  %vm188_vm10 = vcmask 1040384  }
  0x91   :  { %355 = vrot.lane.b32.xlu0 %v7423_v12, %s8461_s26  ;;  %v7785_v27 = vld [vmem:[#allocation10 + $0x4] ss:$8 sps:$4 sm:$0xff]   ;;  %v7787_v28 = vld [vmem:[#allocation10] ss:$8 sps:$4 sm:$0xff]   ;;  %v7428_v29 = vpack.c.bf16 %v254_v22, %v253_v21  ;;  %v7788_v30 = vld [vmem:[#allocation10 + $0x14] ss:$8 sps:$4 sm:$0xff]   ;;  %v7421_v37 = vpack.c.bf16 %v240_v31, %v239_v26 }
  0x92   :  { %1429 = vmatprep.subr.bf16.mxu0 %v7785_v27  ;;  %v263_v32 = vld [vmem:[#allocation7 + $0xe0] sm:$0xff]  ;;  %v7790_v33 = vld [vmem:[#allocation10 + $0x10] ss:$8 sps:$4 sm:$0xff]   ;;  %v264_v35 = vld [vmem:[#allocation7 + $0xe8] sm:$0xff]  ;;  %vm191_vm11 = vcmask 1044484   ;;  %s6922_s2 = sld [smem:[#allocation3 + $0x1]] }
  0x93   :  { %1430 = vmatpush1.bf16.msra.mxu0 %v7787_v28  ;;  %v7791_v36 = vld [vmem:[#allocation10 + $0x24] ss:$8 sps:$4 sm:$0xff]   ;;  %v249_v40 = vld [vmem:[#allocation7 + $0x70] sm:$0xff]  ;;  %v7793_v41 = vld [vmem:[#allocation10 + $0x20] ss:$8 sps:$4 sm:$0xff]   ;;  %v7433_v42 = vpack.c.bf16 %v264_v35, %v263_v32 }
  0x94   :  { %357 = vrot.lane.b32.xlu1 %v7424_v17, %s8461_s26  ;;  %1431 = vmatprep.subr.bf16.mxu0 %v7788_v30  ;;  %v255_v38 = vld [vmem:[#allocation7 + $0xa0] sm:$0xff]  ;;  %v256_v39 = vld [vmem:[#allocation7 + $0xa8] sm:$0xff]  ;;  %v250_v43 = vld [vmem:[#allocation7 + $0x78] sm:$0xff]  ;;  %vm192_vm12 = vsmask.f32 4352 }
  0x95   :  { %349 = vrot.lane.b32.xlu0 %v7420_v18, %s8461_s26  ;;  %v7794_v44 = vld [vmem:[#allocation10 + $0x34] ss:$8 sps:$4 sm:$0xff]   ;;  %v7429_v45 = vpack.c.bf16 %v256_v39, %v255_v38  ;;  %v7796_v49 = vld [vmem:[#allocation10 + $0x30] ss:$8 sps:$4 sm:$0xff]   ;;  %v7426_v50 = vpack.c.bf16 %v250_v43, %v249_v40  ;;  %v7797_v52 = vld [vmem:[#allocation10 + $0x44] ss:$8 sps:$4 sm:$0xff]  }
  0x96   :  { %v241_v46 = vld [vmem:[#allocation7 + $0x30] sm:$0xff]  ;;  %v242_v47 = vld [vmem:[#allocation7 + $0x38] sm:$0xff]  ;;  %v7799_v56 = vld [vmem:[#allocation10 + $0x40] ss:$8 sps:$4 sm:$0xff]  }
  0x97   :  { %1432 = vmatpush1.bf16.msra.mxu0 %v7790_v33  ;;  %v265_v48 = vld [vmem:[#allocation7 + $0xf0] sm:$0xff]  ;;  %v266_v51 = vld [vmem:[#allocation7 + $0xf8] sm:$0xff]  ;;  %v7422_v53 = vpack.c.bf16 %v242_v47, %v241_v46  ;;  %v7803_v61 = vld [vmem:[#allocation10 + $0x64] ss:$8 sps:$4 sm:$0xff]  }
  0x98   :  { %373 = vrot.lane.b32.xlu1 %v7432_v25, %s8461_s26  ;;  %1433 = vmatprep.subr.bf16.mxu0 %v7791_v36  ;;  %v257_v54 = vld [vmem:[#allocation7 + $0xb0] sm:$0xff]  ;;  %v258_v55 = vld [vmem:[#allocation7 + $0xb8] sm:$0xff]  ;;  %v7434_v57 = vpack.c.bf16 %v266_v51, %v265_v48  ;;  %v7805_v62 = vld [vmem:[#allocation10 + $0x60] ss:$8 sps:$4 sm:$0xff]  }
  0x99   :  { %365 = vrot.lane.b32.xlu0 %v7428_v29, %s8461_s26  ;;  %v7800_v58 = vld [vmem:[#allocation10 + $0x54] ss:$8 sps:$4 sm:$0xff]   ;;  %v7430_v59 = vpack.c.bf16 %v258_v55, %v257_v54  ;;  %v7802_v60 = vld [vmem:[#allocation10 + $0x50] ss:$8 sps:$4 sm:$0xff]   ;;  %v7809_v1 = vld [vmem:[#allocation10 + $0x84] ss:$8 sps:$4 sm:$0xff]  }
  0x9a   :  { %v7806_v63 = vld [vmem:[#allocation10 + $0x74] ss:$8 sps:$4 sm:$0xff]   ;;  %v7808_v0 = vld [vmem:[#allocation10 + $0x70] ss:$8 sps:$4 sm:$0xff]   ;;  %v7811_v2 = vld [vmem:[#allocation10 + $0x80] ss:$8 sps:$4 sm:$0xff]  }
  0x9b   :  { %1434 = vmatpush1.bf16.msra.mxu0 %v7793_v41  ;;  %v7812_v3 = vld [vmem:[#allocation10 + $0x94] ss:$8 sps:$4 sm:$0xff]   ;;  %v7814_v4 = vld [vmem:[#allocation10 + $0x90] ss:$8 sps:$4 sm:$0xff]   ;;  %v7815_v5 = vld [vmem:[#allocation10 + $0xa4] ss:$8 sps:$4 sm:$0xff]  }
  0x9c   :  { %359 = vrot.lane.b32.xlu1 %v7425_v34, %s8461_s26  ;;  %1435 = vmatprep.subr.bf16.mxu0 %v7794_v44  ;;  %v7817_v6 = vld [vmem:[#allocation10 + $0xa0] ss:$8 sps:$4 sm:$0xff]   ;;  %v7818_v7 = vld [vmem:[#allocation10 + $0xb4] ss:$8 sps:$4 sm:$0xff]   ;;  %v7820_v8 = vld [vmem:[#allocation10 + $0xb0] ss:$8 sps:$4 sm:$0xff]  }
  0x9d   :  { %351 = vrot.lane.b32.xlu0 %v7421_v37, %s8461_s26  ;;  %vm8681_vm6 = vmand %vm151_vm3, %vm152_vm2  ;;  %v158_v11 = vld [vmem:[#allocation2 + $0x24] sm:$0x88]  ;;  %v7821_v13 = vld [vmem:[#allocation10 + $0xc4] ss:$8 sps:$4 sm:$0xff]   ;;  %vm445_vm2 = vcmask 1047556   ;;  %vm395_vm3 = vcmask 523264  }
  0x9e   :  { %vm156_vm7 = vmand %vm154_vm5, %vm155_vm4  ;;  %v173_v15 = vld [vmem:[#allocation2 + $0xd8] sm:$0x88]  ;;  %v161_v17 = vld [vmem:[#allocation2 + $0x2c] sm:$0x88]  ;;  %vm479_vm5 = vsmask.f32 4368 }
  0x9f   :  { %1436 = vmatpush1.bf16.msra.mxu0 %v7796_v49  ;;  %vm8687_vm8 = vmor %vm156_vm7, %vm8681_vm6  ;;  %v176_v19 = vld [vmem:[#allocation2 + $0xe0] sm:$0x88]  ;;  %v7823_v20 = vld [vmem:[#allocation10 + $0xc0] ss:$8 sps:$4 sm:$0xff]   ;;  %vm2133_vm7 = vsmask.f32 3328 }
  0xa0   :  { %375 = vrot.lane.b32.xlu1 %v7433_v42, %s8461_s26  ;;  %1437 = vmatprep.subr.bf16.mxu0 %v7797_v52  ;;  %v159_v14 = vsel %vm8687_vm8, 0, %v158_v11  ;;  %v174_v16 = vsel %vm8687_vm8, 0, %v173_v15  ;;  %v162_v18 = vsel %vm8687_vm8, 0, %v161_v17  ;;  %v7824_v21 = vld [vmem:[#allocation10 + $0xd4] ss:$8 sps:$4 sm:$0xff]   ;;  %v177_v22 = vsel %vm8687_vm8, 0, %v176_v19  ;;  %vm8708_vm13 = vmand %vm188_vm10, %vm189_vm9 }
  0xa1   :  { %367 = vrot.lane.b32.xlu0 %v7429_v45, %s8461_s26  ;;  %160 = vst [vmem:[#allocation2 + $0x24] sm:$0x88] %v159_v14  ;;  %175 = vst [vmem:[#allocation2 + $0xd8] sm:$0x88] %v174_v16  ;;  %v164_v23 = vld [vmem:[#allocation2 + $0x34] sm:$0x88] }
  0xa2   :  { %163 = vst [vmem:[#allocation2 + $0x2c] sm:$0x88] %v162_v18  ;;  %178 = vst [vmem:[#allocation2 + $0xe0] sm:$0x88] %v177_v22  ;;  %v7826_v24 = vld [vmem:[#allocation10 + $0xd0] ss:$8 sps:$4 sm:$0xff]  }
  0xa3   :  { %1438 = vmatpush1.bf16.msra.mxu0 %v7799_v56  ;;  %v165_v25 = vsel %vm8687_vm8, 0, %v164_v23  ;;  %v179_v26 = vld [vmem:[#allocation2 + $0xe8] sm:$0x88]  ;;  %v167_v28 = vld [vmem:[#allocation2 + $0x3c] sm:$0x88]  ;;  %vm193_vm14 = vmand %vm191_vm11, %vm192_vm12 }
  0xa4   :  { %361 = vrot.lane.b32.xlu1 %v7426_v50, %s8461_s26  ;;  %1439 = vmatprep.subr.bf16.mxu0 %v7800_v58  ;;  %166 = vst [vmem:[#allocation2 + $0x34] sm:$0x88] %v165_v25  ;;  %v180_v27 = vsel %vm8687_vm8, 0, %v179_v26  ;;  %v168_v29 = vsel %vm8687_vm8, 0, %v167_v28  ;;  %v182_v30 = vld [vmem:[#allocation2 + $0xf0] sm:$0x88]  ;;  %vm8714_vm15 = vmor %vm193_vm14, %vm8708_vm13 }
  0xa5   :  { %353 = vrot.lane.b32.xlu0 %v7422_v53, %s8461_s26  ;;  %181 = vst [vmem:[#allocation2 + $0xe8] sm:$0x88] %v180_v27  ;;  %v7827_v31 = vld [vmem:[#allocation10 + $0xe4] ss:$8 sps:$4 sm:$0xff]   ;;  %169 = vst [vmem:[#allocation2 + $0x3c] sm:$0x88] %v168_v29 }
  0xa6   :  { %v183_v32 = vsel %vm8687_vm8, 0, %v182_v30  ;;  %v7829_v33 = vld [vmem:[#allocation10 + $0xe0] ss:$8 sps:$4 sm:$0xff]   ;;  %v7830_v34 = vld [vmem:[#allocation10 + $0xf4] ss:$8 sps:$4 sm:$0xff]   ;;  %vm8739_vm4 = vmor %vm445_vm2, %vm230_vm1  ;;  %vm397_vm1 = vcmask 1043456  }
  0xa7   :  { %1440 = vmatpush1.bf16.msra.mxu0 %v7802_v60  ;;  %184 = vst [vmem:[#allocation2 + $0xf0] sm:$0x88] %v183_v32  ;;  %v7832_v35 = vld [vmem:[#allocation10 + $0xf0] ss:$8 sps:$4 sm:$0xff]   ;;  %v7836_v36 = vld [vmem:[#allocation10 + $0x104] ss:$8 sps:$4 sm:$0xff]  }
  0xa8   :  { %377 = vrot.lane.b32.xlu1 %v7434_v57, %s8461_s26  ;;  %1441 = vmatprep.subr.bf16.mxu0 %v7803_v61  ;;  %v170_v39 = vld [vmem:[#allocation2 + $0x44] sm:$0x8]  ;;  %v195_v41 = vld [vmem:[#allocation2 + $0x90] sm:$0x11]  ;;  %v210_v43 = vld [vmem:[#allocation2 + $0x144] sm:$0x11] }
  0xa9   :  { %369 = vrot.lane.b32.xlu0 %v7430_v59, %s8461_s26  ;;  %v171_v40 = vsel %vm8681_vm6, 0, %v170_v39  ;;  %v196_v42 = vsel %vm8714_vm15, 0, %v195_v41  ;;  %v211_v44 = vsel %vm8714_vm15, 0, %v210_v43  ;;  %v198_v45 = vld [vmem:[#allocation2 + $0x98] sm:$0x11] }
  0xaa   :  { %172 = vst [vmem:[#allocation2 + $0x44] sm:$0x8] %v171_v40  ;;  %197 = vst [vmem:[#allocation2 + $0x90] sm:$0x11] %v196_v42  ;;  %v199_v46 = vsel %vm8714_vm15, 0, %v198_v45 }
  0xab   :  { %1442 = vmatpush1.bf16.msra.mxu0 %v7805_v62  ;;  %212 = vst [vmem:[#allocation2 + $0x144] sm:$0x11] %v211_v44  ;;  %200 = vst [vmem:[#allocation2 + $0x98] sm:$0x11] %v199_v46  ;;  %v213_v47 = vld [vmem:[#allocation2 + $0x14c] sm:$0x11] }
  0xac   :  { %1443 = vmatprep.subr.bf16.mxu0 %v7806_v63  ;;  %v185_v48 = vld [vmem:[#allocation2 + $0xf8] sm:$0x8]  ;;  %v214_v49 = vsel %vm8714_vm15, 0, %v213_v47  ;;  %v201_v50 = vld [vmem:[#allocation2 + $0xa0] sm:$0x11] }
  0xad   :  { %v186_v51 = vsel %vm8681_vm6, 0, %v185_v48  ;;  %215 = vst [vmem:[#allocation2 + $0x14c] sm:$0x11] %v214_v49  ;;  %v202_v52 = vsel %vm8714_vm15, 0, %v201_v50  ;;  %v216_v53 = vld [vmem:[#allocation2 + $0x154] sm:$0x11]  ;;  %vm8842_vm6 = vmor %vm189_vm9, %vm479_vm5 }
  0xae   :  { %187 = vst [vmem:[#allocation2 + $0xf8] sm:$0x8] %v186_v51  ;;  %203 = vst [vmem:[#allocation2 + $0xa0] sm:$0x11] %v202_v52  ;;  %v217_v54 = vsel %vm8714_vm15, 0, %v216_v53 }
  0xaf   :  { %1444 = vmatpush1.bf16.msra.mxu0 %v7808_v0  ;;  %218 = vst [vmem:[#allocation2 + $0x154] sm:$0x11] %v217_v54  ;;  %v204_v55 = vld [vmem:[#allocation2 + $0xa8] sm:$0x11]  ;;  %v219_v57 = vld [vmem:[#allocation2 + $0x15c] sm:$0x11] }
  0xb0   :  { %1445 = vmatprep.subr.bf16.mxu0 %v7809_v1  ;;  %v205_v56 = vsel %vm8714_vm15, 0, %v204_v55  ;;  %v220_v58 = vsel %vm8714_vm15, 0, %v219_v57  ;;  %v7839_v46 = vld [vmem:[#allocation10 + $0x110] ss:$8 sps:$4 sm:$0xff]   ;;  %v7845_v47 = vld [vmem:[#allocation10 + $0x124] ss:$8 sps:$4 sm:$0xff]  }
  0xb1   :  { %206 = vst [vmem:[#allocation2 + $0xa8] sm:$0x11] %v205_v56  ;;  %221 = vst [vmem:[#allocation2 + $0x15c] sm:$0x11] %v220_v58  ;;  %v569_v49 = vld [vmem:[#allocation2 + $0x2c] sm:$0x88] }
  0xb2   :  { %v575_v52 = vld [vmem:[#allocation2 + $0xe0] sm:$0x88]  ;;  %v7843_v56 = vld [vmem:[#allocation10 + $0x120] ss:$8 sps:$4 sm:$0xff]   ;;  %v669_v57 = vld [vmem:[#allocation2 + $0x34] sm:$0x88] }
  0xb3   :  { %1446 = vmatpush1.bf16.msra.mxu0 %v7811_v2  ;;  %vm2134_vm8 = vsmask.f32 7440 }
  0xb4   :  { %1447 = vmatprep.subr.bf16.mxu0 %v7812_v3  ;;  %vm9173_vm9 = vmor %vm2133_vm7, %vm2134_vm8 }
  0xb7   :  { %1448 = vmatpush1.bf16.msra.mxu0 %v7814_v4 }
  0xb8   :  { %1449 = vmatprep.subr.bf16.mxu0 %v7815_v5 }
  0xbb   :  { %1450 = vmatpush1.bf16.msra.mxu0 %v7817_v6 }
  0xbc   :  { %1451 = vmatprep.subr.bf16.mxu0 %v7818_v7 }
  0xbf   :  { %1452 = vmatpush1.bf16.msra.mxu0 %v7820_v8 }
  0xc0   :  { %1453 = vmatprep.subr.bf16.mxu0 %v7821_v13 }
  0xc3   :  { %1454 = vmatpush1.bf16.msra.mxu0 %v7823_v20 }
  0xc4   :  { %1455 = vmatprep.subr.bf16.mxu0 %v7824_v21 }
  0xc7   :  { %1456 = vmatpush1.bf16.msra.mxu0 %v7826_v24 }
  0xc8   :  { %1457 = vmatprep.subr.bf16.mxu0 %v7827_v31 }
  0xcb   :  { %1458 = vmatpush1.bf16.msra.mxu0 %v7829_v33 }
  0xcc   :  { %1459 = vmatprep.subr.bf16.mxu0 %v7830_v34  ;;  %v7834_v34 = vld [vmem:[#allocation10 + $0x100] ss:$8 sps:$4 sm:$0xff]  }
  0xcf   :  { %1460 = vmatpush1.bf16.msra.mxu0 %v7832_v35 }
  0xd0   :  { %1542 = vmatprep.subr.bf16.mxu0 %v7836_v36  ;;  %v7841_v36 = vld [vmem:[#allocation10 + $0x114] ss:$8 sps:$4 sm:$0xff]  }
  0xfe   :  { %v364_v59 = vpop.permute.xlu1 %363 }
  0xff   :  { %v387_v60 = vrot.slane %v364_v59, 4  ;;  %v348_v62 = vpop.permute.xlu0 %347 }
 0x100   :  { %v379_v63 = vrot.slane %v348_v62, 4 }
 0x101   :  { %v411_v0 = vsel %vm395_vm3, %v387_v60, %v364_v59 }
 0x102   :  { %457 = vst.msk [vmem:[#allocation2 + $0xfc] sm:$0xff] %vm8739_vm4, %v411_v0  ;;  %v396_v1 = vsel %vm395_vm3, %v379_v63, %v348_v62  ;;  %v372_v2 = vpop.permute.xlu1 %371  ;;  %v7848_v62 = vld [vmem:[#allocation10 + $0x134] ss:$8 sps:$4 sm:$0xff]  }
 0x103   :  { %447 = vst.msk [vmem:[#allocation2 + $0x48] sm:$0xff] %vm8739_vm4, %v396_v1  ;;  %v391_v3 = vrot.slane %v372_v2, 4  ;;  %v356_v4 = vpop.permute.xlu0 %355 }
 0x104   :  { %v383_v5 = vrot.slane %v356_v4, 4 }
 0x105   :  { %v418_v6 = vsel %vm395_vm3, %v391_v3, %v372_v2 }
 0x106   :  { %462 = vst.msk [vmem:[#allocation2 + $0x120] sm:$0xff] %vm8739_vm4, %v418_v6  ;;  %v404_v7 = vsel %vm395_vm3, %v383_v5, %v356_v4  ;;  %v358_v8 = vpop.permute.xlu1 %357  ;;  %v675_v4 = vld [vmem:[#allocation2 + $0xe8] sm:$0x88] }
 0x107   :  { %452 = vst.msk [vmem:[#allocation2 + $0x6c] sm:$0xff] %vm8739_vm4, %v404_v7  ;;  %v384_v9 = vrot.slane %v358_v8, 4  ;;  %v350_v11 = vpop.permute.xlu0 %349  ;;  %v682_v7 = vshrl.u32 %v669_v57, 16 }
 0x108   :  { %v380_v12 = vrot.slane %v350_v11, 4 }
 0x109   :  { %v405_v13 = vsel %vm397_vm1, %v383_v5, %v384_v9  ;;  %v8766_v22 = vld [vmem:[#allocation2 + $0xfc] sm:$0xff] }
 0x10a   :  { %v8757_v14 = vsel %vm395_vm3, %v405_v13, %v358_v8  ;;  %v398_v15 = vsel %vm397_vm1, %v379_v63, %v380_v12  ;;  %v374_v16 = vpop.permute.xlu1 %373  ;;  %v8774_v27 = vld [vmem:[#allocation2 + $0x48] sm:$0xff]  ;;  %v582_v63 = vshrl.u32 %v569_v49, 16  ;;  %v8832_v13 = vld [vmem:[#allocation2 + $0x3c] sm:$0x88] }
 0x10b   :  { %453 = vst [vmem:[#allocation2 + $0x74] sm:$0xff] %v8757_v14  ;;  %v8762_v17 = vsel %vm395_vm3, %v398_v15, %v350_v11  ;;  %v392_v18 = vrot.slane %v374_v16, 4  ;;  %v366_v19 = vpop.permute.xlu0 %365 }
 0x10c   :  { %448 = vst [vmem:[#allocation2 + $0x50] sm:$0xff] %v8762_v17  ;;  %v388_v20 = vrot.slane %v366_v19, 4  ;;  %v587_v50 = vshrl.u32 %v8762_v17, 16  ;;  %v6986_v5 = vcombine.high %v8762_v17, %v8757_v14 }
 0x10d   :  { %v419_v21 = vsel %vm397_vm1, %v391_v3, %v392_v18  ;;  %v8768_v23 = vld [vmem:[#allocation2 + $0x120] sm:$0xff]  ;;  %v626_v3 = vshrl.u32 %v575_v52, 16 }
 0x10e   :  { %v8771_v24 = vsel %vm395_vm3, %v419_v21, %v374_v16  ;;  %v412_v25 = vsel %vm397_vm1, %v387_v60, %v388_v20  ;;  %v360_v26 = vpop.permute.xlu1 %359  ;;  %v8776_v28 = vld [vmem:[#allocation2 + $0x6c] sm:$0xff]  ;;  %v6983_v29 = vcombine.high %v8766_v22, %v8768_v23  ;;  %v6982_v0 = vcombine.low %v8766_v22, %v8768_v23  ;;  %v7854_v52 = vld [vmem:[#allocation10 + $0x154] ss:$8 sps:$4 sm:$0xff]  }
 0x10f   :  { %463 = vst [vmem:[#allocation2 + $0x128] sm:$0xff] %v8771_v24  ;;  %v8782_v30 = vsel %vm395_vm3, %v412_v25, %v366_v19  ;;  %v385_v31 = vrot.slane %v360_v26, 4  ;;  %v352_v32 = vpop.permute.xlu0 %351  ;;  %v6980_v33 = vcombine.high %v8774_v27, %v8776_v28  ;;  %v6979_v35 = vcombine.low %v8774_v27, %v8776_v28  ;;  %v7846_v19 = vld [vmem:[#allocation10 + $0x130] ss:$8 sps:$4 sm:$0xff]  }
 0x110   :  { %458 = vst [vmem:[#allocation2 + $0x104] sm:$0xff] %v8782_v30  ;;  %v381_v38 = vrot.slane %v352_v32, 4  ;;  %v8820_v2 = vrot.slane %v587_v50, 7  ;;  %v726_v21 = vshrl.u32 %v675_v4, 16  ;;  %v653_v49 = vshrl.u32 %v8771_v24, 16 }
 0x111   :  { %v407_v39 = vsel %vm397_vm1, %v384_v9, %v385_v31  ;;  %1461 = vmatprep.mubr.bf16.mxu0 %v6980_v33  ;;  %v6945_v33 = vrot.slane %v626_v3, 11  ;;  %v634_v57 = vshll.u32 %v8782_v30, 16 }
 0x112   :  { %v8791_v40 = vsel %vm395_vm3, %v407_v39, %v360_v26  ;;  %v400_v41 = vsel %vm397_vm1, %v380_v12, %v381_v38  ;;  %1462 = vmatmul.mubr.bf16.vlgmr.msra.gmra.mrb[0].mxu0 %v6979_v35  ;;  %v8794_v42 = vpop.permute.xlu1 %375  ;;  %v590_v12 = vshll.u32 %v8762_v17, 16  ;;  %v7851_v26 = vld [vmem:[#allocation10 + $0x144] ss:$8 sps:$4 sm:$0xff]   ;;  %v607_v35 = vrot.slane %v8820_v2, 4 }
 0x113   :  { %454 = vst [vmem:[#allocation2 + $0x7c] sm:$0xff] %v8791_v40  ;;  %v8798_v43 = vsel %vm395_vm3, %v400_v41, %v352_v32  ;;  %1543 = vmatpush1.bf16.msra.mxu0 %v7834_v34  ;;  %1471 = vmatprep.mubr.bf16.mxu0 %v6983_v29  ;;  %v393_v44 = vrot.slane %v8794_v42, 4  ;;  %v8801_v45 = vpop.permute.xlu0 %367  ;;  %v8863_v50 = vrot.slane %v726_v21, 11  ;;  %v6988_v21 = vcombine.low %v8782_v30, %v8771_v24 }
 0x114   :  { %449 = vst [vmem:[#allocation2 + $0x58] sm:$0xff] %v8798_v43  ;;  %v389_v48 = vrot.slane %v8801_v45, 4  ;;  %1544 = vmatprep.subr.bf16.mxu0 %v7841_v36  ;;  %v592_v32 = vor.u32 %v590_v12, %v8820_v2  ;;  %v6947_v36 = vrot.slane %v682_v7, 11 }
 0x115   :  { %v421_v51 = vsel %vm397_vm1, %v392_v18, %v393_v44 }
 0x116   :  { %v8809_v53 = vsel %vm395_vm3, %v421_v51, %v8794_v42  ;;  %v414_v54 = vsel %vm397_vm1, %v388_v20, %v389_v48  ;;  %v362_v55 = vpop.permute.xlu1 %361  ;;  %v609_v20 = vshrl.u32 %v8757_v14, 16  ;;  %v6989_v51 = vcombine.high %v8782_v30, %v8771_v24 }
 0x117   :  { %464 = vst [vmem:[#allocation2 + $0x130] sm:$0xff] %v8809_v53  ;;  %v8815_v58 = vsel %vm395_vm3, %v414_v54, %v8801_v45  ;;  %1545 = vmatpush1.bf16.msra.mxu0 %v7839_v46  ;;  %v386_v59 = vrot.slane %v362_v55, 4  ;;  %v354_v60 = vpop.permute.xlu0 %353  ;;  %v612_v45 = vshll.u32 %v8757_v14, 16  ;;  %v7849_v46 = vld [vmem:[#allocation10 + $0x140] ss:$8 sps:$4 sm:$0xff]  }
 0x118   :  { %459 = vst [vmem:[#allocation2 + $0x10c] sm:$0xff] %v8815_v58  ;;  %v382_v1 = vrot.slane %v354_v60, 4  ;;  %1546 = vmatprep.subr.bf16.mxu0 %v7845_v47  ;;  %v611_v42 = vrot.slane %v609_v20, 7  ;;  %v631_v47 = vshrl.u32 %v8782_v30, 16  ;;  %v734_v20 = vshll.u32 %v8815_v58, 16 }
 0x119   :  { %v409_v6 = vsel %vm397_vm1, %v385_v31, %v386_v59  ;;  %456 = vst.msk [vmem:[#allocation2 + $0x8c] sm:$0xf] %vm225_vm0, %v386_v59  ;;  %v6943_v31 = vrot.slane %v582_v63, 11  ;;  %v655_v59 = vrot.slane %v653_v49, 7  ;;  %v690_v63 = vshll.u32 %v8798_v43, 16 }
 0x11a   :  { %1472 = vmatmul.mubr.bf16.gmra.mrb[4].mxu0 %v6982_v0  ;;  %v8827_v8 = vsel %vm395_vm3, %v409_v6, %v362_v55  ;;  %v402_v9 = vsel %vm397_vm1, %v381_v38, %v382_v1  ;;  %451 = vst.msk [vmem:[#allocation2 + $0x68] sm:$0xf] %vm225_vm0, %v382_v1  ;;  %v378_v11 = vpop.permute.xlu1 %377  ;;  %v782_v38 = vshrl.u32 %v8832_v13, 16  ;;  %v614_v55 = vor.u32 %v612_v45, %v611_v42  ;;  %v7852_v1 = vld [vmem:[#allocation10 + $0x150] ss:$8 sps:$4 sm:$0xff]  }
 0x11b   :  { %1481 = vmatprep.mubr.bf16.mxu0 %v6986_v5  ;;  %455 = vst [vmem:[#allocation2 + $0x84] sm:$0xff] %v8827_v8  ;;  %v8836_v15 = vsel %vm395_vm3, %v402_v9, %v354_v60  ;;  %1547 = vmatpush1.bf16.msra.mxu0 %v7843_v56  ;;  %v394_v16 = vrot.slane %v378_v11, 4  ;;  %v370_v18 = vpop.permute.xlu0 %369  ;;  %v8872_v54 = vsel %vm8842_vm6, %v6943_v31, %v592_v32  ;;  %v633_v56 = vrot.slane %v631_v47, 7  ;;  %v7857_v6 = vld [vmem:[#allocation10 + $0x164] ss:$8 sps:$4 sm:$0xff]  }
 0x11c   :  { %450 = vst [vmem:[#allocation2 + $0x60] sm:$0xff] %v8836_v15  ;;  %v390_v25 = vrot.slane %v370_v18, 4  ;;  %1548 = vmatprep.subr.bf16.mxu0 %v7848_v62  ;;  %v687_v60 = vshrl.u32 %v8798_v43, 16  ;;  %v8876_v62 = vld [vmem:[#allocation2 + $0xf0] sm:$0x88]  ;;  %v709_v0 = vshrl.u32 %v8791_v40, 16  ;;  %v6992_v42 = vcombine.high %v8798_v43, %v8791_v40 }
 0x11d   :  { %v423_v34 = vsel %vm397_vm1, %v393_v44, %v394_v16  ;;  %466 = vst.msk [vmem:[#allocation2 + $0x140] sm:$0xf] %vm225_vm0, %v394_v16  ;;  %v636_v4 = vor.u32 %v634_v57, %v633_v56  ;;  %v651_v5 = vrot.slane %v633_v56, 4  ;;  %v826_v12 = vshrl.u32 %v8876_v62, 16  ;;  %v7855_v32 = vld [vmem:[#allocation10 + $0x160] ss:$8 sps:$4 sm:$0xff]  }
 0x11e   :  { %v8852_v39 = vsel %vm395_vm3, %v423_v34, %v378_v11  ;;  %v416_v41 = vsel %vm397_vm1, %v389_v48, %v390_v25  ;;  %461 = vst.msk [vmem:[#allocation2 + $0x11c] sm:$0xf] %vm225_vm0, %v390_v25  ;;  %v6985_v48 = vcombine.low %v8762_v17, %v8757_v14  ;;  %v8880_v14 = vsel %vm8842_vm6, %v607_v35, %v614_v55 }
 0x11f   :  { %465 = vst [vmem:[#allocation2 + $0x138] sm:$0xff] %v8852_v39  ;;  %v8859_v44 = vsel %vm395_vm3, %v416_v41, %v370_v18  ;;  %1549 = vmatpush1.bf16.msra.mxu0 %v7846_v19  ;;  %v656_v17 = vshll.u32 %v8771_v24, 16  ;;  %v6962_v2 = vcombine.high %v8872_v54, %v8880_v14  ;;  %v6961_v3 = vcombine.low %v8872_v54, %v8880_v14  ;;  %v7860_v24 = vld [vmem:[#allocation10 + $0x174] ss:$8 sps:$4 sm:$0xff]   ;;  %v7938_v54 = vld [vmem:[#allocation8 + $0x170] ss:$8 sps:$4 sm:$0xff]  }
 0x120   :  { %460 = vst [vmem:[#allocation2 + $0x114] sm:$0xff] %v8859_v44  ;;  %1550 = vmatprep.subr.bf16.mxu0 %v7851_v26  ;;  %v689_v9 = vrot.slane %v687_v60, 7  ;;  %v711_v11 = vrot.slane %v709_v0, 7  ;;  %v8892_v16 = vsel %vm8842_vm6, %v6945_v33, %v636_v4  ;;  %v712_v18 = vshll.u32 %v8791_v40, 16  ;;  %v7943_v14 = vld [vmem:[#allocation11 + $0x4] ss:$8 sps:$4 sm:$0xff]  }
 0x121   :  { %v658_v7 = vor.u32 %v656_v17, %v655_v59  ;;  %v731_v19 = vshrl.u32 %v8815_v58, 16  ;;  %v753_v45 = vshrl.u32 %v8809_v53, 16  ;;  %v790_v57 = vshll.u32 %v8836_v15, 16  ;;  %v7863_v59 = vld [vmem:[#allocation8 + $0x4] ss:$8 sps:$4 sm:$0xff]  }
 0x122   :  { %1482 = vmatmul.mubr.bf16.gmra.mrb[8].mxu0 %v6985_v48  ;;  %v692_v26 = vor.u32 %v690_v63, %v689_v9  ;;  %v707_v31 = vrot.slane %v689_v9, 4  ;;  %v714_v35 = vor.u32 %v712_v18, %v711_v11  ;;  %v6951_v62 = vrot.slane %v782_v38, 11 }
 0x123   :  { %1491 = vmatprep.mubr.bf16.mxu0 %v6989_v51  ;;  %1551 = vmatpush1.bf16.msra.mxu0 %v7849_v46  ;;  %v8901_v25 = vsel %vm8842_vm6, %v651_v5, %v658_v7  ;;  %v733_v41 = vrot.slane %v731_v19, 7  ;;  %v756_v46 = vshll.u32 %v8809_v53, 16  ;;  %v787_v51 = vshrl.u32 %v8836_v15, 16 }
 0x124   :  { %1552 = vmatprep.subr.bf16.mxu0 %v7854_v52  ;;  %v6965_v33 = vcombine.high %v8892_v16, %v8901_v25  ;;  %v6964_v34 = vcombine.low %v8892_v16, %v8901_v25  ;;  %v8911_v30 = vsel %vm8842_vm6, %v6947_v36, %v692_v26  ;;  %v8917_v47 = vsel %vm8842_vm6, %v707_v31, %v714_v35  ;;  %v7858_v52 = vld [vmem:[#allocation10 + $0x170] ss:$8 sps:$4 sm:$0xff]   ;;  %v468_v16 = vld [vmem:[#allocation2 + $0x2c] sm:$0x8] }
 0x125   :  { %v736_v49 = vor.u32 %v734_v20, %v733_v41  ;;  %v751_v48 = vrot.slane %v733_v41, 4  ;;  %v6968_v55 = vcombine.high %v8911_v30, %v8917_v47  ;;  %v6967_v36 = vcombine.low %v8911_v30, %v8917_v47 }
 0x126   :  { %v755_v56 = vrot.slane %v753_v45, 7  ;;  %v789_v17 = vrot.slane %v787_v51, 7  ;;  %v809_v63 = vshrl.u32 %v8827_v8, 16  ;;  %v831_v4 = vshrl.u32 %v8859_v44, 16 }
 0x127   :  { %1553 = vmatpush1.bf16.msra.mxu0 %v7852_v1  ;;  %v8928_v60 = vsel %vm8842_vm6, %v8863_v50, %v736_v49  ;;  %v812_v1 = vshll.u32 %v8827_v8, 16  ;;  %v834_v5 = vshll.u32 %v8859_v44, 16  ;;  %v853_v50 = vshrl.u32 %v8852_v39, 16 }
 0x128   :  { %1554 = vmatprep.subr.bf16.mxu0 %v7857_v6  ;;  %v758_v0 = vor.u32 %v756_v46, %v755_v56  ;;  %v792_v6 = vor.u32 %v790_v57, %v789_v17  ;;  %v807_v7 = vrot.slane %v789_v17, 4  ;;  %v811_v9 = vrot.slane %v809_v63, 7  ;;  %v7870_v63 = vld [vmem:[#allocation8 + $0x24] ss:$8 sps:$4 sm:$0xff]  }
 0x129   :  { %v6953_v38 = vrot.slane %v826_v12, 11  ;;  %v833_v11 = vrot.slane %v831_v4, 7  ;;  %v856_v18 = vshll.u32 %v8852_v39, 16  ;;  %v6991_v31 = vcombine.low %v8798_v43, %v8791_v40  ;;  %v7874_v4 = vld [vmem:[#allocation8 + $0x34] ss:$8 sps:$4 sm:$0xff]  }
 0x12a   :  { %1492 = vmatmul.mubr.bf16.gmra.mrb[12].mxu0 %v6988_v21  ;;  %v8939_v13 = vsel %vm8842_vm6, %v751_v48, %v758_v0  ;;  %v8948_v21 = vsel %vm8842_vm6, %v6951_v62, %v792_v6  ;;  %v814_v26 = vor.u32 %v812_v1, %v811_v9  ;;  %v855_v35 = vrot.slane %v853_v50, 7  ;;  %v7861_v62 = vld [vmem:[#allocation8] ss:$8 sps:$4 sm:$0xff]   ;;  %v7877_v6 = vld [vmem:[#allocation8 + $0x44] ss:$8 sps:$4 sm:$0xff]  }
 0x12b   :  { %1501 = vmatprep.mubr.bf16.mxu0 %v6992_v42  ;;  %1555 = vmatpush1.bf16.msra.mxu0 %v7855_v32  ;;  %v6971_v19 = vcombine.high %v8928_v60, %v8939_v13  ;;  %v6970_v20 = vcombine.low %v8928_v60, %v8939_v13  ;;  %v836_v12 = vor.u32 %v834_v5, %v833_v11  ;;  %v851_v32 = vrot.slane %v833_v11, 4  ;;  %v7868_v0 = vld [vmem:[#allocation8 + $0x20] ss:$8 sps:$4 sm:$0xff]   ;;  %v7872_v5 = vld [vmem:[#allocation8 + $0x30] ss:$8 sps:$4 sm:$0xff]  }
 0x12c   :  { %1556 = vmatprep.subr.bf16.mxu0 %v7860_v24  ;;  %v6995_v41 = vcombine.high %v8815_v58, %v8809_v53  ;;  %v8956_v42 = vsel %vm8842_vm6, %v807_v7, %v814_v26  ;;  %v858_v43 = vor.u32 %v856_v18, %v855_v35  ;;  %v6994_v51 = vcombine.low %v8815_v58, %v8809_v53  ;;  %v8985_v53 = vld [vmem:[#allocation2 + $0x50] sm:$0xf]  ;;  %v8987_v58 = vld [vmem:[#allocation2 + $0x74] sm:$0xf]  ;;  %v8999_v9 = vld [vmem:[#allocation2 + $0x58] sm:$0xf] }
 0x12d   :  { %v6974_v24 = vcombine.high %v8948_v21, %v8956_v42  ;;  %v6973_v45 = vcombine.low %v8948_v21, %v8956_v42  ;;  %v8964_v40 = vsel %vm8842_vm6, %v6953_v38, %v836_v12  ;;  %v6997_v56 = vcombine.low %v8836_v15, %v8827_v8  ;;  %v7875_v7 = vld [vmem:[#allocation8 + $0x40] ss:$8 sps:$4 sm:$0xff]   ;;  %v9001_v50 = vld [vmem:[#allocation2 + $0x7c] sm:$0xf]  ;;  %v7879_v18 = vld [vmem:[#allocation8 + $0x50] ss:$8 sps:$4 sm:$0xff]  }
 0x12e   :  { %v8968_v46 = vsel %vm8842_vm6, %v851_v32, %v858_v43  ;;  %v7001_v57 = vcombine.high %v8859_v44, %v8852_v39  ;;  %v6981_v17 = vcombine.low %v8985_v53, %v8987_v58  ;;  %v6987_v38 = vcombine.low %v8999_v9, %v9001_v50  ;;  %v7881_v11 = vld [vmem:[#allocation8 + $0x54] ss:$8 sps:$4 sm:$0xff]   ;;  %v7884_v26 = vld [vmem:[#allocation8 + $0x64] ss:$8 sps:$4 sm:$0xff]   ;;  %v9008_v32 = vld [vmem:[#allocation2 + $0x130] sm:$0xf] }
 0x12f   :  { %1557 = vmatpush1.bf16.msra.mxu0 %v7858_v52  ;;  %v6977_v49 = vcombine.high %v8964_v40, %v8968_v46  ;;  %v6998_v52 = vcombine.high %v8836_v15, %v8827_v8  ;;  %v7867_v8 = vld [vmem:[#allocation8 + $0x14] ss:$8 sps:$4 sm:$0xff]   ;;  %v7865_v15 = vld [vmem:[#allocation8 + $0x10] ss:$8 sps:$4 sm:$0xff]   ;;  %v9006_v12 = vld [vmem:[#allocation2 + $0x10c] sm:$0xf]  ;;  %v10778_v42 = vcombine.low %v8964_v40, %v8968_v46 }
 0x130   :  { %1895 = vmatprep.subr.bf16.mxu0 %v7863_v59  ;;  %v7000_v59 = vcombine.low %v8859_v44, %v8852_v39  ;;  %v8992_v39 = vld [vmem:[#allocation2 + $0x104] sm:$0xf]  ;;  %v8994_v44 = vld [vmem:[#allocation2 + $0x128] sm:$0xf]  ;;  %v6990_v35 = vcombine.low %v9006_v12, %v9008_v32  ;;  %v7886_v43 = vld [vmem:[#allocation8 + $0x70] ss:$8 sps:$4 sm:$0xff]  }
 0x131   :  { %v6984_v1 = vcombine.low %v8992_v39, %v8994_v44  ;;  %v518_v25 = vshrl.u32 %v8987_v58, 16  ;;  %v503_v47 = vshll.u32 %v8985_v53, 16  ;;  %v562_v21 = vshrl.u32 %v8994_v44, 16 }
 0x132   :  { %1502 = vmatmul.mubr.bf16.gmra.mrb[16].mxu0 %v6991_v31  ;;  %v7882_v31 = vld [vmem:[#allocation8 + $0x60] ss:$8 sps:$4 sm:$0xff]   ;;  %v600_v46 = vshrl.u32 %v8999_v9, 16 }
 0x133   :  { %1511 = vmatprep.mubr.bf16.mxu0 %v6995_v41  ;;  %v7888_v41 = vld [vmem:[#allocation8 + $0x74] ss:$8 sps:$4 sm:$0xff]   ;;  %v520_v30 = vrot.slane %v518_v25, 7  ;;  %v7955_v25 = vld [vmem:[#allocation11 + $0x44] ss:$8 sps:$4 sm:$0xff]  }
 0x13a   :  { %1512 = vmatmul.mubr.bf16.gmra.mrb[20].mxu0 %v6994_v51  ;;  %v7891_v51 = vld [vmem:[#allocation8 + $0x84] ss:$8 sps:$4 sm:$0xff]  }
 0x13b   :  { %1521 = vmatprep.mubr.bf16.mxu0 %v6998_v52  ;;  %v7889_v52 = vld [vmem:[#allocation8 + $0x80] ss:$8 sps:$4 sm:$0xff]  }
 0x142   :  { %1522 = vmatmul.mubr.bf16.gmra.mrb[24].mxu0 %v6997_v56  ;;  %v9013_v56 = vld [vmem:[#allocation2 + $0x60] sm:$0xf] }
 0x143   :  { %1531 = vmatprep.mubr.bf16.mxu0 %v7001_v57  ;;  %v9015_v57 = vld [vmem:[#allocation2 + $0x84] sm:$0xf] }
 0x14a   :  { %1532 = vmatmul.mubr.bf16.gmra.mrb[28].mxu0 %v7000_v59  ;;  %v6993_v59 = vcombine.low %v9013_v56, %v9015_v57 }
 0x14b   :  { %1574 = vmatprep.mubr.bf16.mxu0 %v10736_v10 }
 0x152   :  { %1575 = vmatmul.mubr.bf16.vlgmr.msra.gmra.mrb[0].mxu0 %v6981_v17  ;;  %v7893_v17 = vld [vmem:[#allocation8 + $0x90] ss:$8 sps:$4 sm:$0xff]  }
 0x153   :  { %1896 = vmatpush1.bf16.msra.mxu0 %v7861_v62  ;;  %1584 = vmatprep.mubr.bf16.mxu0 %v10736_v10  ;;  %v7895_v62 = vld [vmem:[#allocation8 + $0x94] ss:$8 sps:$4 sm:$0xff]  }
 0x154   :  { %1897 = vmatprep.subr.bf16.mxu0 %v7867_v8  ;;  %v7898_v8 = vld [vmem:[#allocation8 + $0xa4] ss:$8 sps:$4 sm:$0xff]  }
 0x157   :  { %1898 = vmatpush1.bf16.msra.mxu0 %v7865_v15  ;;  %v7896_v15 = vld [vmem:[#allocation8 + $0xa0] ss:$8 sps:$4 sm:$0xff]  }
 0x158   :  { %1899 = vmatprep.subr.bf16.mxu0 %v7870_v63  ;;  %v9020_v63 = vld [vmem:[#allocation2 + $0x114] sm:$0xf] }
 0x15a   :  { %1585 = vmatmul.mubr.bf16.gmra.mrb[4].mxu0 %v6984_v1 }
 0x15b   :  { %1900 = vmatpush1.bf16.msra.mxu0 %v7868_v0  ;;  %1594 = vmatprep.mubr.bf16.mxu0 %v10736_v10  ;;  %v9022_v0 = vld [vmem:[#allocation2 + $0x138] sm:$0xf] }
 0x15c   :  { %1901 = vmatprep.subr.bf16.mxu0 %v7874_v4  ;;  %v6996_v1 = vcombine.low %v9020_v63, %v9022_v0  ;;  %v7902_v4 = vld [vmem:[#allocation8 + $0xb4] ss:$8 sps:$4 sm:$0xff]  }
 0x15f   :  { %1902 = vmatpush1.bf16.msra.mxu0 %v7872_v5  ;;  %v509_v5 = vshrl.u32 %v8776_v28, 16 }
 0x160   :  { %1903 = vmatprep.subr.bf16.mxu0 %v7877_v6  ;;  %v7900_v6 = vld [vmem:[#allocation8 + $0xb0] ss:$8 sps:$4 sm:$0xff]  }
 0x162   :  { %1595 = vmatmul.mubr.bf16.gmra.mrb[8].mxu0 %v6987_v38  ;;  %v487_v38 = vshrl.u32 %v8774_v27, 16 }
 0x163   :  { %1904 = vmatpush1.bf16.msra.mxu0 %v7875_v7  ;;  %1604 = vmatprep.mubr.bf16.mxu0 %v10736_v10  ;;  %v7905_v7 = vld [vmem:[#allocation8 + $0xc4] ss:$8 sps:$4 sm:$0xff]  }
 0x164   :  { %1905 = vmatprep.subr.bf16.mxu0 %v7881_v11  ;;  %v467_v11 = vld [vmem:[#allocation2 + $0x24] sm:$0x88] }
 0x167   :  { %1906 = vmatpush1.bf16.msra.mxu0 %v7879_v18  ;;  %v511_v18 = vrot.slane %v509_v5, 7  ;;  %v553_v5 = vshrl.u32 %v8768_v23, 16 }
 0x168   :  { %1907 = vmatprep.subr.bf16.mxu0 %v7884_v26  ;;  %v207_v26 = vld [vmem:[#allocation2 + $0xb0] sm:$0x1] }
 0x16a   :  { %1605 = vmatmul.mubr.bf16.gmra.mrb[12].mxu0 %v6990_v35  ;;  %v9029_v35 = vld [vmem:[#allocation2 + $0x68] sm:$0xf] }
 0x16b   :  { %1908 = vmatpush1.bf16.msra.mxu0 %v7882_v31  ;;  %1614 = vmatprep.mubr.bf16.mxu0 %v10736_v10  ;;  %v7903_v31 = vld [vmem:[#allocation8 + $0xc0] ss:$8 sps:$4 sm:$0xff]  }
 0x16c   :  { %1909 = vmatprep.subr.bf16.mxu0 %v7888_v41  ;;  %v9031_v41 = vld [vmem:[#allocation2 + $0x8c] sm:$0xf] }
 0x16f   :  { %1910 = vmatpush1.bf16.msra.mxu0 %v7886_v43  ;;  %v6999_v43 = vcombine.low %v9029_v35, %v9031_v41 }
 0x170   :  { %1911 = vmatprep.subr.bf16.mxu0 %v7891_v51  ;;  %v7909_v51 = vld [vmem:[#allocation8 + $0xd4] ss:$8 sps:$4 sm:$0xff]  }
 0x172   :  { %1615 = vmatmul.mubr.bf16.gmra.mrb[16].mxu0 %v6993_v59  ;;  %v489_v59 = vrot.slane %v487_v38, 7 }
 0x173   :  { %1912 = vmatpush1.bf16.msra.mxu0 %v7889_v52  ;;  %1624 = vmatprep.mubr.bf16.mxu0 %v10736_v10  ;;  %v482_v52 = vshrl.u32 %v467_v11, 16 }
 0x174   :  { %1913 = vmatprep.subr.bf16.mxu0 %v7895_v62  ;;  %v512_v62 = vshll.u32 %v8776_v28, 16  ;;  %v7912_v28 = vld [vmem:[#allocation8 + $0xe4] ss:$8 sps:$4 sm:$0xff]   ;;  %v507_v48 = vrot.slane %v489_v59, 4 }
 0x175   :  { %v6939_v38 = vrot.slane %v482_v52, 11  ;;  %v9050_v52 = vld [vmem:[#allocation2 + $0x140] sm:$0xf] }
 0x177   :  { %1914 = vmatpush1.bf16.msra.mxu0 %v7893_v17  ;;  %v473_v17 = vld [vmem:[#allocation2 + $0xd8] sm:$0x88] }
 0x178   :  { %1915 = vmatprep.subr.bf16.mxu0 %v7898_v8  ;;  %v208_v8 = vsel %vm8708_vm13, 0, %v207_v26  ;;  %v526_v26 = vshrl.u32 %v473_v17, 16 }
 0x179   :  { %209 = vst [vmem:[#allocation2 + $0xb0] sm:$0x1] %v208_v8  ;;  %v555_v8 = vrot.slane %v553_v5, 7  ;;  %v7919_v5 = vld [vmem:[#allocation8 + $0x104] ss:$8 sps:$4 sm:$0xff]  }
 0x17a   :  { %1625 = vmatmul.mubr.bf16.gmra.mrb[20].mxu0 %v6996_v1  ;;  %v514_v1 = vor.u32 %v512_v62, %v511_v18  ;;  %v6941_v17 = vrot.slane %v526_v26, 11 }
 0x17b   :  { %1916 = vmatpush1.bf16.msra.mxu0 %v7896_v15  ;;  %1634 = vmatprep.mubr.bf16.mxu0 %v10736_v10  ;;  %v490_v15 = vshll.u32 %v8774_v27, 16 }
 0x17c   :  { %1917 = vmatprep.subr.bf16.mxu0 %v7902_v4  ;;  %v531_v4 = vshrl.u32 %v8766_v22, 16  ;;  %v515_v18 = vsel %vm8842_vm6, %v507_v48, %v514_v1 }
 0x17d   :  { %v492_v11 = vor.u32 %v490_v15, %v489_v59  ;;  %v7916_v59 = vld [vmem:[#allocation8 + $0xf4] ss:$8 sps:$4 sm:$0xff]  }
 0x17e   :  { %v533_v62 = vrot.slane %v531_v4, 7  ;;  %v7914_v4 = vld [vmem:[#allocation8 + $0xf0] ss:$8 sps:$4 sm:$0xff]  }
 0x17f   :  { %1918 = vmatpush1.bf16.msra.mxu0 %v7900_v6  ;;  %v222_v6 = vld [vmem:[#allocation2 + $0x164] sm:$0x1]  ;;  %v493_v37 = vsel %vm8842_vm6, %v6939_v38, %v492_v11 }
 0x180   :  { %1919 = vmatprep.subr.bf16.mxu0 %v7905_v7  ;;  %v7907_v7 = vld [vmem:[#allocation8 + $0xd0] ss:$8 sps:$4 sm:$0xff]   ;;  %v223_v27 = vsel %vm8708_vm13, 0, %v222_v6  ;;  %v6956_v48 = vcombine.high %v493_v37, %v515_v18  ;;  %v6955_v38 = vcombine.low %v493_v37, %v515_v18  ;;  %v7922_v11 = vld [vmem:[#allocation8 + $0x114] ss:$8 sps:$4 sm:$0xff]  }
 0x181   :  { %224 = vst [vmem:[#allocation2 + $0x164] sm:$0x1] %v223_v27  ;;  %v7925_v27 = vld [vmem:[#allocation8 + $0x124] ss:$8 sps:$4 sm:$0xff]   ;;  %v7926_v18 = vld [vmem:[#allocation8 + $0x130] ss:$8 sps:$4 sm:$0xff]  }
 0x182   :  { %1635 = vmatmul.mubr.bf16.gmra.mrb[24].mxu0 %v6999_v43  ;;  %v534_v43 = vshll.u32 %v8766_v22, 16  ;;  %v7934_v37 = vld [vmem:[#allocation8 + $0x154] ss:$8 sps:$4 sm:$0xff]  }
 0x183   :  { %1920 = vmatpush1.bf16.msra.mxu0 %v7903_v31  ;;  %1644 = vmatprep.mubr.bf16.mxu0 %v10736_v10  ;;  %v556_v31 = vshll.u32 %v8768_v23, 16  ;;  %v9048_v10 = vld [vmem:[#allocation2 + $0x11c] sm:$0xf]  ;;  %v551_v23 = vrot.slane %v533_v62, 4 }
 0x184   :  { %1921 = vmatprep.subr.bf16.mxu0 %v7909_v51  ;;  %v7910_v51 = vld [vmem:[#allocation8 + $0xe0] ss:$8 sps:$4 sm:$0xff]   ;;  %v7002_v22 = vcombine.low %v9048_v10, %v9050_v52  ;;  %v536_v15 = vor.u32 %v534_v43, %v533_v62  ;;  %v7920_v43 = vld [vmem:[#allocation8 + $0x110] ss:$8 sps:$4 sm:$0xff]  }
 0x185   :  { %v558_v1 = vor.u32 %v556_v31, %v555_v8  ;;  %v7923_v62 = vld [vmem:[#allocation8 + $0x120] ss:$8 sps:$4 sm:$0xff]   ;;  %v7928_v31 = vld [vmem:[#allocation8 + $0x134] ss:$8 sps:$4 sm:$0xff]  }
 0x186   :  { %v537_v6 = vsel %vm8842_vm6, %v6941_v17, %v536_v15  ;;  %v7940_v17 = vld [vmem:[#allocation8 + $0x174] ss:$8 sps:$4 sm:$0xff]  }
 0x187   :  { %1922 = vmatpush1.bf16.msra.mxu0 %v7907_v7  ;;  %v559_v7 = vsel %vm8842_vm6, %v551_v23, %v558_v1  ;;  %v564_v23 = vrot.slane %v562_v21, 7  ;;  %v7941_v1 = vld [vmem:[#allocation11] ss:$8 sps:$4 sm:$0xff]   ;;  %v700_v21 = vshrl.u32 %v9013_v56, 16 }
 0x188   :  { %1923 = vmatprep.subr.bf16.mxu0 %v7912_v28  ;;  %v7917_v28 = vld [vmem:[#allocation8 + $0x100] ss:$8 sps:$4 sm:$0xff]   ;;  %v6959_v26 = vcombine.high %v537_v6, %v559_v7  ;;  %v6958_v8 = vcombine.low %v537_v6, %v559_v7  ;;  %v7946_v7 = vld [vmem:[#allocation11 + $0x14] ss:$8 sps:$4 sm:$0xff]  }
 0x18a   :  { %1645 = vmatmul.mubr.bf16.gmra.mrb[28].mxu0 %v7002_v22  ;;  %v7929_v22 = vld [vmem:[#allocation8 + $0x140] ss:$8 sps:$4 sm:$0xff]  }
 0x18b   :  { %1924 = vmatpush1.bf16.msra.mxu0 %v7910_v51  ;;  %1927 = vmatprep.mubr.bf16.mxu0 %v6956_v48  ;;  %v7931_v51 = vld [vmem:[#allocation8 + $0x144] ss:$8 sps:$4 sm:$0xff]   ;;  %v7935_v48 = vld [vmem:[#allocation8 + $0x160] ss:$8 sps:$4 sm:$0xff]  }
 0x18c   :  { %1925 = vmatprep.subr.bf16.mxu0 %v7916_v59  ;;  %v7932_v59 = vld [vmem:[#allocation8 + $0x150] ss:$8 sps:$4 sm:$0xff]  }
 0x18f   :  { %1926 = vmatpush1.bf16.msra.mxu0 %v7914_v4  ;;  %v547_v4 = vshll.u32 %v8992_v39, 16 }
 0x190   :  { %2008 = vmatprep.subr.bf16.mxu0 %v7919_v5  ;;  %v565_v5 = vshll.u32 %v8994_v44, 16  ;;  %v603_v44 = vshll.u32 %v8999_v9, 16 }
 0x192   :  { %1928 = vmatmul.mubr.bf16.vlgmr.msra.gmra.mrb[0].mxu0 %v6955_v38 }
 0x193   :  { %2009 = vmatpush1.bf16.msra.mxu0 %v7917_v28  ;;  %1937 = vmatprep.mubr.bf16.mxu0 %v6959_v26  ;;  %v570_v26 = vld [vmem:[#allocation2 + $0x34] sm:$0x8] }
 0x194   :  { %2010 = vmatprep.subr.bf16.mxu0 %v7922_v11  ;;  %v567_v11 = vor.u32 %v565_v5, %v564_v23 }
 0x197   :  { %2011 = vmatpush1.bf16.msra.mxu0 %v7920_v43  ;;  %v618_v43 = vshrl.u32 %v9001_v50, 16 }
 0x198   :  { %2012 = vmatprep.subr.bf16.mxu0 %v7925_v27  ;;  %v7944_v27 = vld [vmem:[#allocation11 + $0x10] ss:$8 sps:$4 sm:$0xff]  }
 0x19a   :  { %1938 = vmatmul.mubr.bf16.gmra.mrb[4].mxu0 %v6958_v8  ;;  %v621_v8 = vshll.u32 %v9001_v50, 16  ;;  %v576_v50 = vld [vmem:[#allocation2 + $0xe8] sm:$0x8] }
 0x19b   :  { %1947 = vmatprep.mubr.bf16.mxu0 %v6962_v2  ;;  %2013 = vmatpush1.bf16.msra.mxu0 %v7923_v62  ;;  %v7937_v2 = vld [vmem:[#allocation8 + $0x164] ss:$8 sps:$4 sm:$0xff]   ;;  %v595_v62 = vshrl.u32 %v570_v26, 16  ;;  %v744_v26 = vshrl.u32 %v9020_v63, 16 }
 0x19c   :  { %2014 = vmatprep.subr.bf16.mxu0 %v7928_v31 }
 0x19f   :  { %2015 = vmatpush1.bf16.msra.mxu0 %v7926_v18 }
 0x1a0   :  { %2016 = vmatprep.subr.bf16.mxu0 %v7931_v51  ;;  %v602_v51 = vrot.slane %v600_v46, 7  ;;  %v7959_v46 = vld [vmem:[#allocation11 + $0x60] ss:$8 sps:$4 sm:$0xff]  }
 0x1a2   :  { %1948 = vmatmul.mubr.bf16.gmra.mrb[8].mxu0 %v6961_v3  ;;  %v500_v3 = vshrl.u32 %v8985_v53, 16  ;;  %v616_v9 = vrot.slane %v602_v51, 4 }
 0x1a3   :  { %1957 = vmatprep.mubr.bf16.mxu0 %v6965_v33  ;;  %2017 = vmatpush1.bf16.msra.mxu0 %v7929_v22  ;;  %v495_v33 = vshrl.u32 %v468_v16, 16  ;;  %v620_v22 = vrot.slane %v618_v43, 7  ;;  %v7950_v16 = vld [vmem:[#allocation11 + $0x30] ss:$8 sps:$4 sm:$0xff]  }
 0x1a4   :  { %2018 = vmatprep.subr.bf16.mxu0 %v7934_v37  ;;  %v7947_v37 = vld [vmem:[#allocation11 + $0x20] ss:$8 sps:$4 sm:$0xff]  }
 0x1a7   :  { %2019 = vmatpush1.bf16.msra.mxu0 %v7932_v59 }
 0x1a8   :  { %2020 = vmatprep.subr.bf16.mxu0 %v7937_v2  ;;  %v7952_v2 = vld [vmem:[#allocation11 + $0x34] ss:$8 sps:$4 sm:$0xff]  }
 0x1aa   :  { %1958 = vmatmul.mubr.bf16.gmra.mrb[12].mxu0 %v6964_v34  ;;  %v502_v34 = vrot.slane %v500_v3, 7  ;;  %v662_v3 = vshrl.u32 %v9008_v32, 16 }
 0x1ab   :  { %1967 = vmatprep.mubr.bf16.mxu0 %v6968_v55  ;;  %2021 = vmatpush1.bf16.msra.mxu0 %v7935_v48  ;;  %v521_v55 = vshll.u32 %v8987_v58, 16  ;;  %v6944_v48 = vrot.slane %v595_v62, 11  ;;  %v7962_v62 = vld [vmem:[#allocation11 + $0x70] ss:$8 sps:$4 sm:$0xff]  }
 0x1ac   :  { %2022 = vmatprep.subr.bf16.mxu0 %v7940_v17  ;;  %v505_v60 = vor.u32 %v503_v47, %v502_v34  ;;  %v516_v13 = vrot.slane %v502_v34, 4  ;;  %v644_v17 = vshrl.u32 %v9006_v12, 16  ;;  %v647_v34 = vshll.u32 %v9006_v12, 16 }
 0x1af   :  { %2023 = vmatpush1.bf16.msra.mxu0 %v7938_v54  ;;  %v605_v54 = vor.u32 %v603_v44, %v602_v51  ;;  %v7967_v44 = vld [vmem:[#allocation11 + $0x84] ss:$8 sps:$4 sm:$0xff]  }
 0x1b0   :  { %2940 = vmatprep.subr.bf16.mxu0 %v7943_v14  ;;  %v623_v14 = vor.u32 %v621_v8, %v620_v22 }
 0x1b1   :  { %v606_v47 = vsel %vm8842_vm6, %v6944_v48, %v605_v54 }
 0x1b2   :  { %1968 = vmatmul.mubr.bf16.gmra.mrb[16].mxu0 %v6967_v36  ;;  %v6940_v36 = vrot.slane %v495_v33, 11  ;;  %v639_v33 = vshrl.u32 %v576_v50, 16 }
 0x1b3   :  { %1977 = vmatprep.mubr.bf16.mxu0 %v6971_v19  ;;  %v523_v19 = vor.u32 %v521_v55, %v520_v30  ;;  %v665_v30 = vshll.u32 %v9008_v32, 16  ;;  %v624_v55 = vsel %vm8842_vm6, %v616_v9, %v623_v14  ;;  %v670_v32 = vld [vmem:[#allocation2 + $0x3c] sm:$0x8]  ;;  %v800_v9 = vshrl.u32 %v9029_v35, 16 }
 0x1b4   :  { %v506_v53 = vsel %vm8842_vm6, %v6940_v36, %v505_v60  ;;  %v646_v36 = vrot.slane %v644_v17, 7  ;;  %v664_v60 = vrot.slane %v662_v3, 7  ;;  %v695_v23 = vshrl.u32 %v670_v32, 16  ;;  %v7970_v17 = vld [vmem:[#allocation11 + $0x94] ss:$8 sps:$4 sm:$0xff]  }
 0x1b5   :  { %v524_v58 = vsel %vm8842_vm6, %v516_v13, %v523_v19  ;;  %v7953_v13 = vld [vmem:[#allocation11 + $0x40] ss:$8 sps:$4 sm:$0xff]   ;;  %v6963_v19 = vcombine.low %v606_v47, %v624_v55  ;;  %v818_v3 = vshrl.u32 %v9031_v41, 16  ;;  %v821_v47 = vshll.u32 %v9031_v41, 16 }
 0x1b6   :  { %v6957_v6 = vcombine.low %v506_v53, %v524_v58  ;;  %v660_v12 = vrot.slane %v646_v36, 4  ;;  %v718_v53 = vshrl.u32 %v9015_v57, 16  ;;  %v7956_v58 = vld [vmem:[#allocation11 + $0x50] ss:$8 sps:$4 sm:$0xff]   ;;  %v862_v41 = vshrl.u32 %v9050_v52, 16 }
 0x1ba   :  { %1978 = vmatmul.mubr.bf16.gmra.mrb[20].mxu0 %v6970_v20  ;;  %v474_v20 = vld [vmem:[#allocation2 + $0xe0] sm:$0x8] }
 0x1bb   :  { %1987 = vmatprep.mubr.bf16.mxu0 %v6974_v24  ;;  %v544_v24 = vshrl.u32 %v8992_v39, 16  ;;  %v7949_v39 = vld [vmem:[#allocation11 + $0x24] ss:$8 sps:$4 sm:$0xff]  }
 0x1bd   :  { %v546_v15 = vrot.slane %v544_v24, 7  ;;  %v6946_v24 = vrot.slane %v639_v33, 11  ;;  %v7973_v33 = vld [vmem:[#allocation11 + $0xa4] ss:$8 sps:$4 sm:$0xff]  }
 0x1bf   :  { %v549_v28 = vor.u32 %v547_v4, %v546_v15  ;;  %v560_v38 = vrot.slane %v546_v15, 4  ;;  %v7961_v15 = vld [vmem:[#allocation11 + $0x64] ss:$8 sps:$4 sm:$0xff]   ;;  %v721_v4 = vshll.u32 %v9015_v57, 16  ;;  %v676_v57 = vld [vmem:[#allocation2 + $0xf0] sm:$0x8] }
 0x1c0   :  { %v739_v8 = vshrl.u32 %v676_v57, 16 }
 0x1c1   :  { %v568_v18 = vsel %vm8842_vm6, %v560_v38, %v567_v11  ;;  %v7964_v38 = vld [vmem:[#allocation11 + $0x74] ss:$8 sps:$4 sm:$0xff]   ;;  %v6948_v11 = vrot.slane %v695_v23, 11 }
 0x1c2   :  { %1988 = vmatmul.mubr.bf16.gmra.mrb[24].mxu0 %v6973_v45  ;;  %v10779_v45 = vmov 0   ;;  %v6950_v54 = vrot.slane %v739_v8, 11 }
 0x1c3   :  { %1997 = vmatprep.mubr.bf16.mxu0 %v6977_v49  ;;  %v539_v49 = vshrl.u32 %v474_v20, 16  ;;  %v7958_v20 = vld [vmem:[#allocation11 + $0x54] ss:$8 sps:$4 sm:$0xff]  }
 0x1c5   :  { %v6942_v40 = vrot.slane %v539_v49, 11  ;;  %v667_v49 = vor.u32 %v665_v30, %v664_v60  ;;  %v803_v30 = vshll.u32 %v9029_v35, 16  ;;  %v802_v60 = vrot.slane %v800_v9, 7  ;;  %v2131_v9 = vld [vmem:[#allocation2 + $0x144] sm:$0x11] }
 0x1c7   :  { %v550_v31 = vsel %vm8842_vm6, %v6942_v40, %v549_v28  ;;  %v720_v40 = vrot.slane %v718_v53, 7  ;;  %v816_v23 = vrot.slane %v802_v60, 4 }
 0x1c8   :  { %v6960_v59 = vcombine.low %v550_v31, %v568_v18  ;;  %v747_v31 = vshll.u32 %v9020_v63, 16  ;;  %v765_v18 = vshll.u32 %v9022_v0, 16 }
 0x1ca   :  { %1998 = vmatmul.mubr.bf16.gmra.mrb[28].mxu0 %v10778_v42  ;;  %v649_v42 = vor.u32 %v647_v34, %v646_v36 }
 0x1cb   :  { %2040 = vmatprep.mubr.bf16.mxu0 %v10779_v45 }
 0x1cc   :  { %v650_v5 = vsel %vm8842_vm6, %v6946_v24, %v649_v42  ;;  %v776_v42 = vld [vmem:[#allocation2 + $0xf8] sm:$0x8] }
 0x1d2   :  { %2041 = vmatmul.mubr.bf16.vlgmr.msra.gmra.mrb[0].mxu0 %v6957_v6  ;;  %v668_v6 = vsel %vm8842_vm6, %v660_v12, %v667_v49  ;;  %v844_v12 = vshrl.u32 %v9048_v10, 16  ;;  %v7976_v49 = vld [vmem:[#allocation11 + $0xb4] ss:$8 sps:$4 sm:$0xff]  }
 0x1d3   :  { %2941 = vmatpush1.bf16.msra.mxu0 %v7941_v1  ;;  %2050 = vmatprep.mubr.bf16.mxu0 %v10779_v45  ;;  %v703_v1 = vshll.u32 %v9013_v56, 16  ;;  %v6966_v28 = vcombine.low %v650_v5, %v668_v6 }
 0x1d4   :  { %2942 = vmatprep.subr.bf16.mxu0 %v7946_v7  ;;  %v702_v7 = vrot.slane %v700_v21, 7  ;;  %v7971_v21 = vld [vmem:[#allocation11 + $0xa0] ss:$8 sps:$4 sm:$0xff]  }
 0x1d6   :  { %v705_v43 = vor.u32 %v703_v1, %v702_v7  ;;  %v716_v56 = vrot.slane %v702_v7, 4  ;;  %v2127_v7 = vld [vmem:[#allocation2 + $0xfc] sm:$0xff] }
 0x1d7   :  { %2943 = vmatpush1.bf16.msra.mxu0 %v7944_v27  ;;  %v723_v27 = vor.u32 %v721_v4, %v720_v40  ;;  %v2125_v4 = vld [vmem:[#allocation2 + $0x90] sm:$0x11]  ;;  %v7974_v40 = vld [vmem:[#allocation11 + $0xb0] ss:$8 sps:$4 sm:$0xff]   ;;  %v2188_v8 = vshll.u32 %v2127_v7, 16 }
 0x1d8   :  { %2944 = vmatprep.subr.bf16.mxu0 %v7949_v39  ;;  %v762_v39 = vshrl.u32 %v9022_v0, 16  ;;  %v706_v51 = vsel %vm8842_vm6, %v6948_v11, %v705_v43  ;;  %v770_v0 = vld [vmem:[#allocation2 + $0x44] sm:$0x8]  ;;  %v846_v43 = vrot.slane %v844_v12, 7 }
 0x1d9   :  { %v724_v22 = vsel %vm8842_vm6, %v716_v56, %v723_v27  ;;  %v795_v34 = vshrl.u32 %v770_v0, 16  ;;  %v2129_v11 = vld [vmem:[#allocation2 + $0x120] sm:$0xff]  ;;  %v864_v56 = vrot.slane %v862_v41, 7 }
 0x1da   :  { %2051 = vmatmul.mubr.bf16.gmra.mrb[4].mxu0 %v6960_v59  ;;  %v764_v59 = vrot.slane %v762_v39, 7  ;;  %v6969_v48 = vcombine.low %v706_v51, %v724_v22  ;;  %v7977_v51 = vld [vmem:[#allocation11 + $0xc0] ss:$8 sps:$4 sm:$0xff]  }
 0x1db   :  { %2945 = vmatpush1.bf16.msra.mxu0 %v7947_v37  ;;  %2060 = vmatprep.mubr.bf16.mxu0 %v10779_v45  ;;  %v746_v37 = vrot.slane %v744_v26, 7  ;;  %v7979_v26 = vld [vmem:[#allocation11 + $0xc4] ss:$8 sps:$4 sm:$0xff]  }
 0x1dc   :  { %2946 = vmatprep.subr.bf16.mxu0 %v7952_v2  ;;  %v7965_v2 = vld [vmem:[#allocation11 + $0x80] ss:$8 sps:$4 sm:$0xff]   ;;  %v767_v50 = vor.u32 %v765_v18, %v764_v59  ;;  %v2194_v18 = vshll.u32 %v2129_v11, 16 }
 0x1dd   :  { %v749_v14 = vor.u32 %v747_v31, %v746_v37  ;;  %v760_v63 = vrot.slane %v746_v37, 4  ;;  %v7982_v37 = vld [vmem:[#allocation11 + $0xd4] ss:$8 sps:$4 sm:$0xff]  }
 0x1df   :  { %2947 = vmatpush1.bf16.msra.mxu0 %v7950_v16  ;;  %v7968_v16 = vld [vmem:[#allocation11 + $0x90] ss:$8 sps:$4 sm:$0xff]   ;;  %v750_v55 = vsel %vm8842_vm6, %v6950_v54, %v749_v14  ;;  %v768_v36 = vsel %vm8842_vm6, %v760_v63, %v767_v50  ;;  %v2190_v63 = vrot.slane %v2188_v8, 5 }
 0x1e0   :  { %2948 = vmatprep.subr.bf16.mxu0 %v7955_v25  ;;  %v2123_v25 = vld [vmem:[#allocation2 + $0x6c] sm:$0xff]  ;;  %v6972_v35 = vcombine.low %v750_v55, %v768_v36  ;;  %v2218_v36 = vshll.u32 %v2131_v9, 16  ;;  %v2340_v9 = vld [vmem:[#allocation2 + $0x58] sm:$0xff] }
 0x1e1   :  { %v2164_v24 = vshrl.u32 %v2123_v25, 16 }
 0x1e2   :  { %2061 = vmatmul.mubr.bf16.gmra.mrb[8].mxu0 %v6963_v19  ;;  %v2121_v19 = vld [vmem:[#allocation2 + $0x48] sm:$0xff] }
 0x1e3   :  { %2949 = vmatpush1.bf16.msra.mxu0 %v7953_v13  ;;  %2070 = vmatprep.mubr.bf16.mxu0 %v10779_v45  ;;  %v820_v13 = vrot.slane %v818_v3, 7  ;;  %v2137_v32 = vshrl.u32 %v2121_v19, 16  ;;  %v2140_v53 = vshll.u32 %v2121_v19, 16  ;;  %v2166_v6 = vrot.slane %v2164_v24, 4 }
 0x1e4   :  { %2950 = vmatprep.subr.bf16.mxu0 %v7958_v20  ;;  %v2146_v20 = vshll.u32 %v2123_v25, 16  ;;  %v2196_v3 = vrot.slane %v2194_v18, 5  ;;  %v2232_v25 = vld [vmem:[#allocation2 + $0x50] sm:$0xff]  ;;  %v7994_v18 = vld [vmem:[#allocation11 + $0x114] ss:$8 sps:$4 sm:$0xff]  }
 0x1e5   :  { %v823_v1 = vor.u32 %v821_v47, %v820_v13  ;;  %v2139_v27 = vrot.slane %v2137_v32, 4  ;;  %v2142_v57 = vrot.slane %v2140_v53, 5  ;;  %v10780_v13 = vmov 0  ;;  %v7988_v53 = vld [vmem:[#allocation11 + $0xf4] ss:$8 sps:$4 sm:$0xff]  }
 0x1e6   :  { %v9156_v5 = vrot.slane %v2146_v20, 5  ;;  %v10781_v13 = vsel %vm9173_vm9, 4294967295, %v10780_v13  ;;  %v2245_v20 = vshrl.u32 %v2232_v25, 16  ;;  %v2248_v24 = vshll.u32 %v2232_v25, 16 }
 0x1e7   :  { %2951 = vmatpush1.bf16.msra.mxu0 %v7956_v58  ;;  %v6952_v58 = vrot.slane %v795_v34, 11  ;;  %v2234_v34 = vld [vmem:[#allocation2 + $0x74] sm:$0xff]  ;;  %10782 = vst [vmem:[#allocation24_spill] sm:$0xff] %v10781_v13  ;;  %v2353_v25 = vshrl.u32 %v2340_v9, 16 }
 0x1e8   :  { %2952 = vmatprep.subr.bf16.mxu0 %v7961_v15  ;;  %v805_v15 = vor.u32 %v803_v30, %v802_v60  ;;  %v2167_v31 = vor.u32 %v2166_v6, %v9156_v5  ;;  %v7985_v30 = vld [vmem:[#allocation11 + $0xe4] ss:$8 sps:$4 sm:$0xff]   ;;  %v2254_v12 = vshll.u32 %v2234_v34, 16 }
 0x1ea   :  { %2071 = vmatmul.mubr.bf16.gmra.mrb[12].mxu0 %v6966_v28  ;;  %v847_v28 = vshll.u32 %v9048_v10, 16  ;;  %v806_v39 = vsel %vm8842_vm6, %v6952_v58, %v805_v15  ;;  %v2170_v10 = vshll.u32 %v2125_v4, 16  ;;  %v2168_v50 = vrot.slane %v2167_v31, 4  ;;  %v7989_v31 = vld [vmem:[#allocation11 + $0x100] ss:$8 sps:$4 sm:$0xff]  }
 0x1eb   :  { %2953 = vmatpush1.bf16.msra.mxu0 %v7959_v46  ;;  %2080 = vmatprep.mubr.bf16.mxu0 %v10779_v45  ;;  %v839_v46 = vshrl.u32 %v776_v42, 16  ;;  %v2250_v4 = vrot.slane %v2248_v24, 5 }
 0x1ec   :  { %2954 = vmatprep.subr.bf16.mxu0 %v7964_v38  ;;  %v865_v38 = vshll.u32 %v9050_v52, 16  ;;  %v2212_v52 = vshrl.u32 %v2129_v11, 16  ;;  %v2172_v0 = vrot.slane %v2170_v10, 5  ;;  %v2240_v11 = vld [vmem:[#allocation2 + $0x128] sm:$0xff] }
 0x1ed   :  { %v6954_v59 = vrot.slane %v839_v46, 11  ;;  %v2320_v8 = vshrl.u32 %v2240_v11, 16 }
 0x1ee   :  { %v867_v54 = vor.u32 %v865_v38, %v864_v56  ;;  %v7986_v38 = vld [vmem:[#allocation11 + $0xf0] ss:$8 sps:$4 sm:$0xff]  }
 0x1ef   :  { %2955 = vmatpush1.bf16.msra.mxu0 %v7962_v62  ;;  %v824_v62 = vsel %vm8842_vm6, %v816_v23, %v823_v1  ;;  %v2236_v23 = vld [vmem:[#allocation2 + $0x98] sm:$0x11]  ;;  %v2247_v1 = vrot.slane %v2245_v20, 4 }
 0x1f0   :  { %2956 = vmatprep.subr.bf16.mxu0 %v7967_v44  ;;  %v2185_v44 = vshrl.u32 %v2127_v7, 16  ;;  %v6975_v22 = vcombine.low %v806_v39, %v824_v62  ;;  %v2220_v7 = vrot.slane %v2218_v36, 5  ;;  %v7995_v36 = vld [vmem:[#allocation11 + $0x120] ss:$8 sps:$4 sm:$0xff]  }
 0x1f1   :  { %v2251_v56 = vor.u32 %v2250_v4, %v2247_v1  ;;  %v8003_v1 = vld [vmem:[#allocation11 + $0x144] ss:$8 sps:$4 sm:$0xff]  }
 0x1f2   :  { %2081 = vmatmul.mubr.bf16.gmra.mrb[16].mxu0 %v6969_v48  ;;  %v2143_v48 = vor.u32 %v2142_v57, %v2139_v27  ;;  %v2187_v14 = vrot.slane %v2185_v44, 4  ;;  %v2302_v44 = vshll.u32 %v2240_v11, 16 }
 0x1f3   :  { %2957 = vmatpush1.bf16.msra.mxu0 %v7965_v2  ;;  %2090 = vmatprep.mubr.bf16.mxu0 %v10779_v45  ;;  %v849_v2 = vor.u32 %v847_v28, %v846_v43  ;;  %v2238_v28 = vld [vmem:[#allocation2 + $0x104] sm:$0xff] }
 0x1f4   :  { %2958 = vmatprep.subr.bf16.mxu0 %v7970_v17  ;;  %v860_v17 = vrot.slane %v846_v43, 4  ;;  %v2144_v55 = vrot.slane %v2143_v48, 4  ;;  %v2191_v19 = vor.u32 %v2190_v63, %v2187_v14  ;;  %v2278_v43 = vshll.u32 %v2236_v23, 16  ;;  %v7992_v14 = vld [vmem:[#allocation11 + $0x110] ss:$8 sps:$4 sm:$0xff]  }
 0x1f5   :  { %v850_v47 = vsel %vm8842_vm6, %v6954_v59, %v849_v2  ;;  %v2293_v27 = vshrl.u32 %v2238_v28, 16  ;;  %v2296_v57 = vshll.u32 %v2238_v28, 16  ;;  %v2342_v63 = vld [vmem:[#allocation2 + $0x7c] sm:$0xff] }
 0x1f6   :  { %v868_v60 = vsel %vm8842_vm6, %v860_v17, %v867_v54  ;;  %v2149_v32 = vsel %vm9173_vm9, %v2144_v55, %v9156_v5  ;;  %v2192_v15 = vrot.slane %v2191_v19, 4  ;;  %v2280_v48 = vrot.slane %v2278_v43, 5  ;;  %v8000_v19 = vld [vmem:[#allocation11 + $0x134] ss:$8 sps:$4 sm:$0xff]  }
 0x1f7   :  { %2959 = vmatpush1.bf16.msra.mxu0 %v7968_v16  ;;  %v2214_v16 = vrot.slane %v2212_v52, 4  ;;  %v6978_v41 = vcombine.low %v850_v47, %v868_v60  ;;  %v2298_v59 = vrot.slane %v2296_v57, 5  ;;  %v2304_v17 = vrot.slane %v2302_v44, 5  ;;  %v2350_v57 = vld [vmem:[#allocation2 + $0x154] sm:$0x11] }
 0x1f8   :  { %2960 = vmatprep.subr.bf16.mxu0 %v7973_v33  ;;  %v7980_v33 = vld [vmem:[#allocation11 + $0xd0] ss:$8 sps:$4 sm:$0xff]   ;;  %v2197_v5 = vsel %vm9173_vm9, %v2192_v15, %v2196_v3  ;;  %v2322_v54 = vrot.slane %v2320_v8, 4  ;;  %v2362_v47 = vshll.u32 %v2342_v63, 16  ;;  %v2380_v55 = vshrl.u32 %v2342_v63, 16  ;;  %v2348_v15 = vld [vmem:[#allocation2 + $0x130] sm:$0xff] }
 0x1f9   :  { %v2215_v42 = vor.u32 %v2214_v16, %v2196_v3  ;;  %v2428_v11 = vshrl.u32 %v2348_v15, 16 }
 0x1fa   :  { %2091 = vmatmul.mubr.bf16.gmra.mrb[20].mxu0 %v6972_v35  ;;  %v2272_v35 = vshrl.u32 %v2234_v34, 16 }
 0x1fb   :  { %2961 = vmatpush1.bf16.msra.mxu0 %v7971_v21  ;;  %2100 = vmatprep.mubr.bf16.mxu0 %v10779_v45  ;;  %v2173_v21 = vsel %vm9173_vm9, %v2168_v50, %v2172_v0  ;;  %v2216_v6 = vrot.slane %v2215_v42, 4  ;;  %v7997_v50 = vld [vmem:[#allocation11 + $0x124] ss:$8 sps:$4 sm:$0xff]   ;;  %v2355_v42 = vrot.slane %v2353_v25, 4 }
 0x1fc   :  { %2962 = vmatprep.subr.bf16.mxu0 %v7976_v49  ;;  %v7983_v49 = vld [vmem:[#allocation11 + $0xe0] ss:$8 sps:$4 sm:$0xff]   ;;  %v7100_v58 = vcombine.high %v2149_v32, %v2173_v21  ;;  %v2274_v46 = vrot.slane %v2272_v35, 4  ;;  %v7099_v10 = vcombine.low %v2149_v32, %v2173_v21  ;;  %v2344_v21 = vld [vmem:[#allocation2 + $0xa0] sm:$0x11]  ;;  %v2382_v32 = vrot.slane %v2380_v55, 4 }
 0x1fd   :  { %v2221_v39 = vsel %vm9173_vm9, %v2216_v6, %v2220_v7  ;;  %v2386_v23 = vshll.u32 %v2344_v21, 16 }
 0x1fe   :  { %v7103_v52 = vcombine.high %v2197_v5, %v2221_v39  ;;  %v7102_v60 = vcombine.low %v2197_v5, %v2221_v39  ;;  %v8006_v5 = vld [vmem:[#allocation11 + $0x154] ss:$8 sps:$4 sm:$0xff]  }
 0x1ff   :  { %2963 = vmatpush1.bf16.msra.mxu0 %v7974_v40  ;;  %v2256_v40 = vrot.slane %v2254_v12, 5  ;;  %v2388_v8 = vrot.slane %v2386_v23, 5 }
 0x200   :  { %2964 = vmatprep.subr.bf16.mxu0 %v7979_v26  ;;  %v7991_v26 = vld [vmem:[#allocation11 + $0x104] ss:$8 sps:$4 sm:$0xff]  }
 0x201   :  { %v2275_v62 = vor.u32 %v2274_v46, %v2256_v40 }
 0x202   :  { %2101 = vmatmul.mubr.bf16.gmra.mrb[24].mxu0 %v6975_v22  ;;  %v2242_v22 = vld [vmem:[#allocation2 + $0x14c] sm:$0x11] }
 0x203   :  { %2965 = vmatpush1.bf16.msra.mxu0 %v7977_v51  ;;  %2110 = vmatprep.mubr.bf16.mxu0 %v10779_v45  ;;  %v2252_v51 = vrot.slane %v2251_v56, 4  ;;  %v2276_v2 = vrot.slane %v2275_v62, 4  ;;  %v2326_v0 = vshll.u32 %v2242_v22, 16  ;;  %v2434_v22 = vshll.u32 %v2350_v57, 16 }
 0x204   :  { %2966 = vmatprep.subr.bf16.mxu0 %v7982_v37  ;;  %v2295_v37 = vrot.slane %v2293_v27, 4 }
 0x205   :  { %v2257_v3 = vsel %vm9173_vm9, %v2252_v51, %v2256_v40  ;;  %v2281_v34 = vsel %vm9173_vm9, %v2276_v2, %v2280_v48  ;;  %v2450_v51 = vld [vmem:[#allocation2 + $0x84] sm:$0xff]  ;;  %v2436_v55 = vrot.slane %v2434_v22, 5 }
 0x206   :  { %v2299_v16 = vor.u32 %v2298_v59, %v2295_v37  ;;  %v7106_v20 = vcombine.high %v2257_v3, %v2281_v34  ;;  %v7105_v43 = vcombine.low %v2257_v3, %v2281_v34  ;;  %v8009_v37 = vld [vmem:[#allocation11 + $0x164] ss:$8 sps:$4 sm:$0xff]   ;;  %v2488_v63 = vshrl.u32 %v2450_v51, 16  ;;  %v8012_v3 = vld [vmem:[#allocation11 + $0x174] ss:$8 sps:$4 sm:$0xff]  }
 0x207   :  { %2967 = vmatpush1.bf16.msra.mxu0 %v7980_v33  ;;  %v2356_v33 = vshll.u32 %v2340_v9, 16 }
 0x208   :  { %2968 = vmatprep.subr.bf16.mxu0 %v7985_v30  ;;  %v2323_v30 = vor.u32 %v2322_v54, %v2304_v17  ;;  %v2300_v24 = vrot.slane %v2299_v16, 4 }
 0x209   :  { %v2358_v12 = vrot.slane %v2356_v33, 5  ;;  %v2452_v33 = vld [vmem:[#allocation2 + $0xa8] sm:$0x11] }
 0x20a   :  { %2111 = vmatmul.mubr.bf16.gmra.mrb[28].mxu0 %v6978_v41  ;;  %v2324_v35 = vrot.slane %v2323_v30, 4  ;;  %v2364_v41 = vrot.slane %v2362_v47, 5  ;;  %v2305_v4 = vsel %vm9173_vm9, %v2300_v24, %v2304_v17  ;;  %v8010_v24 = vld [vmem:[#allocation11 + $0x170] ss:$8 sps:$4 sm:$0xff]   ;;  %v2494_v21 = vshll.u32 %v2452_v33, 16 }
 0x20b   :  { %2969 = vmatpush1.bf16.msra.mxu0 %v7983_v49  ;;  %2972 = vmatprep.mubr.bf16.mxu0 %v7100_v58  ;;  %v2328_v49 = vrot.slane %v2326_v0, 5  ;;  %v7998_v58 = vld [vmem:[#allocation11 + $0x130] ss:$8 sps:$4 sm:$0xff]   ;;  %v2359_v6 = vor.u32 %v2358_v12, %v2355_v42 }
 0x20c   :  { %2970 = vmatprep.subr.bf16.mxu0 %v7988_v53  ;;  %v2346_v53 = vld [vmem:[#allocation2 + $0x10c] sm:$0xff]  ;;  %v2383_v28 = vor.u32 %v2382_v32, %v2364_v41 }
 0x20d   :  { %v2401_v7 = vshrl.u32 %v2346_v53, 16  ;;  %v2404_v40 = vshll.u32 %v2346_v53, 16  ;;  %v2329_v46 = vsel %vm9173_vm9, %v2324_v35, %v2328_v49  ;;  %v2360_v27 = vrot.slane %v2359_v6, 4 }
 0x20e   :  { %v7109_v56 = vcombine.high %v2305_v4, %v2329_v46  ;;  %v2384_v44 = vrot.slane %v2383_v28, 4  ;;  %v7108_v0 = vcombine.low %v2305_v4, %v2329_v46  ;;  %v2496_v4 = vrot.slane %v2494_v21, 5 }
 0x20f   :  { %2971 = vmatpush1.bf16.msra.mxu0 %v7986_v38  ;;  %v2410_v38 = vshll.u32 %v2348_v15, 16  ;;  %v2403_v39 = vrot.slane %v2401_v7, 4  ;;  %v2406_v62 = vrot.slane %v2404_v40, 5  ;;  %v2365_v59 = vsel %vm9173_vm9, %v2360_v27, %v2364_v41  ;;  %v2458_v40 = vld [vmem:[#allocation2 + $0x15c] sm:$0x11] }
 0x210   :  { %3053 = vmatprep.subr.bf16.mxu0 %v7991_v26  ;;  %v8001_v26 = vld [vmem:[#allocation11 + $0x140] ss:$8 sps:$4 sm:$0xff]   ;;  %v2389_v54 = vsel %vm9173_vm9, %v2384_v44, %v2388_v8 }
 0x211   :  { %v2407_v2 = vor.u32 %v2406_v62, %v2403_v39  ;;  %v7112_v16 = vcombine.high %v2365_v59, %v2389_v54  ;;  %v7111_v15 = vcombine.low %v2365_v59, %v2389_v54  ;;  %v2122_v39 = vld [vmem:[#allocation2 + $0x50] sm:$0xf] }
 0x212   :  { %2973 = vmatmul.mubr.bf16.vlgmr.msra.gmra.mrb[0].mxu0 %v7099_v10  ;;  %v2430_v10 = vrot.slane %v2428_v11, 4  ;;  %v2542_v11 = vshll.u32 %v2458_v40, 16  ;;  %v2237_v40 = vld [vmem:[#allocation2 + $0xa0] sm:$0x1] }
 0x213   :  { %3054 = vmatpush1.bf16.msra.mxu0 %v7989_v31  ;;  %2982 = vmatprep.mubr.bf16.mxu0 %v7103_v52  ;;  %v2412_v31 = vrot.slane %v2410_v38, 5  ;;  %v8004_v52 = vld [vmem:[#allocation11 + $0x150] ss:$8 sps:$4 sm:$0xff]   ;;  %v2408_v25 = vrot.slane %v2407_v2, 4 }
 0x214   :  { %3055 = vmatprep.subr.bf16.mxu0 %v7994_v18  ;;  %v2448_v18 = vld [vmem:[#allocation2 + $0x60] sm:$0xff]  ;;  %v2544_v8 = vrot.slane %v2542_v11, 5 }
 0x215   :  { %v2461_v48 = vshrl.u32 %v2448_v18, 16  ;;  %v2464_v17 = vshll.u32 %v2448_v18, 16  ;;  %v2431_v9 = vor.u32 %v2430_v10, %v2412_v31  ;;  %v2413_v42 = vsel %vm9173_vm9, %v2408_v25, %v2412_v31  ;;  %v2124_v31 = vld [vmem:[#allocation2 + $0x74] sm:$0xf] }
 0x216   :  { %v2151_v10 = vshrl.u32 %v2122_v39, 16  ;;  %v2154_v18 = vshll.u32 %v2122_v39, 16 }
 0x217   :  { %3056 = vmatpush1.bf16.msra.mxu0 %v7992_v14  ;;  %v2470_v14 = vshll.u32 %v2450_v51, 16  ;;  %v2463_v34 = vrot.slane %v2461_v48, 4  ;;  %v2466_v30 = vrot.slane %v2464_v17, 5  ;;  %v2432_v47 = vrot.slane %v2431_v9, 4 }
 0x218   :  { %3057 = vmatprep.subr.bf16.mxu0 %v7997_v50  ;;  %v8007_v50 = vld [vmem:[#allocation11 + $0x160] ss:$8 sps:$4 sm:$0xff]   ;;  %v2174_v51 = vshrl.u32 %v2124_v31, 16  ;;  %v2153_v2 = vrot.slane %v2151_v10, 4  ;;  %v2156_v48 = vrot.slane %v2154_v18, 5 }
 0x219   :  { %v2467_v12 = vor.u32 %v2466_v30, %v2463_v34  ;;  %v2437_v41 = vsel %vm9173_vm9, %v2432_v47, %v2436_v55 }
 0x21a   :  { %2983 = vmatmul.mubr.bf16.gmra.mrb[4].mxu0 %v7102_v60  ;;  %v2490_v60 = vrot.slane %v2488_v63, 4  ;;  %v7115_v23 = vcombine.high %v2413_v42, %v2437_v41  ;;  %v7114_v27 = vcombine.low %v2413_v42, %v2437_v41  ;;  %v2176_v9 = vrot.slane %v2174_v51, 4  ;;  %v2126_v63 = vld [vmem:[#allocation2 + $0x98] sm:$0x1] }
 0x21b   :  { %2992 = vmatprep.mubr.bf16.mxu0 %v7106_v20  ;;  %3058 = vmatpush1.bf16.msra.mxu0 %v7995_v36  ;;  %v2472_v36 = vrot.slane %v2470_v14, 5  ;;  %v2456_v20 = vld [vmem:[#allocation2 + $0x138] sm:$0xff]  ;;  %v2128_v14 = vld [vmem:[#allocation2 + $0x104] sm:$0xf]  ;;  %v2180_v33 = vshll.u32 %v2126_v63, 16 }
 0x21c   :  { %3059 = vmatprep.subr.bf16.mxu0 %v8000_v19  ;;  %v2454_v19 = vld [vmem:[#allocation2 + $0x114] sm:$0xff]  ;;  %v2518_v53 = vshll.u32 %v2456_v20, 16 }
 0x21d   :  { %v2509_v35 = vshrl.u32 %v2454_v19, 16  ;;  %v2512_v49 = vshll.u32 %v2454_v19, 16  ;;  %v2491_v32 = vor.u32 %v2490_v60, %v2472_v36 }
 0x21e   :  { %v2520_v28 = vrot.slane %v2518_v53, 5 }
 0x21f   :  { %3060 = vmatpush1.bf16.msra.mxu0 %v7998_v58  ;;  %v2536_v58 = vshrl.u32 %v2456_v20, 16  ;;  %v2511_v6 = vrot.slane %v2509_v35, 4  ;;  %v2492_v7 = vrot.slane %v2491_v32, 4  ;;  %v2514_v46 = vrot.slane %v2512_v49, 5  ;;  %v2235_v35 = vld [vmem:[#allocation2 + $0x7c] sm:$0xf] }
 0x220   :  { %3061 = vmatprep.subr.bf16.mxu0 %v8003_v1  ;;  %v2468_v1 = vrot.slane %v2467_v12, 4  ;;  %v2233_v12 = vld [vmem:[#allocation2 + $0x58] sm:$0xf] }
 0x221   :  { %v2538_v38 = vrot.slane %v2536_v58, 4  ;;  %v2259_v53 = vshrl.u32 %v2233_v12, 16  ;;  %v2262_v58 = vshll.u32 %v2233_v12, 16 }
 0x222   :  { %2993 = vmatmul.mubr.bf16.gmra.mrb[8].mxu0 %v7105_v43  ;;  %v2497_v43 = vsel %vm9173_vm9, %v2492_v7, %v2496_v4  ;;  %v2282_v4 = vshrl.u32 %v2235_v35, 16 }
 0x223   :  { %3002 = vmatprep.mubr.bf16.mxu0 %v7109_v56  ;;  %3062 = vmatpush1.bf16.msra.mxu0 %v8001_v26  ;;  %v2473_v26 = vsel %vm9173_vm9, %v2468_v1, %v2472_v36  ;;  %v2539_v56 = vor.u32 %v2538_v38, %v2520_v28  ;;  %v2132_v36 = vld [vmem:[#allocation2 + $0x14c] sm:$0x1]  ;;  %v2268_v1 = vshll.u32 %v2235_v35, 16  ;;  %v2349_v35 = vld [vmem:[#allocation2 + $0x138] sm:$0xf] }
 0x224   :  { %3063 = vmatprep.subr.bf16.mxu0 %v8006_v5  ;;  %v2515_v5 = vor.u32 %v2514_v46, %v2511_v6  ;;  %v7118_v57 = vcombine.high %v2473_v26, %v2497_v43  ;;  %v7117_v59 = vcombine.low %v2473_v26, %v2497_v43  ;;  %v2228_v49 = vshll.u32 %v2132_v36, 16 }
 0x225   :  { %v2540_v44 = vrot.slane %v2539_v56, 4  ;;  %v2261_v46 = vrot.slane %v2259_v53, 4  ;;  %v2270_v26 = vrot.slane %v2268_v1, 5  ;;  %v2284_v43 = vrot.slane %v2282_v4, 4  ;;  %v2241_v56 = vld [vmem:[#allocation2 + $0x130] sm:$0xf] }
 0x226   :  { %v2516_v62 = vrot.slane %v2515_v5, 4  ;;  %v2230_v11 = vrot.slane %v2228_v49, 5  ;;  %v2239_v5 = vld [vmem:[#allocation2 + $0x10c] sm:$0xf]  ;;  %v2316_v10 = vshll.u32 %v2241_v56, 16  ;;  %v2330_v18 = vshrl.u32 %v2241_v56, 16 }
 0x227   :  { %3064 = vmatpush1.bf16.msra.mxu0 %v8004_v52  ;;  %v2160_v52 = vshll.u32 %v2124_v31, 16  ;;  %v2285_v31 = vor.u32 %v2284_v43, %v2270_v26  ;;  %v2424_v53 = vshll.u32 %v2349_v35, 16  ;;  %v2451_v56 = vld [vmem:[#allocation2 + $0x8c] sm:$0xf] }
 0x228   :  { %3065 = vmatprep.subr.bf16.mxu0 %v8009_v37  ;;  %v2521_v22 = vsel %vm9173_vm9, %v2516_v62, %v2520_v28  ;;  %v2545_v37 = vsel %vm9173_vm9, %v2540_v44, %v2544_v8  ;;  %v2264_v28 = vrot.slane %v2262_v58, 5  ;;  %v2307_v62 = vshrl.u32 %v2239_v5, 16 }
 0x229   :  { %v7121_v17 = vcombine.high %v2521_v22, %v2545_v37  ;;  %v2162_v54 = vrot.slane %v2160_v52, 5  ;;  %v7120_v47 = vcombine.low %v2521_v22, %v2545_v37  ;;  %v2310_v44 = vshll.u32 %v2239_v5, 16  ;;  %v2243_v22 = vld [vmem:[#allocation2 + $0x154] sm:$0x1]  ;;  %v2449_v5 = vld [vmem:[#allocation2 + $0x68] sm:$0xf] }
 0x22a   :  { %3003 = vmatmul.mubr.bf16.gmra.mrb[12].mxu0 %v7108_v0  ;;  %v2157_v0 = vor.u32 %v2156_v48, %v2153_v2  ;;  %v2265_v39 = vor.u32 %v2264_v28, %v2261_v46  ;;  %v2309_v37 = vrot.slane %v2307_v62, 4  ;;  %v2286_v2 = vrot.slane %v2285_v31, 4  ;;  %v2351_v46 = vld [vmem:[#allocation2 + $0x15c] sm:$0x1] }
 0x22b   :  { %3012 = vmatprep.mubr.bf16.mxu0 %v7112_v16  ;;  %3066 = vmatpush1.bf16.msra.mxu0 %v8007_v50  ;;  %v2130_v50 = vld [vmem:[#allocation2 + $0x128] sm:$0xf]  ;;  %v2202_v16 = vshll.u32 %v2128_v14, 16  ;;  %v2177_v25 = vor.u32 %v2176_v9, %v2162_v54  ;;  %v2341_v9 = vld [vmem:[#allocation2 + $0x60] sm:$0xf]  ;;  %v2336_v63 = vshll.u32 %v2243_v22, 16 }
 0x22c   :  { %3067 = vmatprep.subr.bf16.mxu0 %v8012_v3  ;;  %v2199_v3 = vshrl.u32 %v2128_v14, 16  ;;  %v2208_v34 = vshll.u32 %v2130_v50, 16  ;;  %v2222_v30 = vshrl.u32 %v2130_v50, 16  ;;  %v2158_v55 = vrot.slane %v2157_v0, 4  ;;  %v2343_v14 = vld [vmem:[#allocation2 + $0x84] sm:$0xf] }
 0x22d   :  { %v2204_v19 = vrot.slane %v2202_v16, 5  ;;  %v2178_v20 = vrot.slane %v2177_v25, 4  ;;  %v2266_v51 = vrot.slane %v2265_v39, 4  ;;  %v2370_v16 = vshll.u32 %v2341_v9, 16 }
 0x22e   :  { %v2201_v60 = vrot.slane %v2199_v3, 4  ;;  %v2210_v21 = vrot.slane %v2208_v34, 5  ;;  %v2224_v42 = vrot.slane %v2222_v30, 4  ;;  %v2163_v41 = vsel %vm9173_vm9, %v2158_v55, %v2162_v54 }
 0x22f   :  { %3068 = vmatpush1.bf16.msra.mxu0 %v8010_v24  ;;  %v2182_v24 = vrot.slane %v2180_v33, 5  ;;  %v2332_v54 = vrot.slane %v2330_v18, 4  ;;  %v2271_v50 = vsel %vm9173_vm9, %v2266_v51, %v2270_v26  ;;  %v2367_v3 = vshrl.u32 %v2341_v9, 16  ;;  %v2453_v9 = vld [vmem:[#allocation2 + $0xb0] sm:$0x1] }
 0x230   :  { %v2205_v32 = vor.u32 %v2204_v19, %v2201_v60  ;;  %v2376_v34 = vshll.u32 %v2343_v14, 16  ;;  %v2390_v30 = vshrl.u32 %v2343_v14, 16  ;;  %v2345_v60 = vld [vmem:[#allocation2 + $0xa8] sm:$0x1]  ;;  %v2438_v58 = vshrl.u32 %v2349_v35, 16 }
 0x231   :  { %v2369_v19 = vrot.slane %v2367_v3, 4  ;;  %v2426_v28 = vrot.slane %v2424_v53, 5  ;;  %v2475_v62 = vshrl.u32 %v2449_v5, 16  ;;  %v2498_v18 = vshrl.u32 %v2451_v56, 16  ;;  %v2457_v14 = vld [vmem:[#allocation2 + $0x140] sm:$0xf] }
 0x232   :  { %3013 = vmatmul.mubr.bf16.gmra.mrb[16].mxu0 %v7111_v15  ;;  %v2183_v15 = vsel %vm9173_vm9, %v2178_v20, %v2182_v24  ;;  %v2206_v7 = vrot.slane %v2205_v32, 4  ;;  %v2347_v20 = vld [vmem:[#allocation2 + $0x114] sm:$0xf]  ;;  %v2392_v12 = vrot.slane %v2390_v30, 4  ;;  %v2396_v32 = vshll.u32 %v2345_v60, 16 }
 0x233   :  { %3022 = vmatprep.mubr.bf16.mxu0 %v7115_v23  ;;  %v2225_v23 = vor.u32 %v2224_v42, %v2210_v21  ;;  %v7101_v6 = vcombine.low %v2163_v41, %v2183_v15  ;;  %v2378_v42 = vrot.slane %v2376_v34, 5  ;;  %v2415_v49 = vshrl.u32 %v2347_v20, 16 }
 0x234   :  { %v2418_v41 = vshll.u32 %v2347_v20, 16  ;;  %v2398_v43 = vrot.slane %v2396_v32, 5  ;;  %v2532_v34 = vshll.u32 %v2457_v14, 16  ;;  %v2546_v30 = vshrl.u32 %v2457_v14, 16 }
 0x235   :  { %v2226_v38 = vrot.slane %v2225_v23, 4  ;;  %v2393_v4 = vor.u32 %v2392_v12, %v2378_v42 }
 0x237   :  { %v2231_v8 = vsel %vm9173_vm9, %v2226_v38, %v2230_v11  ;;  %v2440_v38 = vrot.slane %v2438_v58, 4  ;;  %v2394_v26 = vrot.slane %v2393_v4, 4 }
 0x239   :  { %v2441_v39 = vor.u32 %v2440_v38, %v2426_v28  ;;  %v2399_v31 = vsel %vm9173_vm9, %v2394_v26, %v2398_v43 }
 0x23a   :  { %3023 = vmatmul.mubr.bf16.gmra.mrb[20].mxu0 %v7114_v27  ;;  %v2288_v27 = vshll.u32 %v2237_v40, 16 }
 0x23b   :  { %3032 = vmatprep.mubr.bf16.mxu0 %v7118_v57  ;;  %v2211_v57 = vsel %vm9173_vm9, %v2206_v7, %v2210_v21  ;;  %v2372_v21 = vrot.slane %v2370_v16, 5  ;;  %v2420_v7 = vrot.slane %v2418_v41, 5 }
 0x23c   :  { %v7104_v52 = vcombine.low %v2211_v57, %v2231_v8  ;;  %v2290_v48 = vrot.slane %v2288_v27, 5  ;;  %v2444_v57 = vshll.u32 %v2351_v46, 16 }
 0x23d   :  { %v2373_v1 = vor.u32 %v2372_v21, %v2369_v19  ;;  %v2548_v21 = vrot.slane %v2546_v30, 4 }
 0x23e   :  { %v2291_v25 = vsel %vm9173_vm9, %v2286_v2, %v2290_v48  ;;  %v2446_v51 = vrot.slane %v2444_v57, 5 }
 0x23f   :  { %v7107_v55 = vcombine.low %v2271_v50, %v2291_v25  ;;  %v2374_v11 = vrot.slane %v2373_v1, 4 }
 0x241   :  { %v2379_v8 = vsel %vm9173_vm9, %v2374_v11, %v2378_v42  ;;  %v2459_v42 = vld [vmem:[#allocation2 + $0x164] sm:$0x1] }
 0x242   :  { %3033 = vmatmul.mubr.bf16.gmra.mrb[24].mxu0 %v7117_v59  ;;  %v2312_v59 = vrot.slane %v2310_v44, 5  ;;  %v2478_v44 = vshll.u32 %v2449_v5, 16  ;;  %v7113_v22 = vcombine.low %v2379_v8, %v2399_v31  ;;  %v2552_v32 = vshll.u32 %v2459_v42, 16 }
 0x243   :  { %3042 = vmatprep.mubr.bf16.mxu0 %v7121_v17  ;;  %v2318_v17 = vrot.slane %v2316_v10, 5  ;;  %v2484_v10 = vshll.u32 %v2451_v56, 16 }
 0x244   :  { %v2313_v0 = vor.u32 %v2312_v59, %v2309_v37  ;;  %v2442_v37 = vrot.slane %v2441_v39, 4  ;;  %v2477_v59 = vrot.slane %v2475_v62, 4  ;;  %v2480_v2 = vrot.slane %v2478_v44, 5 }
 0x245   :  { %v2333_v33 = vor.u32 %v2332_v54, %v2318_v17  ;;  %v2486_v48 = vrot.slane %v2484_v10, 5  ;;  %v2455_v54 = vld [vmem:[#allocation2 + $0x11c] sm:$0xf] }
 0x246   :  { %v2314_v36 = vrot.slane %v2313_v0, 4  ;;  %v2447_v50 = vsel %vm9173_vm9, %v2442_v37, %v2446_v51  ;;  %v2481_v0 = vor.u32 %v2480_v2, %v2477_v59  ;;  %v2523_v3 = vshrl.u32 %v2455_v54, 16 }
 0x247   :  { %v2334_v24 = vrot.slane %v2333_v33, 4  ;;  %v2526_v16 = vshll.u32 %v2455_v54, 16  ;;  %v2504_v33 = vshll.u32 %v2453_v9, 16 }
 0x248   :  { %v2319_v15 = vsel %vm9173_vm9, %v2314_v36, %v2318_v17  ;;  %v2500_v17 = vrot.slane %v2498_v18, 4  ;;  %v2525_v36 = vrot.slane %v2523_v3, 4 }
 0x249   :  { %v2528_v60 = vrot.slane %v2526_v16, 5  ;;  %v2506_v20 = vrot.slane %v2504_v33, 5 }
 0x24a   :  { %3043 = vmatmul.mubr.bf16.gmra.mrb[28].mxu0 %v7120_v47  ;;  %v2338_v47 = vrot.slane %v2336_v63, 5  ;;  %v2501_v25 = vor.u32 %v2500_v17, %v2486_v48 }
 0x24b   :  { %3085 = vmatprep.mubr.bf16.mxu0 %v10779_v45  ;;  %v2529_v12 = vor.u32 %v2528_v60, %v2525_v36 }
 0x24c   :  { %v2339_v23 = vsel %vm9173_vm9, %v2334_v24, %v2338_v47  ;;  %v2502_v19 = vrot.slane %v2501_v25, 4  ;;  %v2534_v24 = vrot.slane %v2532_v34, 5 }
 0x24d   :  { %v7110_v40 = vcombine.low %v2319_v15, %v2339_v23  ;;  %v2530_v58 = vrot.slane %v2529_v12, 4  ;;  %v2554_v23 = vrot.slane %v2552_v32, 5 }
 0x24e   :  { %v2549_v41 = vor.u32 %v2548_v21, %v2534_v24 }
 0x24f   :  { %v2535_v1 = vsel %vm9173_vm9, %v2530_v58, %v2534_v24 }
 0x250   :  { %v2550_v15 = vrot.slane %v2549_v41, 4 }
 0x252   :  { %3086 = vmatmul.mubr.bf16.vlgmr.msra.gmra.mrb[0].mxu0 %v7101_v6  ;;  %v2417_v6 = vrot.slane %v2415_v49, 4  ;;  %v2507_v49 = vsel %vm9173_vm9, %v2502_v19, %v2506_v20  ;;  %v2555_v4 = vsel %vm9173_vm9, %v2550_v15, %v2554_v23 }
 0x253   :  { %3095 = vmatprep.mubr.bf16.mxu0 %v10779_v45 }
 0x254   :  { %v2421_v27 = vor.u32 %v2420_v7, %v2417_v6  ;;  %v7122_v6 = vcombine.low %v2535_v1, %v2555_v4 }
 0x25a   :  { %3096 = vmatmul.mubr.bf16.gmra.mrb[4].mxu0 %v7104_v52  ;;  %v2422_v52 = vrot.slane %v2421_v27, 4 }
 0x25b   :  { %3105 = vmatprep.mubr.bf16.mxu0 %v10779_v45 }
 0x25c   :  { %v2427_v63 = vsel %vm9173_vm9, %v2422_v52, %v2426_v28 }
 0x25d   :  { %v7116_v47 = vcombine.low %v2427_v63, %v2447_v50 }
 0x262   :  { %3106 = vmatmul.mubr.bf16.gmra.mrb[8].mxu0 %v7107_v55  ;;  %v2482_v55 = vrot.slane %v2481_v0, 4 }
 0x263   :  { %3115 = vmatprep.mubr.bf16.mxu0 %v10779_v45 }
 0x264   :  { %v2487_v35 = vsel %vm9173_vm9, %v2482_v55, %v2486_v48 }
 0x265   :  { %v7119_v53 = vcombine.low %v2487_v35, %v2507_v49 }
 0x26a   :  { %3116 = vmatmul.mubr.bf16.gmra.mrb[12].mxu0 %v7110_v40 }
 0x26b   :  { %3125 = vmatprep.mubr.bf16.mxu0 %v10779_v45 }
 0x272   :  { %3126 = vmatmul.mubr.bf16.gmra.mrb[16].mxu0 %v7113_v22 }
 0x273   :  { %3135 = vmatprep.mubr.bf16.mxu0 %v10779_v45 }
 0x27a   :  { %3136 = vmatmul.mubr.bf16.gmra.mrb[20].mxu0 %v7116_v47 }
 0x27b   :  { %3145 = vmatprep.mubr.bf16.mxu0 %v10779_v45 }
 0x282   :  { %3146 = vmatmul.mubr.bf16.gmra.mrb[24].mxu0 %v7119_v53 }
 0x283   :  { %3155 = vmatprep.mubr.bf16.mxu0 %v10779_v45 }
 0x28a   :  { %3156 = vmatmul.mubr.bf16.gmra.mrb[28].mxu0 %v7122_v6 }
 0x325   :  { %v9250_v7 = vpop.f32.mrb[0].mxu0 }
 0x326   :  { %v9252_v40 = vpop.f32.mrb[1].mxu0  ;;  %v3240_v28 = vmul.f32 %v9250_v7, %v9250_v7 }
 0x327   :  { %v9254_v46 = vpop.f32.mrb[2].mxu0  ;;  %v3241_v43 = vmul.f32 %v9252_v40, %v9252_v40 }
 0x328   :  { %v3198_v38 = vadd.f32 %v9254_v46, %v9250_v7  ;;  %v3242_v11 = vmul.f32 %v9254_v46, %v9254_v46  ;;  %v9262_v26 = vpop.f32.mrb[3].mxu0 }
 0x329   :  { %v3219_v5 = vadd.f32 %v9262_v26, %v9252_v40  ;;  %v3243_v56 = vmul.f32 %v9262_v26, %v9262_v26 }
 0x32a   :  { %v3272_v27 = vadd.f32 %v3242_v11, %v3240_v28 }
 0x32b   :  { %v3293_v57 = vadd.f32 %v3243_v56, %v3241_v43 }
 0x32d   :  { %v9270_v39 = vpop.f32.mrb[4].mxu0 }
 0x32e   :  { %v3199_v62 = vadd.f32 %v3198_v38, %v9270_v39  ;;  %v3244_v44 = vmul.f32 %v9270_v39, %v9270_v39  ;;  %v9275_v8 = vpop.f32.mrb[5].mxu0 }
 0x32f   :  { %v3220_v31 = vadd.f32 %v3219_v5, %v9275_v8  ;;  %v3245_v10 = vmul.f32 %v9275_v8, %v9275_v8  ;;  %v9280_v18 = vpop.f32.mrb[6].mxu0 }
 0x330   :  { %v3273_v52 = vadd.f32 %v3272_v27, %v3244_v44  ;;  %v3200_v51 = vadd.f32 %v3199_v62, %v9280_v18  ;;  %v3246_v22 = vmul.f32 %v9280_v18, %v9280_v18  ;;  %v9285_v37 = vpop.f32.mrb[7].mxu0 }
 0x331   :  { %v3294_v59 = vadd.f32 %v3293_v57, %v3245_v10  ;;  %v3221_v2 = vadd.f32 %v3220_v31, %v9285_v37  ;;  %v3247_v48 = vmul.f32 %v9285_v37, %v9285_v37 }
 0x332   :  { %v3274_v17 = vadd.f32 %v3273_v52, %v3246_v22 }
 0x333   :  { %v3295_v54 = vadd.f32 %v3294_v59, %v3247_v48 }
 0x335   :  { %v9290_v9 = vpop.f32.mrb[8].mxu0 }
 0x336   :  { %v3201_v14 = vadd.f32 %v3200_v51, %v9290_v9  ;;  %v3248_v63 = vmul.f32 %v9290_v9, %v9290_v9  ;;  %v9295_v50 = vpop.f32.mrb[9].mxu0 }
 0x337   :  { %v3222_v0 = vadd.f32 %v3221_v2, %v9295_v50  ;;  %v3249_v3 = vmul.f32 %v9295_v50, %v9295_v50  ;;  %v9300_v16 = vpop.f32.mrb[10].mxu0 }
 0x338   :  { %v3275_v25 = vadd.f32 %v3274_v17, %v3248_v63  ;;  %v3202_v33 = vadd.f32 %v3201_v14, %v9300_v16  ;;  %v3250_v34 = vmul.f32 %v9300_v16, %v9300_v16  ;;  %v9305_v30 = vpop.f32.mrb[11].mxu0 }
 0x339   :  { %v3296_v47 = vadd.f32 %v3295_v54, %v3249_v3  ;;  %v3223_v55 = vadd.f32 %v3222_v0, %v9305_v30  ;;  %v3251_v36 = vmul.f32 %v9305_v30, %v9305_v30 }
 0x33a   :  { %v3276_v60 = vadd.f32 %v3275_v25, %v3250_v34 }
 0x33b   :  { %v3297_v19 = vadd.f32 %v3296_v47, %v3251_v36 }
 0x33d   :  { %v9310_v20 = vpop.f32.mrb[12].mxu0 }
 0x33e   :  { %v3203_v24 = vadd.f32 %v3202_v33, %v9310_v20  ;;  %v3252_v21 = vmul.f32 %v9310_v20, %v9310_v20  ;;  %v9315_v42 = vpop.f32.mrb[13].mxu0 }
 0x33f   :  { %v3224_v12 = vadd.f32 %v3223_v55, %v9315_v42  ;;  %v3253_v35 = vmul.f32 %v9315_v42, %v9315_v42  ;;  %v9320_v49 = vpop.f32.mrb[14].mxu0 }
 0x340   :  { %v3277_v41 = vadd.f32 %v3276_v60, %v3252_v21  ;;  %v3204_v32 = vadd.f32 %v3203_v24, %v9320_v49  ;;  %v3254_v53 = vmul.f32 %v9320_v49, %v9320_v49  ;;  %v9325_v58 = vpop.f32.mrb[15].mxu0 }
 0x341   :  { %v3298_v15 = vadd.f32 %v3297_v19, %v3253_v35  ;;  %v3225_v23 = vadd.f32 %v3224_v12, %v9325_v58  ;;  %v3255_v1 = vmul.f32 %v9325_v58, %v9325_v58 }
 0x342   :  { %v3278_v4 = vadd.f32 %v3277_v41, %v3254_v53 }
 0x343   :  { %v3299_v6 = vadd.f32 %v3298_v15, %v3255_v1 }
 0x345   :  { %v9330_v28 = vpop.f32.mrb[16].mxu0 }
 0x346   :  { %v3205_v38 = vadd.f32 %v3204_v32, %v9330_v28  ;;  %v3256_v11 = vmul.f32 %v9330_v28, %v9330_v28  ;;  %v9335_v43 = vpop.f32.mrb[17].mxu0 }
 0x347   :  { %v3226_v5 = vadd.f32 %v3225_v23, %v9335_v43  ;;  %v3257_v56 = vmul.f32 %v9335_v43, %v9335_v43  ;;  %v9340_v27 = vpop.f32.mrb[18].mxu0 }
 0x348   :  { %v3279_v57 = vadd.f32 %v3278_v4, %v3256_v11  ;;  %v3206_v62 = vadd.f32 %v3205_v38, %v9340_v27  ;;  %v3258_v44 = vmul.f32 %v9340_v27, %v9340_v27  ;;  %v9345_v31 = vpop.f32.mrb[19].mxu0 }
 0x349   :  { %v3300_v10 = vadd.f32 %v3299_v6, %v3257_v56  ;;  %v3227_v52 = vadd.f32 %v3226_v5, %v9345_v31  ;;  %v3259_v51 = vmul.f32 %v9345_v31, %v9345_v31 }
 0x34a   :  { %v3280_v22 = vadd.f32 %v3279_v57, %v3258_v44 }
 0x34b   :  { %v3301_v59 = vadd.f32 %v3300_v10, %v3259_v51 }
 0x34d   :  { %v9350_v2 = vpop.f32.mrb[20].mxu0 }
 0x34e   :  { %v3207_v48 = vadd.f32 %v3206_v62, %v9350_v2  ;;  %v3260_v17 = vmul.f32 %v9350_v2, %v9350_v2  ;;  %v9355_v54 = vpop.f32.mrb[21].mxu0 }
 0x34f   :  { %v3228_v14 = vadd.f32 %v3227_v52, %v9355_v54  ;;  %v3261_v63 = vmul.f32 %v9355_v54, %v9355_v54  ;;  %v9360_v0 = vpop.f32.mrb[22].mxu0 }
 0x350   :  { %v3281_v3 = vadd.f32 %v3280_v22, %v3260_v17  ;;  %v3208_v25 = vadd.f32 %v3207_v48, %v9360_v0  ;;  %v3262_v33 = vmul.f32 %v9360_v0, %v9360_v0  ;;  %v9365_v34 = vpop.f32.mrb[23].mxu0 }
 0x351   :  { %v3302_v47 = vadd.f32 %v3301_v59, %v3261_v63  ;;  %v3229_v55 = vadd.f32 %v3228_v14, %v9365_v34  ;;  %v3263_v36 = vmul.f32 %v9365_v34, %v9365_v34 }
 0x352   :  { %v3282_v60 = vadd.f32 %v3281_v3, %v3262_v33 }
 0x353   :  { %v3303_v19 = vadd.f32 %v3302_v47, %v3263_v36 }
 0x355   :  { %v9370_v24 = vpop.f32.mrb[24].mxu0 }
 0x356   :  { %v3209_v21 = vadd.f32 %v3208_v25, %v9370_v24  ;;  %v3264_v12 = vmul.f32 %v9370_v24, %v9370_v24  ;;  %v9375_v35 = vpop.f32.mrb[25].mxu0 }
 0x357   :  { %v3230_v41 = vadd.f32 %v3229_v55, %v9375_v35  ;;  %v3265_v32 = vmul.f32 %v9375_v35, %v9375_v35  ;;  %v9380_v53 = vpop.f32.mrb[26].mxu0 }
 0x358   :  { %v3283_v15 = vadd.f32 %v3282_v60, %v3264_v12  ;;  %v3210_v23 = vadd.f32 %v3209_v21, %v9380_v53  ;;  %v3266_v1 = vmul.f32 %v9380_v53, %v9380_v53  ;;  %v9385_v4 = vpop.f32.mrb[27].mxu0 }
 0x359   :  { %v3304_v6 = vadd.f32 %v3303_v19, %v3265_v32  ;;  %v3231_v38 = vadd.f32 %v3230_v41, %v9385_v4  ;;  %v3267_v11 = vmul.f32 %v9385_v4, %v9385_v4 }
 0x35a   :  { %v3284_v5 = vadd.f32 %v3283_v15, %v3266_v1 }
 0x35b   :  { %v3305_v56 = vadd.f32 %v3304_v6, %v3267_v11 }
 0x35d   :  { %v9390_v57 = vpop.f32.mrb[28].mxu0 }
 0x35e   :  { %v3211_v62 = vadd.f32 %v3210_v23, %v9390_v57  ;;  %v3268_v44 = vmul.f32 %v9390_v57, %v9390_v57  ;;  %v9395_v10 = vpop.f32.mrb[29].mxu0 }
 0x35f   :  { %v3232_v52 = vadd.f32 %v3231_v38, %v9395_v10  ;;  %v3269_v51 = vmul.f32 %v9395_v10, %v9395_v10  ;;  %v9400_v22 = vpop.f32.mrb[30].mxu0 }
 0x360   :  { %v3285_v59 = vadd.f32 %v3284_v5, %v3268_v44  ;;  %v3212_v48 = vadd.f32 %v3211_v62, %v9400_v22  ;;  %v3270_v17 = vmul.f32 %v9400_v22, %v9400_v22  ;;  %v9405_v14 = vpop.f32.mrb[31].mxu0 }
 0x361   :  { %v3306_v63 = vadd.f32 %v3305_v56, %v3269_v51  ;;  %v3233_v3 = vadd.f32 %v3232_v52, %v9405_v14  ;;  %v3271_v25 = vmul.f32 %v9405_v14, %v9405_v14 }
 0x362   :  { %v3213_v33 = vrot.slane %v3212_v48, 4  ;;  %v3286_v47 = vadd.f32 %v3285_v59, %v3270_v17 }
 0x363   :  { %v3234_v55 = vrot.slane %v3233_v3, 4  ;;  %v3307_v36 = vadd.f32 %v3306_v63, %v3271_v25 }
 0x364   :  { %v3214_v60 = vadd.f32 %v3213_v33, %v3212_v48  ;;  %v3287_v19 = vrot.slane %v3286_v47, 4 }
 0x365   :  { %v3235_v21 = vadd.f32 %v3234_v55, %v3233_v3  ;;  %v3308_v12 = vrot.slane %v3307_v36, 4 }
 0x366   :  { %v3215_v41 = vrot.slane %v3214_v60, 2  ;;  %v3288_v32 = vadd.f32 %v3287_v19, %v3286_v47 }
 0x367   :  { %v3236_v15 = vrot.slane %v3235_v21, 2  ;;  %v3309_v23 = vadd.f32 %v3308_v12, %v3307_v36 }
 0x368   :  { %v3216_v1 = vadd.f32 %v3215_v41, %v3214_v60  ;;  %v3289_v6 = vrot.slane %v3288_v32, 2 }
 0x369   :  { %v3237_v38 = vadd.f32 %v3236_v15, %v3235_v21  ;;  %v3310_v11 = vrot.slane %v3309_v23, 2 }
 0x36a   :  { %v3217_v5 = vrot.slane %v3216_v1, 1  ;;  %v3290_v56 = vadd.f32 %v3289_v6, %v3288_v32  ;;  %v3348_v6 = vlaneseq }
 0x36b   :  { %v3311_v62 = vadd.f32 %v3310_v11, %v3309_v23  ;;  %v3238_v51 = vrot.slane %v3237_v38, 1  ;;  %v3340_v11 = vld [vmem:[%s10731_s8] sm:$0x1]  ;;  %s149_s8 = sld [smem:[#allocation3]] }
 0x36c   :  { %v3218_v44 = vadd.f32 %v3217_v5, %v3216_v1  ;;  %v3291_v52 = vrot.slane %v3290_v56, 1 }
 0x36d   :  { %v3312_v48 = vrot.slane %v3311_v62, 1  ;;  %v3239_v17 = vadd.f32 %v3238_v51, %v3237_v38  ;;  %v3349_v38 = vshrl.u32 %v3348_v6, 7  ;;  %v8039_v6 = vld [vmem:[#allocation14 + $0x80] ss:$8 sps:$4 sm:$0xff]  }
 0x36e   :  { %3315 = vrot.lane.b32.xlu0 %v3218_v44, %s8461_s26  ;;  %v3292_v59 = vadd.f32 %v3291_v52, %v3290_v56 }
 0x36f   :  { %v3313_v63 = vadd.f32 %v3312_v48, %v3311_v62  ;;  %v9417_v5 = vsub.s32 0, %v3349_v38  ;;  %v8040_v38 = vld [vmem:[#allocation14 + $0x94] ss:$8 sps:$4 sm:$0xff]  }
 0x370   :  { %3327 = vrot.lane.b32.xlu1 %v3292_v59, %s8461_s26 }
 0x371   :  { %10783 = vst [vmem:[#allocation25_spill] sm:$0xff] %v9417_v5 }
 0x372   :  { %3321 = vrot.lane.b32.xlu0 %v3239_v17, %s8461_s26 }
 0x374   :  { %3333 = vrot.lane.b32.xlu1 %v3313_v63, %s8461_s26 }
 0x3e0   :  { %v3316_v3 = vpop.permute.xlu0 %3315 }
 0x3e1   :  { %v3318_v25 = vadd.f32 %v3316_v3, %v3218_v44  ;;  %v3344_v44 = vld [vmem:[%s10732_s9] sm:$0x1]  ;;  %v8016_v3 = vld [vmem:[#allocation14 + $0x14] ss:$8 sps:$4 sm:$0xff]  }
 0x3e2   :  { %v3328_v33 = vpop.permute.xlu1 %3327 }
 0x3e3   :  { %v3330_v47 = vadd.f32 %v3328_v33, %v3292_v59  ;;  %v3319_v55 = vadd.f32 %v3318_v25, %v3239_v17  ;;  %v8013_v17 = vld [vmem:[#allocation14 + $0x4] ss:$8 sps:$4 sm:$0xff]   ;;  %v8018_v25 = vld [vmem:[#allocation14 + $0x10] ss:$8 sps:$4 sm:$0xff]  }
 0x3e4   :  { %v3322_v36 = vpop.permute.xlu0 %3321  ;;  %4703 = vmatprep.subr.bf16.mxu1 %v8013_v17  ;;  %v8019_v33 = vld [vmem:[#allocation14 + $0x24] ss:$8 sps:$4 sm:$0xff]   ;;  %v8051_v17 = vld [vmem:[#allocation14 + $0xc0] ss:$8 sps:$4 sm:$0xff]  }
 0x3e5   :  { %v3324_v60 = vadd.f32 %v3322_v36, %v3319_v55  ;;  %v3331_v19 = vadd.f32 %v3330_v47, %v3313_v63  ;;  %v8015_v63 = vld [vmem:[#allocation14] ss:$8 sps:$4 sm:$0xff]   ;;  %v8022_v55 = vld [vmem:[#allocation14 + $0x34] ss:$8 sps:$4 sm:$0xff]   ;;  %v8024_v36 = vld [vmem:[#allocation14 + $0x30] ss:$8 sps:$4 sm:$0xff]  }
 0x3e6   :  { %v3334_v21 = vpop.permute.xlu1 %3333  ;;  %4704 = vmatpush1.bf16.msra.mxu1 %v8015_v63  ;;  %v8021_v47 = vld [vmem:[#allocation14 + $0x20] ss:$8 sps:$4 sm:$0xff]  }
 0x3e7   :  { %v3325_v12 = vmul.f32 0.001953125, %v3324_v60  ;;  %v3336_v41 = vadd.f32 %v3334_v21, %v3331_v19  ;;  %4705 = vmatprep.subr.bf16.mxu1 %v8016_v3  ;;  %v8025_v60 = vld [vmem:[#allocation14 + $0x44] ss:$8 sps:$4 sm:$0xff]   ;;  %v8027_v19 = vld [vmem:[#allocation14 + $0x40] ss:$8 sps:$4 sm:$0xff]  }
 0x3e8   :  { %v8028_v21 = vld [vmem:[#allocation14 + $0x54] ss:$8 sps:$4 sm:$0xff]  }
 0x3e9   :  { %v3338_v32 = vmul.f32 %v3325_v12, %v3325_v12  ;;  %v3337_v15 = vmul.f32 0.001953125, %v3336_v41  ;;  %v8031_v41 = vld [vmem:[#allocation14 + $0x64] ss:$8 sps:$4 sm:$0xff]  }
 0x3ea   :  { %4706 = vmatpush1.bf16.msra.mxu1 %v8018_v25 }
 0x3eb   :  { %v3339_v23 = vsub.f32 %v3337_v15, %v3338_v32  ;;  %4707 = vmatprep.subr.bf16.mxu1 %v8019_v33  ;;  %v8033_v32 = vld [vmem:[#allocation14 + $0x60] ss:$8 sps:$4 sm:$0xff]   ;;  %v8034_v15 = vld [vmem:[#allocation14 + $0x74] ss:$8 sps:$4 sm:$0xff]  }
 0x3ed   :  { %v3341_v1 = vadd.f32 1e-05, %v3339_v23  ;;  %v8036_v23 = vld [vmem:[#allocation14 + $0x70] ss:$8 sps:$4 sm:$0xff]  }
 0x3ee   :  { %4708 = vmatpush1.bf16.msra.mxu1 %v8021_v47 }
 0x3ef   :  { %8251 = vrsqrt.f32 %v3341_v1  ;;  %4709 = vmatprep.subr.bf16.mxu1 %v8022_v55  ;;  %v8037_v1 = vld [vmem:[#allocation14 + $0x84] ss:$8 sps:$4 sm:$0xff]   ;;  %v9438_v55 = vstv %s149_s8 }
 0x3f2   :  { %4710 = vmatpush1.bf16.msra.mxu1 %v8024_v36 }
 0x3f3   :  { %4711 = vmatprep.subr.bf16.mxu1 %v8025_v60 }
 0x3f6   :  { %4712 = vmatpush1.bf16.msra.mxu1 %v8027_v19 }
 0x3f7   :  { %4713 = vmatprep.subr.bf16.mxu1 %v8028_v21 }
 0x3f9   :  { %v8252_v56 = vpop.eup %8251 }
 0x3fa   :  { %v9419_v62 = vmul.f32 %v8252_v56, %v3340_v11  ;;  %v8042_v11 = vld [vmem:[#allocation14 + $0x90] ss:$8 sps:$4 sm:$0xff]   ;;  %v8043_v56 = vld [vmem:[#allocation14 + $0xa4] ss:$8 sps:$4 sm:$0xff]  }
 0x3fc   :  { %v3351_v52 = vrot.slane %v9419_v62, %v9417_v5  ;;  %v3345_v51 = vmul.f32 %v9419_v62, %v3325_v12  ;;  %v8030_v12 = vld [vmem:[#allocation14 + $0x50] ss:$8 sps:$4 sm:$0xff]  }
 0x3fd   :  { %4714 = vmatpush1.bf16.msra.mxu1 %v8030_v12 }
 0x3fe   :  { %3352 = vrot.lane.b32.xlu0 %v3351_v52, %s8461_s26  ;;  %v9428_v59 = vsub.f32 %v3344_v44, %v3345_v51  ;;  %4715 = vmatprep.subr.bf16.mxu1 %v8031_v41  ;;  %v8045_v44 = vld [vmem:[#allocation14 + $0xa0] ss:$8 sps:$4 sm:$0xff]   ;;  %v8046_v52 = vld [vmem:[#allocation14 + $0xb4] ss:$8 sps:$4 sm:$0xff]   ;;  %v8048_v51 = vld [vmem:[#allocation14 + $0xb0] ss:$8 sps:$4 sm:$0xff]  }
 0x400   :  { %v3361_v48 = vrot.slane %v9428_v59, %v9417_v5 }
 0x401   :  { %4716 = vmatpush1.bf16.msra.mxu1 %v8033_v32 }
 0x402   :  { %3362 = vrot.lane.b32.xlu1 %v3361_v48, %s8461_s26  ;;  %4717 = vmatprep.subr.bf16.mxu1 %v8034_v15  ;;  %v8049_v48 = vld [vmem:[#allocation14 + $0xc4] ss:$8 sps:$4 sm:$0xff]  }
 0x405   :  { %4718 = vmatpush1.bf16.msra.mxu1 %v8036_v23 }
 0x406   :  { %4719 = vmatprep.subr.bf16.mxu1 %v8037_v1 }
 0x409   :  { %4720 = vmatpush1.bf16.msra.mxu1 %v8039_v6 }
 0x40a   :  { %4721 = vmatprep.subr.bf16.mxu1 %v8040_v38 }
 0x40d   :  { %4722 = vmatpush1.bf16.msra.mxu1 %v8042_v11 }
 0x40e   :  { %4723 = vmatprep.subr.bf16.mxu1 %v8043_v56 }
 0x411   :  { %4724 = vmatpush1.bf16.msra.mxu1 %v8045_v44 }
 0x412   :  { %4725 = vmatprep.subr.bf16.mxu1 %v8046_v52 }
 0x415   :  { %4726 = vmatpush1.bf16.msra.mxu1 %v8048_v51 }
 0x416   :  { %4727 = vmatprep.subr.bf16.mxu1 %v8049_v48 }
 0x419   :  { %4728 = vmatpush1.bf16.msra.mxu1 %v8051_v17 }
 0x470   :  { %v3353_v63 = vpop.permute.xlu0 %3352 }
 0x471   :  { %v3356_v3 = vsel %vm395_vm3, %v9419_v62, %v3353_v63  ;;  %v8052_v63 = vld [vmem:[#allocation14 + $0xd4] ss:$8 sps:$4 sm:$0xff]  }
 0x472   :  { %v3369_v25 = vrot.slane %v3356_v3, %v9417_v5  ;;  %v8054_v3 = vld [vmem:[#allocation14 + $0xd0] ss:$8 sps:$4 sm:$0xff]   ;;  %4729 = vmatprep.subr.bf16.mxu1 %v8052_v63 }
 0x473   :  { %4730 = vmatpush1.bf16.msra.mxu1 %v8054_v3 }
 0x474   :  { %v3370_v33 = vmul.f32 %v3369_v25, %v9250_v7  ;;  %v3371_v47 = vmul.f32 %v3369_v25, %v9252_v40  ;;  %v3372_v36 = vmul.f32 %v3369_v25, %v9254_v46  ;;  %v3373_v60 = vmul.f32 %v3369_v25, %v9262_v26  ;;  %v3363_v15 = vpop.permute.xlu1 %3362 }
 0x475   :  { %v3374_v19 = vmul.f32 %v3369_v25, %v9270_v39  ;;  %v3375_v21 = vmul.f32 %v3369_v25, %v9275_v8  ;;  %v3376_v12 = vmul.f32 %v3369_v25, %v9280_v18  ;;  %v3377_v62 = vmul.f32 %v3369_v25, %v9285_v37 }
 0x476   :  { %v3378_v41 = vmul.f32 %v3369_v25, %v9290_v9  ;;  %v3379_v7 = vmul.f32 %v3369_v25, %v9295_v50  ;;  %v3380_v40 = vmul.f32 %v3369_v25, %v9300_v16  ;;  %v3381_v32 = vmul.f32 %v3369_v25, %v9305_v30 }
 0x477   :  { %v3382_v46 = vmul.f32 %v3369_v25, %v9310_v20  ;;  %v3383_v26 = vmul.f32 %v3369_v25, %v9315_v42  ;;  %v3384_v39 = vmul.f32 %v3369_v25, %v9320_v49  ;;  %v3385_v8 = vmul.f32 %v3369_v25, %v9325_v58 }
 0x478   :  { %v3386_v18 = vmul.f32 %v3369_v25, %v9330_v28  ;;  %v3387_v37 = vmul.f32 %v3369_v25, %v9335_v43  ;;  %v3388_v9 = vmul.f32 %v3369_v25, %v9340_v27  ;;  %v3389_v50 = vmul.f32 %v3369_v25, %v9345_v31 }
 0x479   :  { %v3390_v16 = vmul.f32 %v3369_v25, %v9350_v2  ;;  %v3391_v30 = vmul.f32 %v3369_v25, %v9355_v54  ;;  %v3392_v20 = vmul.f32 %v3369_v25, %v9360_v0  ;;  %v3393_v42 = vmul.f32 %v3369_v25, %v9365_v34 }
 0x47a   :  { %v3394_v49 = vmul.f32 %v3369_v25, %v9370_v24  ;;  %v3365_v58 = vsel %vm395_vm3, %v9428_v59, %v3363_v15  ;;  %v3395_v28 = vmul.f32 %v3369_v25, %v9375_v35  ;;  %v3396_v43 = vmul.f32 %v3369_v25, %v9380_v53  ;;  %v8057_v15 = vld [vmem:[#allocation14 + $0xe0] ss:$8 sps:$4 sm:$0xff]  }
 0x47b   :  { %v3397_v27 = vmul.f32 %v3369_v25, %v9385_v4  ;;  %v3405_v31 = vrot.slane %v3365_v58, %v9417_v5  ;;  %v3398_v2 = vmul.f32 %v3369_v25, %v9390_v57  ;;  %v3399_v54 = vmul.f32 %v3369_v25, %v9395_v10  ;;  %v8060_v58 = vld [vmem:[#allocation14 + $0xf0] ss:$8 sps:$4 sm:$0xff]  }
 0x47c   :  { %v3400_v0 = vmul.f32 %v3369_v25, %v9400_v22  ;;  %v3401_v34 = vmul.f32 %v3369_v25, %v9405_v14 }
 0x47d   :  { %v3406_v24 = vadd.f32 %v3405_v31, %v3370_v33  ;;  %v3407_v23 = vadd.f32 %v3405_v31, %v3371_v47  ;;  %v3408_v1 = vadd.f32 %v3405_v31, %v3372_v36  ;;  %v3409_v59 = vadd.f32 %v3405_v31, %v3373_v60 }
 0x47e   :  { %v9473_v6 = vadd.f32 %v3405_v31, %v3374_v19  ;;  %v9475_v35 = vadd.f32 %v3405_v31, %v3375_v21  ;;  %v3412_v53 = vadd.f32 %v3405_v31, %v3376_v12  ;;  %v3413_v4 = vadd.f32 %v3405_v31, %v3377_v62 }
 0x47f   :  { %v9477_v38 = vadd.f32 %v3405_v31, %v3378_v41  ;;  %v9479_v11 = vadd.f32 %v3405_v31, %v3379_v7  ;;  %v9481_v57 = vadd.f32 %v3405_v31, %v3380_v40  ;;  %v9483_v10 = vadd.f32 %v3405_v31, %v3381_v32 }
 0x480   :  { %v9485_v22 = vadd.f32 %v3405_v31, %v3382_v46  ;;  %v9487_v14 = vadd.f32 %v3405_v31, %v3383_v26  ;;  %v9489_v56 = vadd.f32 %v3405_v31, %v3384_v39  ;;  %v9491_v44 = vadd.f32 %v3405_v31, %v3385_v8  ;;  %v8055_v26 = vld [vmem:[#allocation14 + $0xe4] ss:$8 sps:$4 sm:$0xff]  }
 0x481   :  { %v9493_v52 = vadd.f32 %v3405_v31, %v3386_v18  ;;  %v9495_v51 = vadd.f32 %v3405_v31, %v3387_v37  ;;  %v9497_v48 = vadd.f32 %v3405_v31, %v3388_v9  ;;  %v9499_v17 = vadd.f32 %v3405_v31, %v3389_v50  ;;  %4731 = vmatprep.subr.bf16.mxu1 %v8055_v26 }
 0x482   :  { %v9501_v25 = vadd.f32 %v3405_v31, %v3390_v16  ;;  %v9503_v33 = vadd.f32 %v3405_v31, %v3391_v30  ;;  %v9505_v47 = vadd.f32 %v3405_v31, %v3392_v20  ;;  %v9507_v36 = vadd.f32 %v3405_v31, %v3393_v42  ;;  %4732 = vmatpush1.bf16.msra.mxu1 %v8057_v15 }
 0x483   :  { %v9509_v60 = vadd.f32 %v3405_v31, %v3394_v49  ;;  %v9511_v19 = vadd.f32 %v3405_v31, %v3395_v28  ;;  %v9513_v21 = vadd.f32 %v3405_v31, %v3396_v43  ;;  %v9515_v12 = vadd.f32 %v3405_v31, %v3397_v27  ;;  %v8058_v49 = vld [vmem:[#allocation14 + $0xf4] ss:$8 sps:$4 sm:$0xff]  }
 0x484   :  { %v9517_v62 = vadd.f32 %v3405_v31, %v3398_v2  ;;  %v9519_v41 = vadd.f32 %v3405_v31, %v3399_v54  ;;  %v9521_v7 = vadd.f32 %v3405_v31, %v3400_v0  ;;  %v9523_v40 = vadd.f32 %v3405_v31, %v3401_v34  ;;  %4733 = vmatprep.subr.bf16.mxu1 %v8058_v49 }
 0x485   :  { %vm3440_vm10 = vcmp.ge.f32.partialorder %v3408_v1, 0.0  ;;  %vm3441_vm11 = vcmp.ge.f32.partialorder %v3409_v59, 0.0  ;;  %v3473_v32 = vmul.f32 %v9438_v55, %v3408_v1  ;;  %v3474_v46 = vmul.f32 %v9438_v55, %v3409_v59 }
 0x486   :  { %vm3438_vm12 = vcmp.ge.f32.partialorder %v3406_v24, 0.0  ;;  %vm3439_vm13 = vcmp.ge.f32.partialorder %v3407_v23, 0.0  ;;  %v3471_v39 = vmul.f32 %v9438_v55, %v3406_v24  ;;  %v3472_v8 = vmul.f32 %v9438_v55, %v3407_v23  ;;  %4734 = vmatpush1.bf16.msra.mxu1 %v8060_v58 }
 0x487   :  { %v3505_v18 = vsel %vm3440_vm10, %v3408_v1, %v3473_v32  ;;  %v3506_v37 = vsel %vm3441_vm11, %v3409_v59, %v3474_v46  ;;  %vm3444_vm14 = vcmp.ge.f32.partialorder %v3412_v53, 0.0  ;;  %vm3445_vm15 = vcmp.ge.f32.partialorder %v3413_v4, 0.0 }
 0x488   :  { %v7436_v9 = vpack.c.bf16 %v3506_v37, %v3505_v18  ;;  %v3503_v50 = vsel %vm3438_vm12, %v3406_v24, %v3471_v39  ;;  %v3504_v16 = vsel %vm3439_vm13, %v3407_v23, %v3472_v8  ;;  %v3477_v30 = vmul.f32 %v9438_v55, %v3412_v53 }
 0x489   :  { %v7435_v20 = vpack.c.bf16 %v3504_v16, %v3503_v50  ;;  %v3478_v42 = vmul.f32 %v9438_v55, %v3413_v4  ;;  %vm3442_vm2 = vcmp.ge.f32.partialorder %v9473_v6, 0.0  ;;  %vm3443_vm1 = vcmp.ge.f32.partialorder %v9475_v35, 0.0 }
 0x48a   :  { %3557 = vrot.lane.b32.xlu1 %v7436_v9, %s8461_s26  ;;  %v3509_v28 = vsel %vm3444_vm14, %v3412_v53, %v3477_v30  ;;  %v3475_v43 = vmul.f32 %v9438_v55, %v9473_v6  ;;  %v3476_v27 = vmul.f32 %v9438_v55, %v9475_v35  ;;  %vm3448_vm5 = vcmp.ge.f32.partialorder %v9481_v57, 0.0  ;;  %v8064_v53 = vld [vmem:[#allocation14 + $0x104] ss:$8 sps:$4 sm:$0xff]  }
 0x48b   :  { %3555 = vrot.lane.b32.xlu0 %v7435_v20, %s8461_s26  ;;  %v3510_v31 = vsel %vm3445_vm15, %v3413_v4, %v3478_v42  ;;  %vm3449_vm7 = vcmp.ge.f32.partialorder %v9483_v10, 0.0  ;;  %v3481_v2 = vmul.f32 %v9438_v55, %v9481_v57  ;;  %v3482_v54 = vmul.f32 %v9438_v55, %v9483_v10  ;;  %4816 = vmatprep.subr.bf16.mxu1 %v8064_v53 }
 0x48c   :  { %v7438_v0 = vpack.c.bf16 %v3510_v31, %v3509_v28  ;;  %v3507_v34 = vsel %vm3442_vm2, %v9473_v6, %v3475_v43  ;;  %v3508_v24 = vsel %vm3443_vm1, %v9475_v35, %v3476_v27  ;;  %vm3446_vm8 = vcmp.ge.f32.partialorder %v9477_v38, 0.0 }
 0x48d   :  { %v7437_v23 = vpack.c.bf16 %v3508_v24, %v3507_v34  ;;  %v3513_v1 = vsel %vm3448_vm5, %v9481_v57, %v3481_v2  ;;  %v3514_v59 = vsel %vm3449_vm7, %v9483_v10, %v3482_v54  ;;  %vm3447_vm10 = vcmp.ge.f32.partialorder %v9479_v11, 0.0 }
 0x48e   :  { %3561 = vrot.lane.b32.xlu1 %v7438_v0, %s8461_s26  ;;  %v7440_v4 = vpack.c.bf16 %v3514_v59, %v3513_v1  ;;  %v3479_v6 = vmul.f32 %v9438_v55, %v9477_v38  ;;  %v3480_v35 = vmul.f32 %v9438_v55, %v9479_v11  ;;  %vm3452_vm11 = vcmp.ge.f32.partialorder %v9489_v56, 0.0 }
 0x48f   :  { %3559 = vrot.lane.b32.xlu0 %v7437_v23, %s8461_s26  ;;  %vm3453_vm12 = vcmp.ge.f32.partialorder %v9491_v44, 0.0  ;;  %v3485_v57 = vmul.f32 %v9438_v55, %v9489_v56  ;;  %v3486_v10 = vmul.f32 %v9438_v55, %v9491_v44  ;;  %vm3450_vm13 = vcmp.ge.f32.partialorder %v9485_v22, 0.0 }
 0x490   :  { %v3511_v63 = vsel %vm3446_vm8, %v9477_v38, %v3479_v6  ;;  %v3512_v3 = vsel %vm3447_vm10, %v9479_v11, %v3480_v35  ;;  %vm3451_vm14 = vcmp.ge.f32.partialorder %v9487_v14, 0.0  ;;  %v3483_v32 = vmul.f32 %v9438_v55, %v9485_v22 }
 0x491   :  { %v7439_v46 = vpack.c.bf16 %v3512_v3, %v3511_v63  ;;  %v3517_v26 = vsel %vm3452_vm11, %v9489_v56, %v3485_v57  ;;  %v3518_v15 = vsel %vm3453_vm12, %v9491_v44, %v3486_v10  ;;  %v3484_v39 = vmul.f32 %v9438_v55, %v9487_v14  ;;  %v3749_v10 = vld [vmem:[#allocation2 + $0xd8] sm:$0x88] }
 0x492   :  { %3609 = vrot.lane.b32.xlu1 %v7440_v4, %s8461_s26  ;;  %v7442_v8 = vpack.c.bf16 %v3518_v15, %v3517_v26  ;;  %v3515_v38 = vsel %vm3450_vm13, %v9485_v22, %v3483_v32  ;;  %vm3456_vm15 = vcmp.ge.f32.partialorder %v9497_v48, 0.0  ;;  %vm3457_vm2 = vcmp.ge.f32.partialorder %v9499_v17, 0.0  ;;  %v3849_v32 = vld [vmem:[#allocation2 + $0xe0] sm:$0x88] }
 0x493   :  { %3607 = vrot.lane.b32.xlu0 %v7439_v46, %s8461_s26  ;;  %v3516_v11 = vsel %vm3451_vm14, %v9487_v14, %v3484_v39  ;;  %v3489_v56 = vmul.f32 %v9438_v55, %v9497_v48  ;;  %v3490_v44 = vmul.f32 %v9438_v55, %v9499_v17  ;;  %vm3454_vm1 = vcmp.ge.f32.partialorder %v9493_v52, 0.0  ;;  %v3943_v46 = vld [vmem:[#allocation2 + $0x34] sm:$0x88]  ;;  %v3750_v26 = vld [vmem:[#allocation2 + $0xe0] sm:$0x8] }
 0x494   :  { %v7441_v18 = vpack.c.bf16 %v3516_v11, %v3515_v38  ;;  %vm3455_vm5 = vcmp.ge.f32.partialorder %v9495_v51, 0.0  ;;  %v3487_v22 = vmul.f32 %v9438_v55, %v9493_v52  ;;  %v3488_v37 = vmul.f32 %v9438_v55, %v9495_v51  ;;  %v3949_v11 = vld [vmem:[#allocation2 + $0xe8] sm:$0x88] }
 0x495   :  { %v3521_v9 = vsel %vm3456_vm15, %v9497_v48, %v3489_v56  ;;  %v3522_v14 = vsel %vm3457_vm2, %v9499_v17, %v3490_v44  ;;  %vm3460_vm7 = vcmp.ge.f32.partialorder %v9505_v47, 0.0  ;;  %vm3461_vm8 = vcmp.ge.f32.partialorder %v9507_v36, 0.0  ;;  %v3844_v56 = vld [vmem:[#allocation2 + $0x34] sm:$0x8] }
 0x496   :  { %3613 = vrot.lane.b32.xlu1 %v7442_v8, %s8461_s26  ;;  %v7444_v50 = vpack.c.bf16 %v3522_v14, %v3521_v9  ;;  %v3519_v16 = vsel %vm3454_vm1, %v9493_v52, %v3487_v22  ;;  %v3520_v30 = vsel %vm3455_vm5, %v9495_v51, %v3488_v37  ;;  %v3493_v20 = vmul.f32 %v9438_v55, %v9505_v47 }
 0x497   :  { %3611 = vrot.lane.b32.xlu0 %v7441_v18, %s8461_s26  ;;  %v7443_v42 = vpack.c.bf16 %v3520_v30, %v3519_v16  ;;  %v3494_v48 = vmul.f32 %v9438_v55, %v9507_v36  ;;  %vm3458_vm10 = vcmp.ge.f32.partialorder %v9501_v25, 0.0  ;;  %vm3459_vm11 = vcmp.ge.f32.partialorder %v9503_v33, 0.0 }
 0x498   :  { %v3525_v17 = vsel %vm3460_vm7, %v9505_v47, %v3493_v20  ;;  %v3491_v52 = vmul.f32 %v9438_v55, %v9501_v25  ;;  %v3492_v51 = vmul.f32 %v9438_v55, %v9503_v33  ;;  %vm3464_vm12 = vcmp.ge.f32.partialorder %v9513_v21, 0.0 }
 0x499   :  { %v3526_v49 = vsel %vm3461_vm8, %v9507_v36, %v3494_v48  ;;  %vm3465_vm13 = vcmp.ge.f32.partialorder %v9515_v12, 0.0  ;;  %v3497_v58 = vmul.f32 %v9438_v55, %v9513_v21  ;;  %v3498_v28 = vmul.f32 %v9438_v55, %v9515_v12 }
 0x49a   :  { %3661 = vrot.lane.b32.xlu1 %v7444_v50, %s8461_s26  ;;  %v7446_v47 = vpack.c.bf16 %v3526_v49, %v3525_v17  ;;  %v3523_v43 = vsel %vm3458_vm10, %v9501_v25, %v3491_v52  ;;  %v3524_v27 = vsel %vm3459_vm11, %v9503_v33, %v3492_v51  ;;  %vm3462_vm14 = vcmp.ge.f32.partialorder %v9509_v60, 0.0  ;;  %v3850_v49 = vld [vmem:[#allocation2 + $0xe8] sm:$0x8] }
 0x49b   :  { %3659 = vrot.lane.b32.xlu0 %v7443_v42, %s8461_s26  ;;  %v7445_v36 = vpack.c.bf16 %v3524_v27, %v3523_v43  ;;  %v3529_v31 = vsel %vm3464_vm12, %v9513_v21, %v3497_v58  ;;  %v3530_v2 = vsel %vm3465_vm13, %v9515_v12, %v3498_v28  ;;  %vm3463_vm15 = vcmp.ge.f32.partialorder %v9511_v19, 0.0  ;;  %v9684_v27 = vld [vmem:[#allocation2 + $0x3c] sm:$0x8] }
 0x49c   :  { %v7448_v54 = vpack.c.bf16 %v3530_v2, %v3529_v31  ;;  %v3495_v0 = vmul.f32 %v9438_v55, %v9509_v60  ;;  %v3496_v25 = vmul.f32 %v9438_v55, %v9511_v19  ;;  %vm3468_vm2 = vcmp.ge.f32.partialorder %v9521_v7, 0.0 }
 0x49d   :  { %vm3469_vm1 = vcmp.ge.f32.partialorder %v9523_v40, 0.0  ;;  %v3501_v33 = vmul.f32 %v9438_v55, %v9521_v7  ;;  %v3502_v21 = vmul.f32 %v9438_v55, %v9523_v40  ;;  %vm3466_vm5 = vcmp.ge.f32.partialorder %v9517_v62, 0.0 }
 0x49e   :  { %3665 = vrot.lane.b32.xlu1 %v7446_v47, %s8461_s26  ;;  %v3527_v12 = vsel %vm3462_vm14, %v9509_v60, %v3495_v0  ;;  %v3528_v34 = vsel %vm3463_vm15, %v9511_v19, %v3496_v25  ;;  %vm3467_vm7 = vcmp.ge.f32.partialorder %v9519_v41, 0.0  ;;  %v3499_v24 = vmul.f32 %v9438_v55, %v9517_v62  ;;  %v9680_v47 = vld [vmem:[#allocation2 + $0x3c] sm:$0x88]  ;;  %v9692_v0 = vld [vmem:[#allocation2 + $0x44] sm:$0x8] }
 0x49f   :  { %3663 = vrot.lane.b32.xlu0 %v7445_v36, %s8461_s26  ;;  %v7447_v23 = vpack.c.bf16 %v3528_v34, %v3527_v12  ;;  %v3533_v1 = vsel %vm3468_vm2, %v9521_v7, %v3501_v33  ;;  %v3534_v59 = vsel %vm3469_vm1, %v9523_v40, %v3502_v21  ;;  %v3500_v53 = vmul.f32 %v9438_v55, %v9519_v41  ;;  %v3743_v7 = vld [vmem:[#allocation2 + $0x24] sm:$0x88]  ;;  %v3843_v55 = vld [vmem:[#allocation2 + $0x2c] sm:$0x88] }
 0x4a0   :  { %v7450_v4 = vpack.c.bf16 %v3534_v59, %v3533_v1  ;;  %v3531_v60 = vsel %vm3466_vm5, %v9517_v62, %v3499_v24  ;;  %v3756_v3 = vshrl.u32 %v3743_v7, 16  ;;  %v3744_v62 = vld [vmem:[#allocation2 + $0x2c] sm:$0x8]  ;;  %v3800_v8 = vshrl.u32 %v3749_v10, 16  ;;  %v8062_v21 = vld [vmem:[#allocation14 + $0x100] ss:$8 sps:$4 sm:$0xff]  }
 0x4a1   :  { %v3532_v19 = vsel %vm3467_vm7, %v9519_v41, %v3500_v53  ;;  %v3856_v38 = vshrl.u32 %v3843_v55, 16  ;;  %v3769_v22 = vshrl.u32 %v3744_v62, 16  ;;  %v3900_v9 = vshrl.u32 %v3849_v32, 16  ;;  %v3950_v10 = vld [vmem:[#allocation2 + $0xf0] sm:$0x8] }
 0x4a2   :  { %3713 = vrot.lane.b32.xlu1 %v7448_v54, %s8461_s26  ;;  %v7449_v6 = vpack.c.bf16 %v3532_v19, %v3531_v60  ;;  %v3956_v14 = vshrl.u32 %v3943_v46, 16  ;;  %v3813_v50 = vshrl.u32 %v3750_v26, 16  ;;  %v4000_v30 = vshrl.u32 %v3949_v11, 16  ;;  %v4049_v19 = vld [vmem:[#allocation2 + $0xf0] sm:$0x88] }
 0x4a3   :  { %3711 = vrot.lane.b32.xlu0 %v7447_v23, %s8461_s26  ;;  %v3869_v20 = vshrl.u32 %v3844_v56, 16  ;;  %v9672_v17 = vrot.slane %v3756_v3, 11  ;;  %v9674_v52 = vrot.slane %v3800_v8, 11  ;;  %v9676_v51 = vrot.slane %v3856_v38, 11  ;;  %v4050_v32 = vld [vmem:[#allocation2 + $0xf8] sm:$0x8] }
 0x4a4   :  { %v9682_v43 = vrot.slane %v3769_v22, 11  ;;  %v9686_v31 = vrot.slane %v3900_v9, 11  ;;  %v9688_v2 = vrot.slane %v3956_v14, 11  ;;  %v9690_v54 = vrot.slane %v3813_v50, 11  ;;  %v8067_v50 = vld [vmem:[#allocation14 + $0x110] ss:$8 sps:$4 sm:$0xff]  }
 0x4a5   :  { %v9696_v12 = vrot.slane %v4000_v30, 11  ;;  %v9698_v34 = vrot.slane %v3869_v20, 11  ;;  %v3913_v24 = vshrl.u32 %v3850_v49, 16  ;;  %v4056_v60 = vshrl.u32 %v9680_v47, 16 }
 0x4a6   :  { %3717 = vrot.lane.b32.xlu1 %v7450_v4, %s8461_s26  ;;  %v8069_v4 = vld [vmem:[#allocation14 + $0x114] ss:$8 sps:$4 sm:$0xff]   ;;  %v4069_v55 = vshrl.u32 %v9692_v0, 16  ;;  %v4100_v8 = vshrl.u32 %v4049_v19, 16  ;;  %v4013_v22 = vshrl.u32 %v3950_v10, 16  ;;  %v4113_v30 = vshrl.u32 %v4050_v32, 16 }
 0x4a7   :  { %3715 = vrot.lane.b32.xlu0 %v7449_v6, %s8461_s26  ;;  %v3969_v6 = vshrl.u32 %v9684_v27, 16  ;;  %v9725_v49 = vrot.slane %v4056_v60, 11  ;;  %v8071_v19 = vld [vmem:[#allocation14 + $0x120] ss:$8 sps:$4 sm:$0xff]   ;;  %v8077_v10 = vld [vmem:[#allocation14 + $0x134] ss:$8 sps:$4 sm:$0xff]  }
 0x4a8   :  { %v9736_v0 = vrot.slane %v4100_v8, 11 }
 0x4fc   :  { %v3558_v35 = vpop.permute.xlu1 %3557 }
 0x4fd   :  { %v3564_v40 = vrot.slane %v3558_v35, 4  ;;  %v3556_v57 = vpop.permute.xlu0 %3555 }
 0x4fe   :  { %v3563_v63 = vrot.slane %v3556_v57, 4 }
 0x4ff   :  { %v3568_v41 = vsel %vm395_vm3, %v3564_v40, %v3558_v35  ;;  %3582 = vst.msk [vmem:[#allocation2 + $0x74] sm:$0xf] %vm225_vm0, %v3564_v40 }
 0x500   :  { %3581 = vst.msk [vmem:[#allocation2 + $0x6c] sm:$0xff] %vm8739_vm4, %v3568_v41  ;;  %v3567_v15 = vsel %vm395_vm3, %v3563_v63, %v3556_v57  ;;  %v3562_v39 = vpop.permute.xlu1 %3561 }
 0x501   :  { %3580 = vst.msk [vmem:[#allocation2 + $0x50] sm:$0xf] %vm225_vm0, %v3563_v63  ;;  %v3566_v44 = vrot.slane %v3562_v39, 4  ;;  %v3560_v18 = vpop.permute.xlu0 %3559 }
 0x502   :  { %3579 = vst.msk [vmem:[#allocation2 + $0x48] sm:$0xff] %vm8739_vm4, %v3567_v15  ;;  %v3565_v37 = vrot.slane %v3560_v18, 4 }
 0x503   :  { %v3570_v16 = vsel %vm395_vm3, %v3566_v44, %v3562_v39  ;;  %3586 = vst.msk [vmem:[#allocation2 + $0x128] sm:$0xf] %vm225_vm0, %v3566_v44 }
 0x504   :  { %3585 = vst.msk [vmem:[#allocation2 + $0x120] sm:$0xff] %vm8739_vm4, %v3570_v16  ;;  %v3569_v42 = vsel %vm395_vm3, %v3565_v37, %v3560_v18  ;;  %v3610_v48 = vpop.permute.xlu1 %3609  ;;  %v9719_v18 = vrot.slane %v3913_v24, 11 }
 0x505   :  { %3584 = vst.msk [vmem:[#allocation2 + $0x104] sm:$0xf] %vm225_vm0, %v3565_v37  ;;  %v3616_v58 = vrot.slane %v3610_v48, 4  ;;  %v3608_v28 = vpop.permute.xlu0 %3607 }
 0x506   :  { %3583 = vst.msk [vmem:[#allocation2 + $0xfc] sm:$0xff] %vm8739_vm4, %v3569_v42  ;;  %v3615_v36 = vrot.slane %v3608_v28, 4  ;;  %v8073_v42 = vld [vmem:[#allocation14 + $0x124] ss:$8 sps:$4 sm:$0xff]  }
 0x507   :  { %v3620_v25 = vsel %vm395_vm3, %v3616_v58, %v3610_v48  ;;  %3634 = vst.msk [vmem:[#allocation2 + $0x7c] sm:$0xf] %vm225_vm0, %v3616_v58  ;;  %v3747_v33 = vld [vmem:[#allocation2 + $0x6c] sm:$0xff]  ;;  %v9727_v58 = vrot.slane %v3969_v6, 11 }
 0x508   :  { %3633 = vst.msk [vmem:[#allocation2 + $0x74] sm:$0xff] %vm8739_vm4, %v3620_v25  ;;  %v3619_v23 = vsel %vm395_vm3, %v3615_v36, %v3608_v28  ;;  %v3614_v1 = vpop.permute.xlu1 %3613  ;;  %v3783_v53 = vshrl.u32 %v3747_v33, 16  ;;  %v3786_v62 = vshll.u32 %v3747_v33, 16  ;;  %v9738_v25 = vrot.slane %v4069_v55, 11 }
 0x509   :  { %3632 = vst.msk [vmem:[#allocation2 + $0x58] sm:$0xf] %vm225_vm0, %v3615_v36  ;;  %v3745_v59 = vld [vmem:[#allocation2 + $0x48] sm:$0xff]  ;;  %v3618_v7 = vrot.slane %v3614_v1, 4  ;;  %v3612_v35 = vpop.permute.xlu0 %3611 }
 0x50a   :  { %3631 = vst.msk [vmem:[#allocation2 + $0x50] sm:$0xff] %vm8739_vm4, %v3619_v23  ;;  %v3761_v40 = vshrl.u32 %v3745_v59, 16  ;;  %v7228_v57 = vcombine.high %v3745_v59, %v3747_v33  ;;  %v3617_v63 = vrot.slane %v3612_v35, 4  ;;  %v3785_v3 = vrot.slane %v3783_v53, 7  ;;  %10785 = vst [vmem:[#allocation27_spill] sm:$0xff] %v9738_v25 }
 0x50b   :  { %v7227_v41 = vcombine.low %v3745_v59, %v3747_v33  ;;  %v3622_v46 = vsel %vm395_vm3, %v3618_v7, %v3614_v1  ;;  %3638 = vst.msk [vmem:[#allocation2 + $0x130] sm:$0xf] %vm225_vm0, %v3618_v7  ;;  %v3764_v15 = vshll.u32 %v3745_v59, 16  ;;  %v9711_v39 = vld [vmem:[#allocation2 + $0x120] sm:$0xff]  ;;  %v9761_v7 = vrot.slane %v4013_v22, 11 }
 0x50c   :  { %v3763_v26 = vrot.slane %v3761_v40, 7  ;;  %4735 = vmatprep.mubr.bf16.mxu1 %v7228_v57  ;;  %3637 = vst.msk [vmem:[#allocation2 + $0x128] sm:$0xff] %vm8739_vm4, %v3622_v46  ;;  %v3621_v38 = vsel %vm395_vm3, %v3617_v63, %v3612_v35  ;;  %v3662_v11 = vpop.permute.xlu1 %3661  ;;  %v3788_v44 = vor.u32 %v3786_v62, %v3785_v3  ;;  %v3827_v36 = vshrl.u32 %v9711_v39, 16  ;;  %v8075_v3 = vld [vmem:[#allocation14 + $0x130] ss:$8 sps:$4 sm:$0xff]  }
 0x50d   :  { %3636 = vst.msk [vmem:[#allocation2 + $0x10c] sm:$0xf] %vm225_vm0, %v3617_v63  ;;  %4736 = vmatmul.mubr.bf16.vlgmr.msra.gmra.mrb[0].mxu1 %v7227_v41  ;;  %v9717_v56 = vld [vmem:[#allocation2 + $0xfc] sm:$0xff]  ;;  %v3668_v37 = vrot.slane %v3662_v11, 4  ;;  %v3660_v9 = vpop.permute.xlu0 %3659  ;;  %v3830_v6 = vshll.u32 %v9711_v39, 16  ;;  %10789 = vst [vmem:[#allocation31_spill] sm:$0xff] %v9761_v7 }
 0x50e   :  { %3635 = vst.msk [vmem:[#allocation2 + $0x104] sm:$0xff] %vm8739_vm4, %v3621_v38  ;;  %4817 = vmatpush1.bf16.msra.mxu1 %v8062_v21  ;;  %v7231_v14 = vcombine.high %v9717_v56, %v9711_v39  ;;  %v3766_v16 = vor.u32 %v3764_v15, %v3763_v26  ;;  %v3667_v20 = vrot.slane %v3660_v9, 4  ;;  %v3781_v48 = vrot.slane %v3763_v26, 4 }
 0x50f   :  { %4818 = vmatprep.subr.bf16.mxu1 %v8069_v4  ;;  %v3672_v28 = vsel %vm395_vm3, %v3668_v37, %v3662_v11  ;;  %3686 = vst.msk [vmem:[#allocation2 + $0x84] sm:$0xf] %vm225_vm0, %v3668_v37  ;;  %v9731_v47 = vld [vmem:[#allocation2 + $0x74] sm:$0xff]  ;;  %v3805_v53 = vshrl.u32 %v9717_v56, 16  ;;  %v9763_v35 = vrot.slane %v4113_v30, 11  ;;  %v7230_v40 = vcombine.low %v9717_v56, %v9711_v39 }
 0x510   :  { %4745 = vmatprep.mubr.bf16.mxu1 %v7231_v14  ;;  %v9733_v27 = vld [vmem:[#allocation2 + $0x74] sm:$0xf]  ;;  %3685 = vst.msk [vmem:[#allocation2 + $0x7c] sm:$0xff] %vm8739_vm4, %v3672_v28  ;;  %v3671_v33 = vsel %vm395_vm3, %v3667_v20, %v3660_v9  ;;  %v3666_v21 = vpop.permute.xlu1 %3665  ;;  %v9751_v1 = vsel %vm8842_vm6, %v9672_v17, %v3766_v16  ;;  %v9755_v59 = vsel %vm8842_vm6, %v3781_v48, %v3788_v44  ;;  %v3808_v38 = vshll.u32 %v9717_v56, 16  ;;  %v8097_v16 = vld [vmem:[#allocation14 + $0x174] ss:$8 sps:$4 sm:$0xff]  }
 0x511   :  { %10784 = vst [vmem:[#allocation26_spill] sm:$0xff] %v9733_v27  ;;  %3684 = vst.msk [vmem:[#allocation2 + $0x60] sm:$0xf] %vm225_vm0, %v3667_v20  ;;  %v9744_v24 = vld [vmem:[#allocation2 + $0x50] sm:$0xff]  ;;  %v3670_v4 = vrot.slane %v3666_v21, 4  ;;  %v3664_v60 = vpop.permute.xlu0 %3663  ;;  %v3792_v55 = vshrl.u32 %v9733_v27, 16 }
 0x512   :  { %v9746_v23 = vld [vmem:[#allocation2 + $0x50] sm:$0xf]  ;;  %10787 = vst [vmem:[#allocation29_spill] sm:$0xff] %v9751_v1  ;;  %10788 = vst [vmem:[#allocation30_spill] sm:$0xff] %v9755_v59  ;;  %4819 = vmatpush1.bf16.msra.mxu1 %v8067_v50  ;;  %v3669_v17 = vrot.slane %v3664_v60, 4  ;;  %v7234_v57 = vcombine.high %v9744_v24, %v9731_v47  ;;  %v3807_v8 = vrot.slane %v3805_v53, 7  ;;  %v7233_v37 = vcombine.low %v9744_v24, %v9731_v47 }
 0x513   :  { %10786 = vst [vmem:[#allocation28_spill] sm:$0xff] %v9746_v23  ;;  %3683 = vst.msk [vmem:[#allocation2 + $0x58] sm:$0xff] %vm8739_vm4, %v3671_v33  ;;  %4820 = vmatprep.subr.bf16.mxu1 %v8073_v42  ;;  %v3674_v63 = vsel %vm395_vm3, %v3670_v4, %v3666_v21  ;;  %v3774_v62 = vshrl.u32 %v9746_v23, 16  ;;  %v9773_v41 = vld [vmem:[#allocation2 + $0x128] sm:$0xf]  ;;  %v3829_v11 = vrot.slane %v3827_v36, 7 }
 0x514   :  { %10790 = vst [vmem:[#allocation32_spill] sm:$0xff] %v9763_v35  ;;  %3690 = vst.msk [vmem:[#allocation2 + $0x138] sm:$0xf] %vm225_vm0, %v3670_v4  ;;  %v3673_v26 = vsel %vm395_vm3, %v3669_v17, %v3664_v60  ;;  %v3714_v15 = vpop.permute.xlu1 %3713  ;;  %v9792_v14 = vld [vmem:[#allocation2 + $0x128] sm:$0xff]  ;;  %v3777_v50 = vshll.u32 %v9746_v23, 16  ;;  %v9796_v20 = vrot.slane %v3792_v55, 7  ;;  %v3810_v21 = vor.u32 %v3808_v38, %v3807_v8 }
 0x515   :  { %3689 = vst.msk [vmem:[#allocation2 + $0x130] sm:$0xff] %vm8739_vm4, %v3674_v63  ;;  %4746 = vmatmul.mubr.bf16.gmra.mrb[4].mxu1 %v7230_v40  ;;  %v9783_v39 = vld [vmem:[#allocation2 + $0x104] sm:$0xf]  ;;  %3687 = vst.msk [vmem:[#allocation2 + $0x10c] sm:$0xff] %vm8739_vm4, %v3673_v26  ;;  %v3720_v44 = vrot.slane %v3714_v15, 4  ;;  %v3712_v22 = vpop.permute.xlu0 %3711  ;;  %v3836_v48 = vshrl.u32 %v9773_v41, 16 }
 0x516   :  { %3688 = vst.msk [vmem:[#allocation2 + $0x114] sm:$0xf] %vm225_vm0, %v3669_v17  ;;  %10791 = vst [vmem:[#allocation33_spill] sm:$0xff] %v9783_v39  ;;  %4755 = vmatprep.mubr.bf16.mxu1 %v7234_v57  ;;  %4821 = vmatpush1.bf16.msra.mxu1 %v8071_v19  ;;  %v9790_v9 = vld [vmem:[#allocation2 + $0x104] sm:$0xff]  ;;  %v3719_v56 = vrot.slane %v3712_v22, 4  ;;  %v3818_v42 = vshrl.u32 %v9783_v39, 16 }
 0x517   :  { %4822 = vmatprep.subr.bf16.mxu1 %v8077_v10  ;;  %v8082_v30 = vld [vmem:[#allocation14 + $0x144] ss:$8 sps:$4 sm:$0xff]   ;;  %v3724_v28 = vsel %vm395_vm3, %v3720_v44, %v3714_v15  ;;  %3738 = vst.msk [vmem:[#allocation2 + $0x8c] sm:$0xf] %vm225_vm0, %v3720_v44  ;;  %v9802_v36 = vrot.slane %v3774_v62, 7  ;;  %v3825_v53 = vrot.slane %v3807_v8, 4  ;;  %v7237_v19 = vcombine.high %v9790_v9, %v9792_v14 }
 0x518   :  { %v9804_v33 = vld [vmem:[#allocation2 + $0x7c] sm:$0xf]  ;;  %3737 = vst.msk [vmem:[#allocation2 + $0x84] sm:$0xff] %vm8739_vm4, %v3724_v28  ;;  %v3723_v4 = vsel %vm395_vm3, %v3719_v56, %v3712_v22  ;;  %v3718_v60 = vpop.permute.xlu1 %3717  ;;  %v8080_v17 = vld [vmem:[#allocation14 + $0x140] ss:$8 sps:$4 sm:$0xff]   ;;  %v3832_v10 = vor.u32 %v3830_v6, %v3829_v11  ;;  %v9825_v11 = vrot.slane %v3818_v42, 7 }
 0x519   :  { %3736 = vst.msk [vmem:[#allocation2 + $0x68] sm:$0xf] %vm225_vm0, %v3719_v56  ;;  %v3722_v55 = vrot.slane %v3718_v60, 4  ;;  %v3716_v63 = vpop.permute.xlu0 %3715  ;;  %v9821_v15 = vld [vmem:[#allocation2 + $0x7c] sm:$0xff]  ;;  %v3892_v38 = vshrl.u32 %v9804_v33, 16  ;;  %v3821_v22 = vshll.u32 %v9783_v39, 16 }
 0x51a   :  { %v9813_v57 = vld [vmem:[#allocation2 + $0x58] sm:$0xf]  ;;  %3735 = vst.msk [vmem:[#allocation2 + $0x60] sm:$0xff] %vm8739_vm4, %v3723_v4  ;;  %4823 = vmatpush1.bf16.msra.mxu1 %v8075_v3  ;;  %v3721_v44 = vrot.slane %v3716_v63, 4  ;;  %v8087_v6 = vld [vmem:[#allocation14 + $0x154] ss:$8 sps:$4 sm:$0xff]   ;;  %v9842_v42 = vsel %vm8842_vm6, %v3825_v53, %v3832_v10 }
 0x51b   :  { %v9819_v26 = vld [vmem:[#allocation2 + $0x58] sm:$0xff]  ;;  %v3874_v8 = vshrl.u32 %v9813_v57, 16  ;;  %4824 = vmatprep.subr.bf16.mxu1 %v8082_v30  ;;  %v9828_v56 = vrot.slane %v3836_v48, 7  ;;  %v3726_v28 = vsel %vm395_vm3, %v3722_v55, %v3718_v60  ;;  %3742 = vst.msk [vmem:[#allocation2 + $0x140] sm:$0xf] %vm225_vm0, %v3722_v55  ;;  %v9838_v30 = vsel %vm8842_vm6, %v9674_v52, %v3810_v21  ;;  %10793 = vst [vmem:[#allocation35_spill] sm:$0xff] %v9842_v42 }
 0x51c   :  { %v8085_v3 = vld [vmem:[#allocation14 + $0x150] ss:$8 sps:$4 sm:$0xff]   ;;  %v9833_v32 = vld [vmem:[#allocation2 + $0x130] sm:$0xf]  ;;  %10792 = vst [vmem:[#allocation34_spill] sm:$0xff] %v9838_v30  ;;  %3741 = vst.msk [vmem:[#allocation2 + $0x138] sm:$0xff] %vm8739_vm4, %v3726_v28  ;;  %v3725_v48 = vsel %vm395_vm3, %v3721_v44, %v3716_v63  ;;  %v7240_v60 = vcombine.high %v9819_v26, %v9821_v15  ;;  %v9909_v30 = vor.u32 %v3821_v22, %v9825_v11 }
 0x51d   :  { %3740 = vst.msk [vmem:[#allocation2 + $0x11c] sm:$0xf] %vm225_vm0, %v3721_v44  ;;  %4756 = vmatmul.mubr.bf16.gmra.mrb[8].mxu1 %v7233_v37  ;;  %v9850_v55 = vld [vmem:[#allocation2 + $0x10c] sm:$0xff]  ;;  %v3936_v21 = vshrl.u32 %v9833_v32, 16  ;;  %v9861_v10 = vrot.slane %v3874_v8, 7  ;;  %v9864_v44 = vrot.slane %v3892_v38, 7  ;;  %v9899_v38 = vor.u32 %v3777_v50, %v9802_v36 }
 0x51e   :  { %v9852_v46 = vld [vmem:[#allocation2 + $0x130] sm:$0xff]  ;;  %v9854_v52 = vld [vmem:[#allocation2 + $0x10c] sm:$0xf]  ;;  %3739 = vst.msk [vmem:[#allocation2 + $0x114] sm:$0xff] %vm8739_vm4, %v3725_v48  ;;  %4765 = vmatprep.mubr.bf16.mxu1 %v7237_v19  ;;  %4825 = vmatpush1.bf16.msra.mxu1 %v8080_v17  ;;  %v3861_v53 = vshrl.u32 %v9744_v24, 16  ;;  %v3886_v59 = vshll.u32 %v9731_v47, 16 }
 0x51f   :  { %v8092_v37 = vld [vmem:[#allocation14 + $0x164] ss:$8 sps:$4 sm:$0xff]   ;;  %v3918_v28 = vshrl.u32 %v9854_v52, 16  ;;  %4826 = vmatprep.subr.bf16.mxu1 %v8087_v6  ;;  %v9868_v40 = vrot.slane %v3936_v21, 7  ;;  %v9881_v6 = vld [vmem:[#allocation2 + $0x84] sm:$0xff] }
 0x520   :  { %v9871_v61 = vld [vmem:[#allocation2 + $0x8c] sm:$0xf]  ;;  %v9883_v48 = vld [vmem:[#allocation2 + $0x84] sm:$0xf]  ;;  %v9885_v21 = vld [vmem:[#allocation2 + $0x68] sm:$0xf] }
 0x521   :  { %10794 = vst [vmem:[#allocation36_spill] sm:$0xff] %v9871_v61  ;;  %10795 = vst [vmem:[#allocation37_spill] sm:$0xff] %v9885_v21  ;;  %v9888_v4 = vld [vmem:[#allocation2 + $0x60] sm:$0xff]  ;;  %v9890_v19 = vrot.slane %v3918_v28, 7  ;;  %v3992_v17 = vshrl.u32 %v9883_v48, 16  ;;  %v4074_v8 = vshrl.u32 %v9885_v21, 16 }
 0x522   :  { %v9892_v63 = vld [vmem:[#allocation2 + $0x60] sm:$0xf]  ;;  %4827 = vmatpush1.bf16.msra.mxu1 %v8085_v3  ;;  %v8090_v62 = vld [vmem:[#allocation14 + $0x160] ss:$8 sps:$4 sm:$0xff]   ;;  %v10796_v28 = vshll.u32 %v9733_v27, 16 }
 0x523   :  { %v3974_v5 = vshrl.u32 %v9892_v63, 16  ;;  %4828 = vmatprep.subr.bf16.mxu1 %v8092_v37  ;;  %v9914_v3 = vrot.slane %v3992_v17, 7  ;;  %v9916_v1 = vrot.slane %v4074_v8, 7  ;;  %v9918_v39 = vld [vmem:[#allocation2 + $0x140] sm:$0xf]  ;;  %v4092_v37 = vshrl.u32 %v9871_v61, 16 }
 0x524   :  { %v9906_v42 = vor.u32 %v10796_v28, %v9796_v20  ;;  %10798 = vst [vmem:[#allocation39_spill] sm:$0xff] %v9918_v39  ;;  %v9922_v20 = vld [vmem:[#allocation2 + $0x138] sm:$0xff]  ;;  %v10800_v17 = vcombine.low %v9790_v9, %v9792_v14  ;;  %v10840_v29 = vld [vmem:[#allocation33_spill] sm:$0xff] }
 0x525   :  { %10797 = vst [vmem:[#allocation38_spill] sm:$0xff] %v9916_v1  ;;  %v9924_v28 = vrot.slane %v3974_v5, 7  ;;  %v9926_v22 = vld [vmem:[#allocation2 + $0x138] sm:$0xf]  ;;  %v9935_v50 = vld [vmem:[#allocation2 + $0x114] sm:$0xf] }
 0x526   :  { %10799 = vst [vmem:[#allocation40_spill] sm:$0xff] %v9926_v22  ;;  %4766 = vmatmul.mubr.bf16.gmra.mrb[12].mxu1 %v10800_v17  ;;  %v9933_v8 = vld [vmem:[#allocation2 + $0x114] sm:$0xff]  ;;  %v4036_v13 = vshrl.u32 %v9926_v22, 16  ;;  %v4136_v5 = vshrl.u32 %v9918_v39, 16  ;;  %v4018_v35 = vshrl.u32 %v9935_v50, 16  ;;  %v9962_v45 = vrot.slane %v4092_v37, 7 }
 0x527   :  { %4775 = vmatprep.mubr.bf16.mxu1 %v7240_v60  ;;  %4829 = vmatpush1.bf16.msra.mxu1 %v8090_v62  ;;  %v8095_v27 = vld [vmem:[#allocation14 + $0x170] ss:$8 sps:$4 sm:$0xff]   ;;  %v9948_v25 = vld [vmem:[#allocation2 + $0x11c] sm:$0xf]  ;;  %v8101_v62 = vld [vmem:[#allocation13 + $0x4] ss:$8 sps:$4 sm:$0xff]  }
 0x528   :  { %10801 = vst [vmem:[#allocation41_spill] sm:$0xff] %v9948_v25  ;;  %4830 = vmatprep.subr.bf16.mxu1 %v8097_v16  ;;  %v9957_v17 = vrot.slane %v4036_v13, 7  ;;  %v4118_v7 = vshrl.u32 %v9948_v25, 16  ;;  %v9960_v61 = vrot.slane %v4018_v35, 7  ;;  %v9965_v1 = vrot.slane %v4136_v5, 7 }
 0x529   :  { %v3863_v60 = vrot.slane %v3861_v53, 7  ;;  %v3864_v22 = vshll.u32 %v9744_v24, 16  ;;  %v3883_v13 = vshrl.u32 %v9731_v47, 16  ;;  %v3905_v35 = vshrl.u32 %v9790_v9, 16 }
 0x52a   :  { %10802 = vst [vmem:[#allocation42_spill] sm:$0xff] %v9965_v1  ;;  %v9967_v23 = vrot.slane %v4118_v7, 7  ;;  %v3908_v37 = vshll.u32 %v9790_v9, 16  ;;  %v3927_v7 = vshrl.u32 %v9792_v14, 16  ;;  %v3930_v1 = vshll.u32 %v9792_v14, 16 }
 0x52b   :  { %4831 = vmatpush1.bf16.msra.mxu1 %v8095_v27  ;;  %v3866_v21 = vor.u32 %v3864_v22, %v3863_v60  ;;  %v3881_v5 = vrot.slane %v3863_v60, 4  ;;  %v3885_v16 = vrot.slane %v3883_v13, 7  ;;  %v3907_v53 = vrot.slane %v3905_v35, 7 }
 0x52c   :  { %10803 = vst [vmem:[#allocation43_spill] sm:$0xff] %v9967_v23  ;;  %5169 = vmatprep.subr.bf16.mxu1 %v8101_v62  ;;  %v3961_v24 = vshrl.u32 %v9819_v26, 16  ;;  %v3964_v27 = vshll.u32 %v9819_v26, 16  ;;  %v10804_v47 = vcombine.low %v9819_v26, %v9821_v15  ;;  %v3929_v22 = vrot.slane %v3927_v7, 7 }
 0x52d   :  { %v9985_v9 = vsel %vm8842_vm6, %v9676_v51, %v3866_v21  ;;  %v3983_v60 = vshrl.u32 %v9821_v15, 16  ;;  %v3986_v14 = vshll.u32 %v9821_v15, 16  ;;  %v10805_v62 = vcombine.high %v9850_v55, %v9852_v46 }
 0x52e   :  { %4776 = vmatmul.mubr.bf16.gmra.mrb[16].mxu1 %v10804_v47  ;;  %v3888_v13 = vor.u32 %v3886_v59, %v3885_v16  ;;  %v3910_v35 = vor.u32 %v3908_v37, %v3907_v53  ;;  %v3925_v39 = vrot.slane %v3907_v53, 4  ;;  %v3963_v25 = vrot.slane %v3961_v24, 7 }
 0x52f   :  { %4785 = vmatprep.mubr.bf16.mxu1 %v10805_v62  ;;  %v3932_v26 = vor.u32 %v3930_v1, %v3929_v22  ;;  %v3985_v47 = vrot.slane %v3983_v60, 7  ;;  %v4005_v23 = vshrl.u32 %v9850_v55, 16  ;;  %v4008_v51 = vshll.u32 %v9850_v55, 16 }
 0x530   :  { %v9996_v21 = vsel %vm8842_vm6, %v3881_v5, %v3888_v13  ;;  %v10001_v15 = vsel %vm8842_vm6, %v9686_v31, %v3910_v35  ;;  %v3966_v7 = vor.u32 %v3964_v27, %v3963_v25  ;;  %v3981_v59 = vrot.slane %v3963_v25, 4 }
 0x531   :  { %v7210_v16 = vcombine.high %v9985_v9, %v9996_v21  ;;  %v7209_v1 = vcombine.low %v9985_v9, %v9996_v21  ;;  %v10009_v37 = vsel %vm8842_vm6, %v3925_v39, %v3932_v26  ;;  %v3988_v53 = vor.u32 %v3986_v14, %v3985_v47  ;;  %v8176_v21 = vld [vmem:[#allocation13 + $0x170] ss:$8 sps:$4 sm:$0xff]  }
 0x532   :  { %v10018_v25 = vsel %vm8842_vm6, %v9688_v2, %v3966_v7  ;;  %v4007_v24 = vrot.slane %v4005_v23, 7  ;;  %v4027_v39 = vshrl.u32 %v9852_v46, 16  ;;  %v4030_v22 = vshll.u32 %v9852_v46, 16 }
 0x533   :  { %v10022_v27 = vsel %vm8842_vm6, %v3981_v59, %v3988_v53  ;;  %v4061_v60 = vshrl.u32 %v9888_v4, 16  ;;  %v10806_v23 = vcombine.low %v9850_v55, %v9852_v46  ;;  %v4064_v47 = vshll.u32 %v9888_v4, 16 }
 0x534   :  { %v4010_v13 = vor.u32 %v4008_v51, %v4007_v24  ;;  %v4025_v2 = vrot.slane %v4007_v24, 4  ;;  %v4029_v35 = vrot.slane %v4027_v39, 7  ;;  %v4083_v7 = vshrl.u32 %v9881_v6, 16 }
 0x535   :  { %v4063_v26 = vrot.slane %v4061_v60, 7  ;;  %v10807_v59 = vcombine.high %v9888_v4, %v9881_v6  ;;  %v4086_v51 = vshll.u32 %v9881_v6, 16  ;;  %v4105_v46 = vshrl.u32 %v9933_v8, 16 }
 0x536   :  { %4786 = vmatmul.mubr.bf16.gmra.mrb[20].mxu1 %v10806_v23  ;;  %v10042_v53 = vsel %vm8842_vm6, %v9696_v12, %v4010_v13  ;;  %v10808_v55 = vshll.u32 %v9773_v41, 16  ;;  %v4032_v39 = vor.u32 %v4030_v22, %v4029_v35  ;;  %v4085_v62 = vrot.slane %v4083_v7, 7 }
 0x537   :  { %4795 = vmatprep.mubr.bf16.mxu1 %v10807_v59  ;;  %v4066_v60 = vor.u32 %v4064_v47, %v4063_v26  ;;  %v4081_v23 = vrot.slane %v4063_v26, 4  ;;  %v4107_v14 = vrot.slane %v4105_v46, 7  ;;  %v4108_v59 = vshll.u32 %v9933_v8, 16 }
 0x538   :  { %v3841_v24 = vor.u32 %v10808_v55, %v9828_v56  ;;  %v4127_v31 = vshrl.u32 %v9922_v20, 16  ;;  %v4130_v12 = vshll.u32 %v9922_v20, 16  ;;  %v10054_v13 = vsel %vm8842_vm6, %v4025_v2, %v4032_v39 }
 0x539   :  { %v10059_v5 = vsel %vm8842_vm6, %v9725_v49, %v4066_v60  ;;  %v4088_v56 = vor.u32 %v4086_v51, %v4085_v62  ;;  %v3790_v22 = vrot.slane %v9802_v36, 4  ;;  %v7219_v35 = vcombine.high %v10042_v53, %v10054_v13 }
 0x53a   :  { %v7218_v26 = vcombine.low %v10042_v53, %v10054_v13  ;;  %v4110_v47 = vor.u32 %v4108_v59, %v4107_v14  ;;  %v4125_v7 = vrot.slane %v4107_v14, 4  ;;  %v4129_v46 = vrot.slane %v4127_v31, 7  ;;  %v8190_v53 = vld [vmem:[#allocation16 + $0x34] ss:$8 sps:$4 sm:$0xff]   ;;  %v8188_v13 = vld [vmem:[#allocation16 + $0x30] ss:$8 sps:$4 sm:$0xff]  }
 0x53b   :  { %v10068_v2 = vsel %vm8842_vm6, %v4081_v23, %v4088_v56  ;;  %v3798_v49 = vsel %vm8842_vm6, %v3790_v22, %v9906_v42  ;;  %v3834_v62 = vrot.slane %v9825_v11, 4  ;;  %v10809_v31 = vsel %vm8842_vm6, %v9682_v43, %v9899_v38 }
 0x53c   :  { %v7222_v36 = vcombine.high %v10059_v5, %v10068_v2  ;;  %v7221_v51 = vcombine.low %v10059_v5, %v10068_v2  ;;  %v10081_v14 = vsel %vm8842_vm6, %v9736_v0, %v4110_v47  ;;  %v10088_v55 = vcombine.low %v10809_v31, %v3798_v49  ;;  %v8187_v5 = vld [vmem:[#allocation16 + $0x24] ss:$8 sps:$4 sm:$0xff]   ;;  %v8196_v2 = vld [vmem:[#allocation16 + $0x54] ss:$8 sps:$4 sm:$0xff]  }
 0x53d   :  { %v10810_v11 = vcombine.low %v9888_v4, %v9881_v6  ;;  %v4132_v42 = vor.u32 %v4130_v12, %v4129_v46  ;;  %v3842_v39 = vsel %vm8842_vm6, %v3834_v62, %v3841_v24  ;;  %v10811_v60 = vshll.u32 %v9813_v57, 16 }
 0x53e   :  { %v3890_v23 = vrot.slane %v9861_v10, 4  ;;  %v10812_v59 = vcombine.high %v9933_v8, %v9922_v20  ;;  %v10813_v43 = vsel %vm8842_vm6, %v9690_v54, %v9909_v30  ;;  %v10814_v38 = vshll.u32 %v9804_v33, 16 }
 0x53f   :  { %4796 = vmatmul.mubr.bf16.gmra.mrb[24].mxu1 %v10810_v11  ;;  %v3879_v0 = vor.u32 %v10811_v60, %v9861_v10  ;;  %v10107_v4 = vcombine.low %v10813_v43, %v3842_v39  ;;  %v10815_v24 = vshll.u32 %v9854_v52, 16  ;;  %v3934_v10 = vrot.slane %v9890_v19, 4 }
 0x540   :  { %4805 = vmatprep.mubr.bf16.mxu1 %v10812_v59  ;;  %v3897_v6 = vor.u32 %v10814_v38, %v9864_v44  ;;  %v10118_v56 = vsel %vm8842_vm6, %v4125_v7, %v4132_v42  ;;  %v10816_v30 = vshll.u32 %v9833_v32, 16  ;;  %v10817_v44 = vshll.u32 %v9892_v63, 16  ;;  %v10822_v38 = vld [vmem:[#allocation38_spill] sm:$0xff] }
 0x541   :  { %v3923_v12 = vor.u32 %v10815_v24, %v9890_v19  ;;  %v3880_v54 = vsel %vm8842_vm6, %v9698_v34, %v3879_v0  ;;  %v7225_v46 = vcombine.high %v10081_v14, %v10118_v56  ;;  %v7224_v19 = vcombine.low %v10081_v14, %v10118_v56  ;;  %v8197_v14 = vld [vmem:[#allocation16 + $0x60] ss:$8 sps:$4 sm:$0xff]   ;;  %v8205_v56 = vld [vmem:[#allocation16 + $0x84] ss:$8 sps:$4 sm:$0xff]  }
 0x542   :  { %v3941_v22 = vor.u32 %v10816_v30, %v9868_v40  ;;  %v3979_v47 = vor.u32 %v10817_v44, %v9924_v28  ;;  %v3898_v7 = vsel %vm8842_vm6, %v3890_v23, %v3897_v6  ;;  %v3990_v31 = vrot.slane %v9924_v28, 4  ;;  %v10820_v23 = vld [vmem:[#allocation40_spill] sm:$0xff]  ;;  %v10827_v30 = vld [vmem:[#allocation31_spill] sm:$0xff]  ;;  %v10829_v44 = vld [vmem:[#allocation41_spill] sm:$0xff] }
 0x543   :  { %v3924_v34 = vsel %vm8842_vm6, %v9719_v18, %v3923_v12  ;;  %v10138_v49 = vcombine.low %v3880_v54, %v3898_v7  ;;  %v10818_v42 = vshll.u32 %v9883_v48, 16  ;;  %v10819_v18 = vshll.u32 %v9935_v50, 16  ;;  %v10825_v12 = vld [vmem:[#allocation36_spill] sm:$0xff] }
 0x544   :  { %v3942_v40 = vsel %vm8842_vm6, %v3934_v10, %v3941_v22  ;;  %v3980_v62 = vsel %vm8842_vm6, %v9727_v58, %v3979_v47  ;;  %v4034_v0 = vrot.slane %v9960_v61, 4  ;;  %v10821_v59 = vshll.u32 %v10820_v23, 16  ;;  %v10823_v58 = vld [vmem:[#allocation37_spill] sm:$0xff]  ;;  %v10828_v22 = vld [vmem:[#allocation43_spill] sm:$0xff] }
 0x545   :  { %v10146_v11 = vcombine.low %v3924_v34, %v3942_v40  ;;  %v3997_v39 = vor.u32 %v10818_v42, %v9914_v3  ;;  %v4023_v60 = vor.u32 %v10819_v18, %v9960_v61  ;;  %v10824_v6 = vshll.u32 %v10823_v58, 16 }
 0x546   :  { %v4041_v43 = vor.u32 %v10821_v59, %v9957_v17  ;;  %v4090_v24 = vrot.slane %v10822_v38, 4  ;;  %v10826_v10 = vshll.u32 %v10825_v12, 16  ;;  %v10830_v17 = vshll.u32 %v10829_v44, 16 }
 0x547   :  { %v4079_v28 = vor.u32 %v10824_v6, %v10822_v38  ;;  %v3998_v54 = vsel %vm8842_vm6, %v3990_v31, %v3997_v39  ;;  %v4024_v61 = vsel %vm8842_vm6, %v10827_v30, %v4023_v60  ;;  %v4134_v7 = vrot.slane %v10828_v22, 4  ;;  %v10832_v31 = vld [vmem:[#allocation27_spill] sm:$0xff] }
 0x548   :  { %v4097_v3 = vor.u32 %v10826_v10, %v9962_v45  ;;  %v4123_v47 = vor.u32 %v10830_v17, %v10828_v22  ;;  %v10831_v34 = vcombine.low %v9933_v8, %v9922_v20  ;;  %v10177_v40 = vcombine.low %v3980_v62, %v3998_v54  ;;  %v10834_v20 = vld [vmem:[#allocation32_spill] sm:$0xff]  ;;  %v10835_v62 = vld [vmem:[#allocation42_spill] sm:$0xff]  ;;  %v10836_v38 = vld [vmem:[#allocation39_spill] sm:$0xff] }
 0x549   :  { %v4042_v45 = vsel %vm8842_vm6, %v4034_v0, %v4041_v43  ;;  %v4080_v42 = vsel %vm8842_vm6, %v10832_v31, %v4079_v28  ;;  %v10833_v18 = vmov 0   ;;  %v10837_v0 = vshll.u32 %v10836_v38, 16  ;;  %v10838_v10 = vld [vmem:[#allocation26_spill] sm:$0xff]  ;;  %v8108_v22 = vld [vmem:[#allocation13 + $0x24] ss:$8 sps:$4 sm:$0xff]  }
 0x54a   :  { %4806 = vmatmul.mubr.bf16.gmra.mrb[28].mxu1 %v10831_v34  ;;  %v4098_v39 = vsel %vm8842_vm6, %v4090_v24, %v4097_v3  ;;  %v10187_v60 = vcombine.low %v4024_v61, %v4042_v45  ;;  %v4124_v8 = vsel %vm8842_vm6, %v10834_v20, %v4123_v47  ;;  %v8099_v24 = vld [vmem:[#allocation13] ss:$8 sps:$4 sm:$0xff]   ;;  %v8105_v30 = vld [vmem:[#allocation13 + $0x14] ss:$8 sps:$4 sm:$0xff]   ;;  %v8103_v61 = vld [vmem:[#allocation13 + $0x10] ss:$8 sps:$4 sm:$0xff]   ;;  %v7232_v47 = vcombine.low %v10840_v29, %v9773_v41 }
 0x54b   :  { %4848 = vmatprep.mubr.bf16.mxu1 %v10833_v18  ;;  %v10189_v59 = vcombine.low %v4080_v42, %v4098_v39  ;;  %v4141_v43 = vor.u32 %v10837_v0, %v10835_v62  ;;  %v10839_v3 = vld [vmem:[#allocation28_spill] sm:$0xff]  ;;  %v8110_v34 = vld [vmem:[#allocation13 + $0x30] ss:$8 sps:$4 sm:$0xff]   ;;  %v7235_v42 = vcombine.low %v9813_v57, %v9804_v33  ;;  %v8119_v39 = vld [vmem:[#allocation13 + $0x54] ss:$8 sps:$4 sm:$0xff]   ;;  %v7238_v62 = vcombine.low %v9854_v52, %v9833_v32 }
 0x54c   :  { %v7229_v54 = vcombine.low %v10839_v3, %v10838_v10  ;;  %v8106_v17 = vld [vmem:[#allocation13 + $0x20] ss:$8 sps:$4 sm:$0xff]   ;;  %v8115_v45 = vld [vmem:[#allocation13 + $0x44] ss:$8 sps:$4 sm:$0xff]   ;;  %v8117_v20 = vld [vmem:[#allocation13 + $0x50] ss:$8 sps:$4 sm:$0xff]   ;;  %v7244_v3 = vcombine.low %v9935_v50, %v10820_v23  ;;  %v7250_v29 = vcombine.low %v10829_v44, %v10836_v38  ;;  %v10851_v9 = vcombine.high %v10018_v25, %v10022_v27 }
 0x54d   :  { %v4142_v6 = vsel %vm8842_vm6, %v4134_v7, %v4141_v43  ;;  %v8112_v7 = vld [vmem:[#allocation13 + $0x34] ss:$8 sps:$4 sm:$0xff]   ;;  %v8113_v31 = vld [vmem:[#allocation13 + $0x40] ss:$8 sps:$4 sm:$0xff]   ;;  %v8122_v41 = vld [vmem:[#allocation13 + $0x64] ss:$8 sps:$4 sm:$0xff]  }
 0x54e   :  { %v10199_v28 = vcombine.low %v4124_v8, %v4142_v6  ;;  %v8120_v8 = vld [vmem:[#allocation13 + $0x60] ss:$8 sps:$4 sm:$0xff]   ;;  %v8126_v0 = vld [vmem:[#allocation13 + $0x74] ss:$8 sps:$4 sm:$0xff]   ;;  %v8124_v43 = vld [vmem:[#allocation13 + $0x70] ss:$8 sps:$4 sm:$0xff]   ;;  %v7241_v6 = vcombine.low %v9892_v63, %v9883_v48 }
 0x54f   :  { %v8129_v33 = vld [vmem:[#allocation13 + $0x84] ss:$8 sps:$4 sm:$0xff]   ;;  %v8127_v57 = vld [vmem:[#allocation13 + $0x80] ss:$8 sps:$4 sm:$0xff]   ;;  %v8131_v10 = vld [vmem:[#allocation13 + $0x90] ss:$8 sps:$4 sm:$0xff]  }
 0x550   :  { %v8136_v32 = vld [vmem:[#allocation13 + $0xa4] ss:$8 sps:$4 sm:$0xff]   ;;  %v8134_v52 = vld [vmem:[#allocation13 + $0xa0] ss:$8 sps:$4 sm:$0xff]   ;;  %v10845_v44 = vld [vmem:[#allocation34_spill] sm:$0xff] }
 0x551   :  { %v8143_v63 = vld [vmem:[#allocation13 + $0xc4] ss:$8 sps:$4 sm:$0xff]   ;;  %v8141_v48 = vld [vmem:[#allocation13 + $0xc0] ss:$8 sps:$4 sm:$0xff]   ;;  %v10846_v38 = vld [vmem:[#allocation35_spill] sm:$0xff] }
 0x552   :  { %4849 = vmatmul.mubr.bf16.vlgmr.msra.gmra.mrb[0].mxu1 %v7229_v54  ;;  %v8140_v54 = vld [vmem:[#allocation13 + $0xb4] ss:$8 sps:$4 sm:$0xff]   ;;  %v8150_v50 = vld [vmem:[#allocation13 + $0xe4] ss:$8 sps:$4 sm:$0xff]   ;;  %v8148_v23 = vld [vmem:[#allocation13 + $0xe0] ss:$8 sps:$4 sm:$0xff]  }
 0x553   :  { %5170 = vmatpush1.bf16.msra.mxu1 %v8099_v24  ;;  %4858 = vmatprep.mubr.bf16.mxu1 %v10833_v18  ;;  %v8133_v24 = vld [vmem:[#allocation13 + $0x94] ss:$8 sps:$4 sm:$0xff]  }
 0x554   :  { %5171 = vmatprep.subr.bf16.mxu1 %v8105_v30  ;;  %v8138_v30 = vld [vmem:[#allocation13 + $0xb0] ss:$8 sps:$4 sm:$0xff]  }
 0x557   :  { %5172 = vmatpush1.bf16.msra.mxu1 %v8103_v61  ;;  %v7247_v61 = vcombine.low %v10823_v58, %v10825_v12  ;;  %v8152_v12 = vld [vmem:[#allocation13 + $0xf0] ss:$8 sps:$4 sm:$0xff]  }
 0x558   :  { %5173 = vmatprep.subr.bf16.mxu1 %v8108_v22  ;;  %v8147_v22 = vld [vmem:[#allocation13 + $0xd4] ss:$8 sps:$4 sm:$0xff]  }
 0x55a   :  { %4859 = vmatmul.mubr.bf16.gmra.mrb[4].mxu1 %v7232_v47  ;;  %v8154_v47 = vld [vmem:[#allocation13 + $0xf4] ss:$8 sps:$4 sm:$0xff]  }
 0x55b   :  { %5174 = vmatpush1.bf16.msra.mxu1 %v8106_v17  ;;  %4868 = vmatprep.mubr.bf16.mxu1 %v10833_v18  ;;  %v8145_v17 = vld [vmem:[#allocation13 + $0xd0] ss:$8 sps:$4 sm:$0xff]  }
 0x55c   :  { %5175 = vmatprep.subr.bf16.mxu1 %v8112_v7  ;;  %v10841_v7 = vld [vmem:[#allocation29_spill] sm:$0xff] }
 0x55f   :  { %5176 = vmatpush1.bf16.msra.mxu1 %v8110_v34  ;;  %v10842_v34 = vld [vmem:[#allocation30_spill] sm:$0xff] }
 0x560   :  { %5177 = vmatprep.subr.bf16.mxu1 %v8115_v45  ;;  %v10843_v58 = vcombine.high %v10841_v7, %v10842_v34  ;;  %v8157_v45 = vld [vmem:[#allocation13 + $0x104] ss:$8 sps:$4 sm:$0xff]  }
 0x562   :  { %4869 = vmatmul.mubr.bf16.gmra.mrb[8].mxu1 %v7235_v42  ;;  %v8160_v42 = vld [vmem:[#allocation13 + $0x114] ss:$8 sps:$4 sm:$0xff]  }
 0x563   :  { %5178 = vmatpush1.bf16.msra.mxu1 %v8113_v31  ;;  %4878 = vmatprep.mubr.bf16.mxu1 %v10833_v18  ;;  %v8155_v31 = vld [vmem:[#allocation13 + $0x100] ss:$8 sps:$4 sm:$0xff]  }
 0x564   :  { %5179 = vmatprep.subr.bf16.mxu1 %v8119_v39  ;;  %v10844_v39 = vcombine.low %v10841_v7, %v10842_v34 }
 0x567   :  { %5180 = vmatpush1.bf16.msra.mxu1 %v8117_v20  ;;  %v10847_v20 = vcombine.high %v10845_v44, %v10846_v38 }
 0x568   :  { %5181 = vmatprep.subr.bf16.mxu1 %v8122_v41  ;;  %v8158_v41 = vld [vmem:[#allocation13 + $0x110] ss:$8 sps:$4 sm:$0xff]  }
 0x56a   :  { %4879 = vmatmul.mubr.bf16.gmra.mrb[12].mxu1 %v7238_v62  ;;  %v8161_v62 = vld [vmem:[#allocation13 + $0x120] ss:$8 sps:$4 sm:$0xff]  }
 0x56b   :  { %5182 = vmatpush1.bf16.msra.mxu1 %v8120_v8  ;;  %4888 = vmatprep.mubr.bf16.mxu1 %v10833_v18  ;;  %v8163_v8 = vld [vmem:[#allocation13 + $0x124] ss:$8 sps:$4 sm:$0xff]  }
 0x56c   :  { %5183 = vmatprep.subr.bf16.mxu1 %v8126_v0  ;;  %v8166_v0 = vld [vmem:[#allocation13 + $0x134] ss:$8 sps:$4 sm:$0xff]  }
 0x56f   :  { %5184 = vmatpush1.bf16.msra.mxu1 %v8124_v43  ;;  %v10848_v43 = vcombine.low %v10845_v44, %v10846_v38 }
 0x570   :  { %5185 = vmatprep.subr.bf16.mxu1 %v8129_v33  ;;  %v8164_v33 = vld [vmem:[#allocation13 + $0x130] ss:$8 sps:$4 sm:$0xff]  }
 0x572   :  { %4889 = vmatmul.mubr.bf16.gmra.mrb[16].mxu1 %v7241_v6  ;;  %v8167_v6 = vld [vmem:[#allocation13 + $0x140] ss:$8 sps:$4 sm:$0xff]  }
 0x573   :  { %5186 = vmatpush1.bf16.msra.mxu1 %v8127_v57  ;;  %4898 = vmatprep.mubr.bf16.mxu1 %v10833_v18  ;;  %v8169_v57 = vld [vmem:[#allocation13 + $0x144] ss:$8 sps:$4 sm:$0xff]  }
 0x574   :  { %5187 = vmatprep.subr.bf16.mxu1 %v8133_v24  ;;  %v8172_v24 = vld [vmem:[#allocation13 + $0x154] ss:$8 sps:$4 sm:$0xff]  }
 0x577   :  { %5188 = vmatpush1.bf16.msra.mxu1 %v8131_v10  ;;  %v10849_v10 = vcombine.high %v10001_v15, %v10009_v37 }
 0x578   :  { %5189 = vmatprep.subr.bf16.mxu1 %v8136_v32  ;;  %v8170_v32 = vld [vmem:[#allocation13 + $0x150] ss:$8 sps:$4 sm:$0xff]  }
 0x57a   :  { %4899 = vmatmul.mubr.bf16.gmra.mrb[20].mxu1 %v7244_v3  ;;  %v8178_v3 = vld [vmem:[#allocation13 + $0x174] ss:$8 sps:$4 sm:$0xff]  }
 0x57b   :  { %5190 = vmatpush1.bf16.msra.mxu1 %v8134_v52  ;;  %4908 = vmatprep.mubr.bf16.mxu1 %v10833_v18  ;;  %v8173_v52 = vld [vmem:[#allocation13 + $0x160] ss:$8 sps:$4 sm:$0xff]  }
 0x57c   :  { %5191 = vmatprep.subr.bf16.mxu1 %v8140_v54  ;;  %v10850_v54 = vcombine.low %v10001_v15, %v10009_v37  ;;  %v8179_v15 = vld [vmem:[#allocation16] ss:$8 sps:$4 sm:$0xff]   ;;  %v8184_v37 = vld [vmem:[#allocation16 + $0x14] ss:$8 sps:$4 sm:$0xff]  }
 0x57f   :  { %5192 = vmatpush1.bf16.msra.mxu1 %v8138_v30  ;;  %v10852_v30 = vcombine.low %v10018_v25, %v10022_v27  ;;  %v8182_v25 = vld [vmem:[#allocation16 + $0x10] ss:$8 sps:$4 sm:$0xff]   ;;  %v8185_v27 = vld [vmem:[#allocation16 + $0x20] ss:$8 sps:$4 sm:$0xff]  }
 0x580   :  { %5193 = vmatprep.subr.bf16.mxu1 %v8143_v63  ;;  %v5395_v63 = vld [vmem:[#allocation2 + $0x48] sm:$0xff] }
 0x582   :  { %4909 = vmatmul.mubr.bf16.gmra.mrb[24].mxu1 %v7247_v61  ;;  %v5408_v61 = vshrl.u32 %v5395_v63, 16 }
 0x583   :  { %5194 = vmatpush1.bf16.msra.mxu1 %v8141_v48  ;;  %4918 = vmatprep.mubr.bf16.mxu1 %v10833_v18  ;;  %v5397_v48 = vld [vmem:[#allocation2 + $0x6c] sm:$0xff] }
 0x584   :  { %5195 = vmatprep.subr.bf16.mxu1 %v8147_v22  ;;  %v5411_v22 = vshll.u32 %v5395_v63, 16  ;;  %v5511_v63 = vld [vmem:[#allocation2 + $0x128] sm:$0xff] }
 0x587   :  { %5196 = vmatpush1.bf16.msra.mxu1 %v8145_v17  ;;  %v5417_v17 = vshll.u32 %v5397_v48, 16 }
 0x588   :  { %5197 = vmatprep.subr.bf16.mxu1 %v8150_v50  ;;  %v5435_v50 = vshrl.u32 %v5397_v48, 16  ;;  %v8229_v48 = vld [vmem:[#allocation16 + $0x104] ss:$8 sps:$4 sm:$0xff]  }
 0x589   :  { %v5419_v7 = vrot.slane %v5417_v17, 5 }
 0x58a   :  { %4919 = vmatmul.mubr.bf16.gmra.mrb[28].mxu1 %v7250_v29  ;;  %v8214_v29 = vld [vmem:[#allocation16 + $0xb4] ss:$8 sps:$4 sm:$0xff]   ;;  %v5437_v34 = vrot.slane %v5435_v50, 4 }
 0x58b   :  { %5198 = vmatpush1.bf16.msra.mxu1 %v8148_v23  ;;  %5201 = vmatprep.mubr.bf16.mxu1 %v10843_v58  ;;  %v8209_v23 = vld [vmem:[#allocation16 + $0xa0] ss:$8 sps:$4 sm:$0xff]   ;;  %v5401_v58 = vld [vmem:[#allocation2 + $0xfc] sm:$0xff] }
 0x58c   :  { %5199 = vmatprep.subr.bf16.mxu1 %v8154_v47  ;;  %v5410_v47 = vrot.slane %v5408_v61, 4  ;;  %v5459_v44 = vshll.u32 %v5401_v58, 16 }
 0x58f   :  { %5200 = vmatpush1.bf16.msra.mxu1 %v8152_v12  ;;  %v5403_v12 = vld [vmem:[#allocation2 + $0x120] sm:$0xff] }
 0x590   :  { %5282 = vmatprep.subr.bf16.mxu1 %v8157_v45  ;;  %v8212_v45 = vld [vmem:[#allocation16 + $0xb0] ss:$8 sps:$4 sm:$0xff]   ;;  %v5465_v38 = vshll.u32 %v5403_v12, 16 }
 0x592   :  { %5202 = vmatmul.mubr.bf16.vlgmr.msra.gmra.mrb[0].mxu1 %v10844_v39  ;;  %v5456_v39 = vshrl.u32 %v5401_v58, 16 }
 0x593   :  { %5283 = vmatpush1.bf16.msra.mxu1 %v8155_v31  ;;  %5211 = vmatprep.mubr.bf16.mxu1 %v10847_v20  ;;  %v5399_v31 = vld [vmem:[#allocation2 + $0x90] sm:$0x11]  ;;  %v5483_v20 = vshrl.u32 %v5403_v12, 16 }
 0x594   :  { %5284 = vmatprep.subr.bf16.mxu1 %v8160_v42  ;;  %v8217_v42 = vld [vmem:[#allocation16 + $0xc4] ss:$8 sps:$4 sm:$0xff]  }
 0x597   :  { %5285 = vmatpush1.bf16.msra.mxu1 %v8158_v41 }
 0x598   :  { %5286 = vmatprep.subr.bf16.mxu1 %v8163_v8  ;;  %v5438_v8 = vor.u32 %v5437_v34, %v5419_v7  ;;  %v8232_v34 = vld [vmem:[#allocation16 + $0x114] ss:$8 sps:$4 sm:$0xff]  }
 0x59a   :  { %5212 = vmatmul.mubr.bf16.gmra.mrb[4].mxu1 %v10848_v43  ;;  %v5405_v43 = vld [vmem:[#allocation2 + $0x144] sm:$0x11] }
 0x59b   :  { %5221 = vmatprep.mubr.bf16.mxu1 %v7210_v16  ;;  %5287 = vmatpush1.bf16.msra.mxu1 %v8161_v62  ;;  %v8175_v16 = vld [vmem:[#allocation13 + $0x164] ss:$8 sps:$4 sm:$0xff]   ;;  %v8215_v62 = vld [vmem:[#allocation16 + $0xc0] ss:$8 sps:$4 sm:$0xff]  }
 0x59c   :  { %5288 = vmatprep.subr.bf16.mxu1 %v8166_v0  ;;  %v8220_v0 = vld [vmem:[#allocation16 + $0xd4] ss:$8 sps:$4 sm:$0xff]  }
 0x59f   :  { %5289 = vmatpush1.bf16.msra.mxu1 %v8164_v33  ;;  %v5458_v33 = vrot.slane %v5456_v39, 4  ;;  %v5611_v39 = vld [vmem:[#allocation2 + $0x58] sm:$0xff] }
 0x5a0   :  { %5290 = vmatprep.subr.bf16.mxu1 %v8169_v57  ;;  %v5461_v57 = vrot.slane %v5459_v44, 5 }
 0x5a2   :  { %5222 = vmatmul.mubr.bf16.gmra.mrb[8].mxu1 %v7209_v1  ;;  %v8181_v1 = vld [vmem:[#allocation16 + $0x4] ss:$8 sps:$4 sm:$0xff]  }
 0x5a3   :  { %5231 = vmatprep.mubr.bf16.mxu1 %v10849_v10  ;;  %5291 = vmatpush1.bf16.msra.mxu1 %v8167_v6  ;;  %v5467_v6 = vrot.slane %v5465_v38, 5  ;;  %v5503_v10 = vld [vmem:[#allocation2 + $0x50] sm:$0xff] }
 0x5a4   :  { %5292 = vmatprep.subr.bf16.mxu1 %v8172_v24  ;;  %v5485_v24 = vrot.slane %v5483_v20, 4 }
 0x5a7   :  { %5293 = vmatpush1.bf16.msra.mxu1 %v8170_v32 }
 0x5a8   :  { %5294 = vmatprep.subr.bf16.mxu1 %v8175_v16  ;;  %v5439_v16 = vrot.slane %v5438_v8, 4  ;;  %v5613_v8 = vld [vmem:[#allocation2 + $0x7c] sm:$0xff] }
 0x5aa   :  { %5232 = vmatmul.mubr.bf16.gmra.mrb[12].mxu1 %v10850_v54  ;;  %v5505_v54 = vld [vmem:[#allocation2 + $0x74] sm:$0xff] }
 0x5ab   :  { %5241 = vmatprep.mubr.bf16.mxu1 %v10851_v9  ;;  %5295 = vmatpush1.bf16.msra.mxu1 %v8173_v52  ;;  %v8223_v9 = vld [vmem:[#allocation16 + $0xe4] ss:$8 sps:$4 sm:$0xff]  }
 0x5ac   :  { %5296 = vmatprep.subr.bf16.mxu1 %v8178_v3  ;;  %v8218_v3 = vld [vmem:[#allocation16 + $0xd0] ss:$8 sps:$4 sm:$0xff]  }
 0x5af   :  { %5297 = vmatpush1.bf16.msra.mxu1 %v8176_v21  ;;  %v5489_v21 = vshll.u32 %v5405_v43, 16  ;;  %v5627_v43 = vshll.u32 %v5611_v39, 16 }
 0x5b0   :  { %6211 = vmatprep.subr.bf16.mxu1 %v8181_v1  ;;  %v5516_v1 = vshrl.u32 %v5503_v10, 16 }
 0x5b2   :  { %5242 = vmatmul.mubr.bf16.gmra.mrb[16].mxu1 %v10852_v30  ;;  %v5462_v30 = vor.u32 %v5461_v57, %v5458_v33  ;;  %v5633_v57 = vshll.u32 %v5613_v8, 16 }
 0x5b3   :  { %5251 = vmatprep.mubr.bf16.mxu1 %v7219_v35  ;;  %v8193_v35 = vld [vmem:[#allocation16 + $0x44] ss:$8 sps:$4 sm:$0xff]  }
 0x5ba   :  { %5252 = vmatmul.mubr.bf16.gmra.mrb[20].mxu1 %v7218_v26  ;;  %v8191_v26 = vld [vmem:[#allocation16 + $0x40] ss:$8 sps:$4 sm:$0xff]  }
 0x5bb   :  { %5261 = vmatprep.mubr.bf16.mxu1 %v7222_v36  ;;  %v8194_v36 = vld [vmem:[#allocation16 + $0x50] ss:$8 sps:$4 sm:$0xff]  }
 0x5c2   :  { %5262 = vmatmul.mubr.bf16.gmra.mrb[24].mxu1 %v7221_v51  ;;  %v8199_v51 = vld [vmem:[#allocation16 + $0x64] ss:$8 sps:$4 sm:$0xff]  }
 0x5c3   :  { %5271 = vmatprep.mubr.bf16.mxu1 %v7225_v46  ;;  %v8203_v46 = vld [vmem:[#allocation16 + $0x80] ss:$8 sps:$4 sm:$0xff]  }
 0x5ca   :  { %5272 = vmatmul.mubr.bf16.gmra.mrb[28].mxu1 %v7224_v19  ;;  %v8208_v19 = vld [vmem:[#allocation16 + $0x94] ss:$8 sps:$4 sm:$0xff]  }
 0x5cb   :  { %5314 = vmatprep.mubr.bf16.mxu1 %v10833_v18 }
 0x5d2   :  { %5315 = vmatmul.mubr.bf16.vlgmr.msra.gmra.mrb[0].mxu1 %v10088_v55  ;;  %v8202_v55 = vld [vmem:[#allocation16 + $0x74] ss:$8 sps:$4 sm:$0xff]  }
 0x5d3   :  { %6212 = vmatpush1.bf16.msra.mxu1 %v8179_v15  ;;  %5324 = vmatprep.mubr.bf16.mxu1 %v10833_v18  ;;  %v5486_v15 = vor.u32 %v5485_v24, %v5467_v6 }
 0x5d4   :  { %6213 = vmatprep.subr.bf16.mxu1 %v8184_v37  ;;  %v5519_v37 = vshll.u32 %v5503_v10, 16 }
 0x5d7   :  { %6214 = vmatpush1.bf16.msra.mxu1 %v8182_v25 }
 0x5d8   :  { %6215 = vmatprep.subr.bf16.mxu1 %v8187_v5 }
 0x5da   :  { %5325 = vmatmul.mubr.bf16.gmra.mrb[4].mxu1 %v10107_v4  ;;  %v8200_v4 = vld [vmem:[#allocation16 + $0x70] ss:$8 sps:$4 sm:$0xff]  }
 0x5db   :  { %6216 = vmatpush1.bf16.msra.mxu1 %v8185_v27  ;;  %5334 = vmatprep.mubr.bf16.mxu1 %v10833_v18  ;;  %v5525_v27 = vshll.u32 %v5505_v54, 16 }
 0x5dc   :  { %6217 = vmatprep.subr.bf16.mxu1 %v8190_v53  ;;  %v5543_v53 = vshrl.u32 %v5505_v54, 16  ;;  %v8238_v54 = vld [vmem:[#allocation16 + $0x134] ss:$8 sps:$4 sm:$0xff]  }
 0x5df   :  { %6218 = vmatpush1.bf16.msra.mxu1 %v8188_v13  ;;  %v8221_v13 = vld [vmem:[#allocation16 + $0xe0] ss:$8 sps:$4 sm:$0xff]  }
 0x5e0   :  { %6219 = vmatprep.subr.bf16.mxu1 %v8193_v35  ;;  %v8226_v35 = vld [vmem:[#allocation16 + $0xf4] ss:$8 sps:$4 sm:$0xff]  }
 0x5e2   :  { %5335 = vmatmul.mubr.bf16.gmra.mrb[8].mxu1 %v10138_v49  ;;  %v8206_v49 = vld [vmem:[#allocation16 + $0x90] ss:$8 sps:$4 sm:$0xff]  }
 0x5e3   :  { %6220 = vmatpush1.bf16.msra.mxu1 %v8191_v26  ;;  %5344 = vmatprep.mubr.bf16.mxu1 %v10833_v18  ;;  %v5491_v26 = vrot.slane %v5489_v21, 5 }
 0x5e4   :  { %6221 = vmatprep.subr.bf16.mxu1 %v8196_v2  ;;  %v5518_v2 = vrot.slane %v5516_v1, 4  ;;  %v5629_v1 = vrot.slane %v5627_v43, 5 }
 0x5e7   :  { %6222 = vmatpush1.bf16.msra.mxu1 %v8194_v36 }
 0x5e8   :  { %6223 = vmatprep.subr.bf16.mxu1 %v8199_v51  ;;  %v5463_v51 = vrot.slane %v5462_v30, 4 }
 0x5ea   :  { %5345 = vmatmul.mubr.bf16.gmra.mrb[12].mxu1 %v10146_v11  ;;  %v8211_v11 = vld [vmem:[#allocation16 + $0xa4] ss:$8 sps:$4 sm:$0xff]   ;;  %v5468_v61 = vsel %vm9173_vm9, %v5463_v51, %v5467_v6  ;;  %v5651_v6 = vshrl.u32 %v5613_v8, 16  ;;  %v8245_v8 = vld [vmem:[#allocation16 + $0x160] ss:$8 sps:$4 sm:$0xff]  }
 0x5eb   :  { %6224 = vmatpush1.bf16.msra.mxu1 %v8197_v14  ;;  %5354 = vmatprep.mubr.bf16.mxu1 %v10833_v18  ;;  %v5487_v14 = vrot.slane %v5486_v15, 4  ;;  %v5635_v15 = vrot.slane %v5633_v57, 5 }
 0x5ec   :  { %6225 = vmatprep.subr.bf16.mxu1 %v8202_v55  ;;  %v5507_v55 = vld [vmem:[#allocation2 + $0x98] sm:$0x11] }
 0x5ef   :  { %6226 = vmatpush1.bf16.msra.mxu1 %v8200_v4  ;;  %v5521_v4 = vrot.slane %v5519_v37, 5  ;;  %v5653_v37 = vrot.slane %v5651_v6, 4  ;;  %v5723_v6 = vld [vmem:[#allocation2 + $0xa8] sm:$0x11] }
 0x5f0   :  { %6227 = vmatprep.subr.bf16.mxu1 %v8205_v56  ;;  %v5527_v56 = vrot.slane %v5525_v27, 5 }
 0x5f1   :  { %v5522_v17 = vor.u32 %v5521_v4, %v5518_v2 }
 0x5f2   :  { %5355 = vmatmul.mubr.bf16.gmra.mrb[16].mxu1 %v10177_v40  ;;  %v5413_v40 = vrot.slane %v5411_v22, 5  ;;  %v5492_v22 = vsel %vm9173_vm9, %v5487_v14, %v5491_v26 }
 0x5f3   :  { %6228 = vmatpush1.bf16.msra.mxu1 %v8203_v46  ;;  %5364 = vmatprep.mubr.bf16.mxu1 %v10833_v18  ;;  %v5545_v46 = vrot.slane %v5543_v53, 4  ;;  %v7351_v58 = vcombine.high %v5468_v61, %v5492_v22  ;;  %v5523_v12 = vrot.slane %v5522_v17, 4  ;;  %v8244_v17 = vld [vmem:[#allocation16 + $0x154] ss:$8 sps:$4 sm:$0xff]  }
 0x5f4   :  { %6229 = vmatprep.subr.bf16.mxu1 %v8208_v19  ;;  %v5414_v41 = vor.u32 %v5413_v40, %v5410_v47  ;;  %v5509_v19 = vld [vmem:[#allocation2 + $0x104] sm:$0xff]  ;;  %v5591_v47 = vshrl.u32 %v5511_v63, 16 }
 0x5f5   :  { %v5564_v50 = vshrl.u32 %v5509_v19, 16  ;;  %v8227_v40 = vld [vmem:[#allocation16 + $0x100] ss:$8 sps:$4 sm:$0xff]   ;;  %v5528_v24 = vsel %vm9173_vm9, %v5523_v12, %v5527_v56  ;;  %v8247_v12 = vld [vmem:[#allocation16 + $0x164] ss:$8 sps:$4 sm:$0xff]  }
 0x5f6   :  { %v5415_v32 = vrot.slane %v5414_v41, 4  ;;  %v5593_v41 = vrot.slane %v5591_v47, 4 }
 0x5f7   :  { %6230 = vmatpush1.bf16.msra.mxu1 %v8206_v49  ;;  %v8224_v49 = vld [vmem:[#allocation16 + $0xf0] ss:$8 sps:$4 sm:$0xff]  }
 0x5f8   :  { %6231 = vmatprep.subr.bf16.mxu1 %v8211_v11  ;;  %v5420_v5 = vsel %vm9173_vm9, %v5415_v32, %v5419_v7  ;;  %v5549_v11 = vshll.u32 %v5507_v55, 16  ;;  %v5654_v55 = vor.u32 %v5653_v37, %v5635_v15 }
 0x5fa   :  { %5365 = vmatmul.mubr.bf16.gmra.mrb[20].mxu1 %v10187_v60  ;;  %v5441_v60 = vshll.u32 %v5399_v31, 16  ;;  %v5513_v31 = vld [vmem:[#allocation2 + $0x14c] sm:$0x11] }
 0x5fb   :  { %6232 = vmatpush1.bf16.msra.mxu1 %v8209_v23  ;;  %5374 = vmatprep.mubr.bf16.mxu1 %v10833_v18  ;;  %v5546_v23 = vor.u32 %v5545_v46, %v5527_v56  ;;  %v5597_v33 = vshll.u32 %v5513_v31, 16 }
 0x5fc   :  { %6233 = vmatprep.subr.bf16.mxu1 %v8214_v29  ;;  %v5443_v52 = vrot.slane %v5441_v60, 5  ;;  %v5573_v29 = vshll.u32 %v5511_v63, 16  ;;  %v8230_v60 = vld [vmem:[#allocation16 + $0x110] ss:$8 sps:$4 sm:$0xff]   ;;  %v8239_v63 = vld [vmem:[#allocation16 + $0x140] ss:$8 sps:$4 sm:$0xff]  }
 0x5fd   :  { %v5547_v44 = vrot.slane %v5546_v23, 4  ;;  %v5599_v53 = vrot.slane %v5597_v33, 5  ;;  %v5655_v23 = vrot.slane %v5654_v55, 4 }
 0x5fe   :  { %v5575_v20 = vrot.slane %v5573_v29, 5 }
 0x5ff   :  { %6234 = vmatpush1.bf16.msra.mxu1 %v8212_v45  ;;  %v5551_v45 = vrot.slane %v5549_v11, 5 }
 0x600   :  { %6235 = vmatprep.subr.bf16.mxu1 %v8217_v42  ;;  %v5566_v42 = vrot.slane %v5564_v50, 4 }
 0x601   :  { %v5552_v10 = vsel %vm9173_vm9, %v5547_v44, %v5551_v45 }
 0x602   :  { %5375 = vmatmul.mubr.bf16.gmra.mrb[24].mxu1 %v10189_v59  ;;  %v5444_v59 = vsel %vm9173_vm9, %v5439_v16, %v5443_v52  ;;  %v5594_v16 = vor.u32 %v5593_v41, %v5575_v20  ;;  %v8233_v52 = vld [vmem:[#allocation16 + $0x120] ss:$8 sps:$4 sm:$0xff]   ;;  %v7354_v30 = vcombine.high %v5528_v24, %v5552_v10 }
 0x603   :  { %6236 = vmatpush1.bf16.msra.mxu1 %v8215_v62  ;;  %5384 = vmatprep.mubr.bf16.mxu1 %v10833_v18  ;;  %v7348_v36 = vcombine.high %v5420_v5, %v5444_v59  ;;  %v7347_v7 = vcombine.low %v5420_v5, %v5444_v59  ;;  %v8235_v62 = vld [vmem:[#allocation16 + $0x124] ss:$8 sps:$4 sm:$0xff]  }
 0x604   :  { %6237 = vmatprep.subr.bf16.mxu1 %v8220_v0  ;;  %v5624_v0 = vshrl.u32 %v5611_v39, 16  ;;  %v5617_v5 = vld [vmem:[#allocation2 + $0x10c] sm:$0xff]  ;;  %v5595_v27 = vrot.slane %v5594_v16, 4 }
 0x605   :  { %v5672_v51 = vshrl.u32 %v5617_v5, 16  ;;  %v5675_v14 = vshll.u32 %v5617_v5, 16 }
 0x606   :  { %v5626_v21 = vrot.slane %v5624_v0, 4 }
 0x607   :  { %6238 = vmatpush1.bf16.msra.mxu1 %v8218_v3  ;;  %v7350_v3 = vcombine.low %v5468_v61, %v5492_v22  ;;  %v5674_v61 = vrot.slane %v5672_v51, 4  ;;  %v5677_v22 = vrot.slane %v5675_v14, 5  ;;  %v5729_v14 = vld [vmem:[#allocation2 + $0x15c] sm:$0x11] }
 0x608   :  { %6239 = vmatprep.subr.bf16.mxu1 %v8223_v9  ;;  %v5615_v9 = vld [vmem:[#allocation2 + $0xa0] sm:$0x11]  ;;  %v5630_v2 = vor.u32 %v5629_v1, %v5626_v21 }
 0x609   :  { %v5657_v26 = vshll.u32 %v5615_v9, 16  ;;  %v5765_v9 = vshll.u32 %v5723_v6, 16 }
 0x60a   :  { %5385 = vmatmul.mubr.bf16.gmra.mrb[28].mxu1 %v10199_v28  ;;  %v5567_v28 = vshll.u32 %v5509_v19, 16  ;;  %v5600_v19 = vsel %vm9173_vm9, %v5595_v27, %v5599_v53  ;;  %v5631_v11 = vrot.slane %v5630_v2, 4 }
 0x60b   :  { %6240 = vmatpush1.bf16.msra.mxu1 %v8221_v13  ;;  %6243 = vmatprep.mubr.bf16.mxu1 %v7348_v36  ;;  %v5619_v13 = vld [vmem:[#allocation2 + $0x130] sm:$0xff] }
 0x60c   :  { %6241 = vmatprep.subr.bf16.mxu1 %v8226_v35  ;;  %v5569_v38 = vrot.slane %v5567_v28, 5  ;;  %v8236_v35 = vld [vmem:[#allocation16 + $0x130] ss:$8 sps:$4 sm:$0xff]   ;;  %v8241_v36 = vld [vmem:[#allocation16 + $0x144] ss:$8 sps:$4 sm:$0xff]   ;;  %v5681_v4 = vshll.u32 %v5619_v13, 16  ;;  %v5636_v45 = vsel %vm9173_vm9, %v5631_v11, %v5635_v15 }
 0x60d   :  { %v5699_v56 = vshrl.u32 %v5619_v13, 16  ;;  %v5621_v28 = vld [vmem:[#allocation2 + $0x154] sm:$0x11]  ;;  %v5396_v11 = vld [vmem:[#allocation2 + $0x50] sm:$0xf] }
 0x60e   :  { %v5570_v32 = vor.u32 %v5569_v38, %v5566_v42  ;;  %v5683_v29 = vrot.slane %v5681_v4, 5  ;;  %v5678_v42 = vor.u32 %v5677_v22, %v5674_v61  ;;  %v5398_v22 = vld [vmem:[#allocation2 + $0x74] sm:$0xf] }
 0x60f   :  { %6242 = vmatpush1.bf16.msra.mxu1 %v8224_v49  ;;  %v5659_v49 = vrot.slane %v5657_v26, 5  ;;  %v5701_v47 = vrot.slane %v5699_v56, 4  ;;  %v5813_v56 = vshll.u32 %v5729_v14, 16  ;;  %v5510_v14 = vld [vmem:[#allocation2 + $0x10c] sm:$0xf] }
 0x610   :  { %6324 = vmatprep.subr.bf16.mxu1 %v8229_v48  ;;  %v5571_v59 = vrot.slane %v5570_v32, 4  ;;  %v7353_v48 = vcombine.low %v5528_v24, %v5552_v10  ;;  %v5679_v43 = vrot.slane %v5678_v42, 4 }
 0x611   :  { %v5660_v31 = vsel %vm9173_vm9, %v5655_v23, %v5659_v49  ;;  %v5702_v39 = vor.u32 %v5701_v47, %v5683_v29  ;;  %v5815_v23 = vrot.slane %v5813_v56, 5  ;;  %v5431_v47 = vshll.u32 %v5398_v22, 16 }
 0x612   :  { %6244 = vmatmul.mubr.bf16.vlgmr.msra.gmra.mrb[0].mxu1 %v7347_v7  ;;  %v5576_v46 = vsel %vm9173_vm9, %v5571_v59, %v5575_v20  ;;  %v5719_v7 = vld [vmem:[#allocation2 + $0x60] sm:$0xff]  ;;  %v7360_v0 = vcombine.high %v5636_v45, %v5660_v31  ;;  %v5684_v21 = vsel %vm9173_vm9, %v5679_v43, %v5683_v29  ;;  %v7359_v53 = vcombine.low %v5636_v45, %v5660_v31  ;;  %v5400_v31 = vld [vmem:[#allocation2 + $0x98] sm:$0x1] }
 0x613   :  { %6325 = vmatpush1.bf16.msra.mxu1 %v8227_v40  ;;  %6253 = vmatprep.mubr.bf16.mxu1 %v7351_v58  ;;  %v7357_v50 = vcombine.high %v5576_v46, %v5600_v19  ;;  %v8242_v40 = vld [vmem:[#allocation16 + $0x150] ss:$8 sps:$4 sm:$0xff]   ;;  %v5705_v58 = vshll.u32 %v5621_v28, 16  ;;  %v5732_v44 = vshrl.u32 %v5719_v7, 16  ;;  %v5735_v38 = vshll.u32 %v5719_v7, 16 }
 0x614   :  { %6326 = vmatprep.subr.bf16.mxu1 %v8232_v34  ;;  %v5721_v34 = vld [vmem:[#allocation2 + $0x84] sm:$0xff]  ;;  %v5703_v33 = vrot.slane %v5702_v39, 4  ;;  %v5422_v28 = vshrl.u32 %v5396_v11, 16  ;;  %v5425_v29 = vshll.u32 %v5396_v11, 16  ;;  %v5433_v42 = vrot.slane %v5431_v47, 5 }
 0x615   :  { %v5741_v20 = vshll.u32 %v5721_v34, 16  ;;  %v5759_v41 = vshrl.u32 %v5721_v34, 16  ;;  %v5707_v57 = vrot.slane %v5705_v58, 5  ;;  %v5734_v24 = vrot.slane %v5732_v44, 4  ;;  %v5514_v47 = vld [vmem:[#allocation2 + $0x154] sm:$0x1] }
 0x616   :  { %v5737_v10 = vrot.slane %v5735_v38, 5  ;;  %v5424_v58 = vrot.slane %v5422_v28, 4  ;;  %v5402_v38 = vld [vmem:[#allocation2 + $0x104] sm:$0xf]  ;;  %v5581_v11 = vshll.u32 %v5510_v14, 16 }
 0x617   :  { %6327 = vmatpush1.bf16.msra.mxu1 %v8230_v60  ;;  %v7356_v60 = vcombine.low %v5576_v46, %v5600_v19  ;;  %v5743_v32 = vrot.slane %v5741_v20, 5  ;;  %v5761_v16 = vrot.slane %v5759_v41, 4  ;;  %v5708_v1 = vsel %vm9173_vm9, %v5703_v33, %v5707_v57  ;;  %v5404_v20 = vld [vmem:[#allocation2 + $0x128] sm:$0xf] }
 0x618   :  { %6328 = vmatprep.subr.bf16.mxu1 %v8235_v62  ;;  %v8250_v62 = vld [vmem:[#allocation16 + $0x174] ss:$8 sps:$4 sm:$0xff]   ;;  %v5738_v37 = vor.u32 %v5737_v10, %v5734_v24  ;;  %v7363_v13 = vcombine.high %v5684_v21, %v5708_v1  ;;  %v5479_v43 = vshll.u32 %v5404_v20, 16  ;;  %v5493_v33 = vshrl.u32 %v5404_v20, 16 }
 0x619   :  { %v5762_v5 = vor.u32 %v5761_v16, %v5743_v32 }
 0x61a   :  { %6254 = vmatmul.mubr.bf16.gmra.mrb[4].mxu1 %v7350_v3  ;;  %v5727_v3 = vld [vmem:[#allocation2 + $0x138] sm:$0xff] }
 0x61b   :  { %6263 = vmatprep.mubr.bf16.mxu1 %v7354_v30  ;;  %6329 = vmatpush1.bf16.msra.mxu1 %v8233_v52  ;;  %v5725_v52 = vld [vmem:[#allocation2 + $0x114] sm:$0xff]  ;;  %v5789_v59 = vshll.u32 %v5727_v3, 16  ;;  %v5807_v27 = vshrl.u32 %v5727_v3, 16  ;;  %v5763_v51 = vrot.slane %v5762_v5, 4  ;;  %v5481_v3 = vrot.slane %v5479_v43, 5 }
 0x61c   :  { %6330 = vmatprep.subr.bf16.mxu1 %v8238_v54  ;;  %v8248_v54 = vld [vmem:[#allocation16 + $0x170] ss:$8 sps:$4 sm:$0xff]   ;;  %v5780_v30 = vshrl.u32 %v5725_v52, 16  ;;  %v5783_v15 = vshll.u32 %v5725_v52, 16 }
 0x61d   :  { %v5791_v55 = vrot.slane %v5789_v59, 5  ;;  %v5809_v4 = vrot.slane %v5807_v27, 4 }
 0x61e   :  { %v5782_v26 = vrot.slane %v5780_v30, 4  ;;  %v5785_v2 = vrot.slane %v5783_v15, 5 }
 0x61f   :  { %6331 = vmatpush1.bf16.msra.mxu1 %v8236_v35  ;;  %v5767_v35 = vrot.slane %v5765_v9, 5  ;;  %v5504_v9 = vld [vmem:[#allocation2 + $0x58] sm:$0xf] }
 0x620   :  { %6332 = vmatprep.subr.bf16.mxu1 %v8241_v36  ;;  %v5739_v36 = vrot.slane %v5738_v37, 4  ;;  %v5786_v49 = vor.u32 %v5785_v2, %v5782_v26  ;;  %v5530_v5 = vshrl.u32 %v5504_v9, 16  ;;  %v5533_v27 = vshll.u32 %v5504_v9, 16 }
 0x621   :  { %v5768_v19 = vsel %vm9173_vm9, %v5763_v51, %v5767_v35 }
 0x622   :  { %6264 = vmatmul.mubr.bf16.gmra.mrb[8].mxu1 %v7353_v48  ;;  %v5744_v46 = vsel %vm9173_vm9, %v5739_v36, %v5743_v32  ;;  %v7362_v48 = vcombine.low %v5684_v21, %v5708_v1  ;;  %v5406_v32 = vld [vmem:[#allocation2 + $0x14c] sm:$0x1]  ;;  %v5506_v21 = vld [vmem:[#allocation2 + $0x7c] sm:$0xf]  ;;  %v5508_v36 = vld [vmem:[#allocation2 + $0xa0] sm:$0x1] }
 0x623   :  { %6273 = vmatprep.mubr.bf16.mxu1 %v7357_v50  ;;  %6333 = vmatpush1.bf16.msra.mxu1 %v8239_v63  ;;  %v5810_v63 = vor.u32 %v5809_v4, %v5791_v55  ;;  %v7366_v61 = vcombine.high %v5744_v46, %v5768_v19  ;;  %v7365_v45 = vcombine.low %v5744_v46, %v5768_v19  ;;  %v5499_v1 = vshll.u32 %v5406_v32, 16  ;;  %v5512_v19 = vld [vmem:[#allocation2 + $0x130] sm:$0xf] }
 0x624   :  { %6334 = vmatprep.subr.bf16.mxu1 %v8244_v17  ;;  %v5787_v17 = vrot.slane %v5786_v49, 4  ;;  %v5532_v51 = vrot.slane %v5530_v5, 4  ;;  %v5535_v4 = vrot.slane %v5533_v27, 5  ;;  %v5559_v49 = vshll.u32 %v5508_v36, 16 }
 0x625   :  { %v5811_v50 = vrot.slane %v5810_v63, 4  ;;  %v5501_v35 = vrot.slane %v5499_v1, 5 }
 0x626   :  { %v5792_v7 = vsel %vm9173_vm9, %v5787_v17, %v5791_v55  ;;  %v5536_v17 = vor.u32 %v5535_v4, %v5532_v51  ;;  %v5561_v28 = vrot.slane %v5559_v49, 5  ;;  %v5720_v4 = vld [vmem:[#allocation2 + $0x68] sm:$0xf] }
 0x627   :  { %6335 = vmatpush1.bf16.msra.mxu1 %v8242_v40  ;;  %v5445_v40 = vshrl.u32 %v5398_v22, 16  ;;  %v5816_v34 = vsel %vm9173_vm9, %v5811_v50, %v5815_v23  ;;  %v5601_v23 = vshrl.u32 %v5512_v19, 16 }
 0x628   :  { %6336 = vmatprep.subr.bf16.mxu1 %v8247_v12  ;;  %v5427_v12 = vrot.slane %v5425_v29, 5  ;;  %v7369_v44 = vcombine.high %v5792_v7, %v5816_v34  ;;  %v7368_v24 = vcombine.low %v5792_v7, %v5816_v34  ;;  %v5583_v7 = vrot.slane %v5581_v11, 5  ;;  %v5612_v34 = vld [vmem:[#allocation2 + $0x60] sm:$0xf] }
 0x629   :  { %v5447_v39 = vrot.slane %v5445_v40, 4  ;;  %v5641_v20 = vshll.u32 %v5612_v34, 16 }
 0x62a   :  { %6274 = vmatmul.mubr.bf16.gmra.mrb[12].mxu1 %v7356_v60  ;;  %v5428_v41 = vor.u32 %v5427_v12, %v5424_v58  ;;  %v5537_v58 = vrot.slane %v5536_v17, 4 }
 0x62b   :  { %6283 = vmatprep.mubr.bf16.mxu1 %v7360_v0  ;;  %6337 = vmatpush1.bf16.msra.mxu1 %v8245_v8  ;;  %v5451_v8 = vshll.u32 %v5400_v31, 16  ;;  %v5448_v60 = vor.u32 %v5447_v39, %v5433_v42  ;;  %v5473_v0 = vshll.u32 %v5402_v38, 16  ;;  %v5603_v31 = vrot.slane %v5601_v23, 4 }
 0x62c   :  { %6338 = vmatprep.subr.bf16.mxu1 %v8250_v62  ;;  %v5470_v62 = vshrl.u32 %v5402_v38, 16  ;;  %v5429_v57 = vrot.slane %v5428_v41, 4  ;;  %v5607_v39 = vshll.u32 %v5514_v47, 16  ;;  %v5638_v38 = vshrl.u32 %v5612_v34, 16 }
 0x62d   :  { %v5453_v6 = vrot.slane %v5451_v8, 5  ;;  %v5449_v10 = vrot.slane %v5448_v60, 4  ;;  %v5475_v52 = vrot.slane %v5473_v0, 5 }
 0x62e   :  { %v5472_v16 = vrot.slane %v5470_v62, 4  ;;  %v5434_v30 = vsel %vm9173_vm9, %v5429_v57, %v5433_v42  ;;  %v5614_v42 = vld [vmem:[#allocation2 + $0x84] sm:$0xf]  ;;  %v5616_v57 = vld [vmem:[#allocation2 + $0xa8] sm:$0x1]  ;;  %v5609_v32 = vrot.slane %v5607_v39, 5 }
 0x62f   :  { %6339 = vmatpush1.bf16.msra.mxu1 %v8248_v54  ;;  %v5495_v54 = vrot.slane %v5493_v33, 4  ;;  %v5454_v15 = vsel %vm9173_vm9, %v5449_v10, %v5453_v6  ;;  %v5647_v41 = vshll.u32 %v5614_v42, 16  ;;  %v5661_v0 = vshrl.u32 %v5614_v42, 16 }
 0x630   :  { %v5476_v37 = vor.u32 %v5475_v52, %v5472_v16  ;;  %v7349_v26 = vcombine.low %v5434_v30, %v5454_v15  ;;  %v5640_v6 = vrot.slane %v5638_v38, 4  ;;  %v5667_v9 = vshll.u32 %v5616_v57, 16 }
 0x631   :  { %v5496_v59 = vor.u32 %v5495_v54, %v5481_v3  ;;  %v5649_v16 = vrot.slane %v5647_v41, 5  ;;  %v5663_v52 = vrot.slane %v5661_v0, 4  ;;  %v5620_v54 = vld [vmem:[#allocation2 + $0x138] sm:$0xf] }
 0x632   :  { %6284 = vmatmul.mubr.bf16.gmra.mrb[16].mxu1 %v7359_v53  ;;  %v5539_v53 = vshll.u32 %v5506_v21, 16  ;;  %v5477_v2 = vrot.slane %v5476_v37, 4  ;;  %v5709_v27 = vshrl.u32 %v5620_v54, 16  ;;  %v5669_v51 = vrot.slane %v5667_v9, 5 }
 0x633   :  { %6293 = vmatprep.mubr.bf16.mxu1 %v7363_v13  ;;  %v5553_v13 = vshrl.u32 %v5506_v21, 16  ;;  %v5497_v55 = vrot.slane %v5496_v59, 4  ;;  %v5664_v5 = vor.u32 %v5663_v52, %v5649_v16  ;;  %v5695_v59 = vshll.u32 %v5620_v54, 16 }
 0x634   :  { %v5541_v56 = vrot.slane %v5539_v53, 5  ;;  %v5482_v63 = vsel %vm9173_vm9, %v5477_v2, %v5481_v3  ;;  %v5618_v3 = vld [vmem:[#allocation2 + $0x114] sm:$0xf] }
 0x635   :  { %v5555_v46 = vrot.slane %v5553_v13, 4  ;;  %v5502_v22 = vsel %vm9173_vm9, %v5497_v55, %v5501_v35  ;;  %v5686_v30 = vshrl.u32 %v5618_v3, 16  ;;  %v5689_v15 = vshll.u32 %v5618_v3, 16  ;;  %v5622_v35 = vld [vmem:[#allocation2 + $0x15c] sm:$0x1] }
 0x636   :  { %v7352_v29 = vcombine.low %v5482_v63, %v5502_v22  ;;  %v5542_v8 = vsel %vm9173_vm9, %v5537_v58, %v5541_v56  ;;  %v5665_v36 = vrot.slane %v5664_v5, 4  ;;  %v5711_v55 = vrot.slane %v5709_v27, 4 }
 0x637   :  { %v5556_v50 = vor.u32 %v5555_v46, %v5541_v56  ;;  %v5691_v2 = vrot.slane %v5689_v15, 5  ;;  %v5722_v56 = vld [vmem:[#allocation2 + $0x8c] sm:$0xf]  ;;  %v5715_v46 = vshll.u32 %v5622_v35, 16  ;;  %v5746_v63 = vshrl.u32 %v5720_v4, 16 }
 0x638   :  { %v5670_v11 = vsel %vm9173_vm9, %v5665_v36, %v5669_v51  ;;  %v5755_v22 = vshll.u32 %v5722_v56, 16  ;;  %v5769_v17 = vshrl.u32 %v5722_v56, 16 }
 0x639   :  { %v5557_v12 = vrot.slane %v5556_v50, 4 }
 0x63a   :  { %6294 = vmatmul.mubr.bf16.gmra.mrb[20].mxu1 %v7362_v48  ;;  %v5578_v48 = vshrl.u32 %v5510_v14, 16  ;;  %v5697_v14 = vrot.slane %v5695_v59, 5  ;;  %v5757_v34 = vrot.slane %v5755_v22, 5  ;;  %v5771_v58 = vrot.slane %v5769_v17, 4 }
 0x63b   :  { %6303 = vmatprep.mubr.bf16.mxu1 %v7366_v61  ;;  %v5587_v61 = vshll.u32 %v5512_v19, 16  ;;  %v5562_v60 = vsel %vm9173_vm9, %v5557_v12, %v5561_v28  ;;  %v5724_v28 = vld [vmem:[#allocation2 + $0xb0] sm:$0x1]  ;;  %v5726_v12 = vld [vmem:[#allocation2 + $0x11c] sm:$0xf] }
 0x63c   :  { %v5580_v40 = vrot.slane %v5578_v48, 4  ;;  %v7355_v43 = vcombine.low %v5542_v8, %v5562_v60  ;;  %v5749_v48 = vshll.u32 %v5720_v4, 16  ;;  %v5797_v38 = vshll.u32 %v5726_v12, 16 }
 0x63d   :  { %v5772_v41 = vor.u32 %v5771_v58, %v5757_v34 }
 0x63e   :  { %v5751_v47 = vrot.slane %v5749_v48, 5 }
 0x63f   :  { %v5773_v57 = vrot.slane %v5772_v41, 4 }
 0x642   :  { %6304 = vmatmul.mubr.bf16.gmra.mrb[24].mxu1 %v7365_v45  ;;  %v5589_v45 = vrot.slane %v5587_v61, 5  ;;  %v5712_v61 = vor.u32 %v5711_v55, %v5697_v14 }
 0x643   :  { %6313 = vmatprep.mubr.bf16.mxu1 %v7369_v44  ;;  %v5584_v44 = vor.u32 %v5583_v7, %v5580_v40  ;;  %v5717_v7 = vrot.slane %v5715_v46, 5 }
 0x644   :  { %v5604_v62 = vor.u32 %v5603_v31, %v5589_v45  ;;  %v5713_v40 = vrot.slane %v5712_v61, 4  ;;  %v5775_v31 = vshll.u32 %v5724_v28, 16 }
 0x645   :  { %v5585_v33 = vrot.slane %v5584_v44, 4  ;;  %v5794_v44 = vshrl.u32 %v5726_v12, 16 }
 0x646   :  { %v5605_v10 = vrot.slane %v5604_v62, 4 }
 0x647   :  { %v5590_v21 = vsel %vm9173_vm9, %v5585_v33, %v5589_v45  ;;  %v5728_v45 = vld [vmem:[#allocation2 + $0x140] sm:$0xf]  ;;  %v5796_v33 = vrot.slane %v5794_v44, 4 }
 0x648   :  { %v5610_v37 = vsel %vm9173_vm9, %v5605_v10, %v5609_v32  ;;  %v5803_v8 = vshll.u32 %v5728_v45, 16  ;;  %v5817_v60 = vshrl.u32 %v5728_v45, 16 }
 0x649   :  { %v7358_v53 = vcombine.low %v5590_v21, %v5610_v37 }
 0x64a   :  { %6314 = vmatmul.mubr.bf16.gmra.mrb[28].mxu1 %v7368_v24  ;;  %v5643_v24 = vrot.slane %v5641_v20, 5  ;;  %v5718_v20 = vsel %vm9173_vm9, %v5713_v40, %v5717_v7  ;;  %v5805_v10 = vrot.slane %v5803_v8, 5  ;;  %v5819_v32 = vrot.slane %v5817_v60, 4 }
 0x64b   :  { %6356 = vmatprep.mubr.bf16.mxu1 %v10833_v18 }
 0x64c   :  { %v5644_v1 = vor.u32 %v5643_v24, %v5640_v6  ;;  %v5730_v6 = vld [vmem:[#allocation2 + $0x164] sm:$0x1]  ;;  %v5799_v24 = vrot.slane %v5797_v38, 5  ;;  %v5820_v9 = vor.u32 %v5819_v32, %v5805_v10 }
 0x64e   :  { %v5645_v13 = vrot.slane %v5644_v1, 4  ;;  %v5800_v54 = vor.u32 %v5799_v24, %v5796_v33 }
 0x650   :  { %v5650_v19 = vsel %vm9173_vm9, %v5645_v13, %v5649_v16  ;;  %v5823_v16 = vshll.u32 %v5730_v6, 16  ;;  %v5801_v1 = vrot.slane %v5800_v54, 4 }
 0x651   :  { %v7361_v50 = vcombine.low %v5650_v19, %v5670_v11 }
 0x652   :  { %6357 = vmatmul.mubr.bf16.vlgmr.msra.gmra.mrb[0].mxu1 %v7349_v26  ;;  %v5688_v26 = vrot.slane %v5686_v30, 4  ;;  %v5821_v30 = vrot.slane %v5820_v9, 4  ;;  %v5825_v15 = vrot.slane %v5823_v16, 5  ;;  %v5806_v37 = vsel %vm9173_vm9, %v5801_v1, %v5805_v10 }
 0x653   :  { %6366 = vmatprep.mubr.bf16.mxu1 %v10833_v18 }
 0x654   :  { %v5692_v49 = vor.u32 %v5691_v2, %v5688_v26  ;;  %v5826_v5 = vsel %vm9173_vm9, %v5821_v30, %v5825_v15 }
 0x655   :  { %v7370_v59 = vcombine.low %v5806_v37, %v5826_v5 }
 0x656   :  { %v5693_v23 = vrot.slane %v5692_v49, 4 }
 0x658   :  { %v5698_v42 = vsel %vm9173_vm9, %v5693_v23, %v5697_v14 }
 0x659   :  { %v7364_v62 = vcombine.low %v5698_v42, %v5718_v20 }
 0x65a   :  { %6367 = vmatmul.mubr.bf16.gmra.mrb[4].mxu1 %v7352_v29  ;;  %v5748_v29 = vrot.slane %v5746_v63, 4 }
 0x65b   :  { %6376 = vmatprep.mubr.bf16.mxu1 %v10833_v18 }
 0x65c   :  { %v5752_v39 = vor.u32 %v5751_v47, %v5748_v29 }
 0x65e   :  { %v5753_v0 = vrot.slane %v5752_v39, 4 }
 0x660   :  { %v5758_v52 = vsel %vm9173_vm9, %v5753_v0, %v5757_v34 }
 0x662   :  { %6377 = vmatmul.mubr.bf16.gmra.mrb[8].mxu1 %v7355_v43  ;;  %v5777_v43 = vrot.slane %v5775_v31, 5 }
 0x663   :  { %6386 = vmatprep.mubr.bf16.mxu1 %v10833_v18 }
 0x664   :  { %v5778_v3 = vsel %vm9173_vm9, %v5773_v57, %v5777_v43 }
 0x665   :  { %v7367_v21 = vcombine.low %v5758_v52, %v5778_v3 }
 0x66a   :  { %6387 = vmatmul.mubr.bf16.gmra.mrb[12].mxu1 %v7358_v53 }
 0x66b   :  { %6396 = vmatprep.mubr.bf16.mxu1 %v10833_v18 }
 0x672   :  { %6397 = vmatmul.mubr.bf16.gmra.mrb[16].mxu1 %v7361_v50 }
 0x673   :  { %6406 = vmatprep.mubr.bf16.mxu1 %v10833_v18 }
 0x67a   :  { %6407 = vmatmul.mubr.bf16.gmra.mrb[20].mxu1 %v7364_v62 }
 0x67b   :  { %6416 = vmatprep.mubr.bf16.mxu1 %v10833_v18 }
 0x682   :  { %6417 = vmatmul.mubr.bf16.gmra.mrb[24].mxu1 %v7367_v21 }
 0x683   :  { %6426 = vmatprep.mubr.bf16.mxu1 %v10833_v18 }
 0x68a   :  { %6427 = vmatmul.mubr.bf16.gmra.mrb[28].mxu1 %v7370_v59 }
 0x725   :  { %v10360_v27 = vpop.f32.mrb[0].mxu1 }
 0x726   :  { %v10362_v53 = vpop.f32.mrb[1].mxu1  ;;  %v6511_v35 = vmul.f32 %v10360_v27, %v10360_v27 }
 0x727   :  { %v10364_v13 = vpop.f32.mrb[2].mxu1  ;;  %v6512_v25 = vmul.f32 %v10362_v53, %v10362_v53 }
 0x728   :  { %v6469_v18 = vadd.f32 %v10364_v13, %v10360_v27  ;;  %v6513_v26 = vmul.f32 %v10364_v13, %v10364_v13  ;;  %v10372_v2 = vpop.f32.mrb[3].mxu1 }
 0x729   :  { %v6490_v36 = vadd.f32 %v10372_v2, %v10362_v53  ;;  %v6514_v51 = vmul.f32 %v10372_v2, %v10372_v2 }
 0x72a   :  { %v6543_v14 = vadd.f32 %v6513_v26, %v6511_v35 }
 0x72b   :  { %v6564_v55 = vadd.f32 %v6514_v51, %v6512_v25 }
 0x72d   :  { %v10380_v4 = vpop.f32.mrb[4].mxu1 }
 0x72e   :  { %v6470_v56 = vadd.f32 %v6469_v18, %v10380_v4  ;;  %v6515_v46 = vmul.f32 %v10380_v4, %v10380_v4  ;;  %v10385_v19 = vpop.f32.mrb[5].mxu1 }
 0x72f   :  { %v6491_v49 = vadd.f32 %v6490_v36, %v10385_v19  ;;  %v6516_v63 = vmul.f32 %v10385_v19, %v10385_v19  ;;  %v10390_v48 = vpop.f32.mrb[6].mxu1 }
 0x730   :  { %v6544_v11 = vadd.f32 %v6543_v14, %v6515_v46  ;;  %v6471_v61 = vadd.f32 %v6470_v56, %v10390_v48  ;;  %v6517_v22 = vmul.f32 %v10390_v48, %v10390_v48  ;;  %v10395_v17 = vpop.f32.mrb[7].mxu1 }
 0x731   :  { %v6565_v50 = vadd.f32 %v6564_v55, %v6516_v63  ;;  %v6492_v23 = vadd.f32 %v6491_v49, %v10395_v17  ;;  %v6518_v28 = vmul.f32 %v10395_v17, %v10395_v17 }
 0x732   :  { %v6545_v29 = vadd.f32 %v6544_v11, %v6517_v22 }
 0x733   :  { %v6566_v47 = vadd.f32 %v6565_v50, %v6518_v28 }
 0x735   :  { %v10400_v40 = vpop.f32.mrb[8].mxu1 }
 0x736   :  { %v6472_v7 = vadd.f32 %v6471_v61, %v10400_v40  ;;  %v6519_v34 = vmul.f32 %v10400_v40, %v10400_v40  ;;  %v10405_v58 = vpop.f32.mrb[9].mxu1 }
 0x737   :  { %v6493_v12 = vadd.f32 %v6492_v23, %v10405_v58  ;;  %v6520_v45 = vmul.f32 %v10405_v58, %v10405_v58  ;;  %v10410_v31 = vpop.f32.mrb[10].mxu1 }
 0x738   :  { %v6546_v42 = vadd.f32 %v6545_v29, %v6519_v34  ;;  %v6473_v39 = vadd.f32 %v6472_v7, %v10410_v31  ;;  %v6521_v44 = vmul.f32 %v10410_v31, %v10410_v31  ;;  %v10415_v38 = vpop.f32.mrb[11].mxu1 }
 0x739   :  { %v6567_v20 = vadd.f32 %v6566_v47, %v6520_v45  ;;  %v6494_v41 = vadd.f32 %v6493_v12, %v10415_v38  ;;  %v6522_v8 = vmul.f32 %v10415_v38, %v10415_v38 }
 0x73a   :  { %v6547_v60 = vadd.f32 %v6546_v42, %v6521_v44 }
 0x73b   :  { %v6568_v62 = vadd.f32 %v6567_v20, %v6522_v8 }
 0x73d   :  { %v10420_v0 = vpop.f32.mrb[12].mxu1 }
 0x73e   :  { %v6474_v43 = vadd.f32 %v6473_v39, %v10420_v0  ;;  %v6523_v33 = vmul.f32 %v10420_v0, %v10420_v0  ;;  %v10425_v57 = vpop.f32.mrb[13].mxu1 }
 0x73f   :  { %v6495_v6 = vadd.f32 %v6494_v41, %v10425_v57  ;;  %v6524_v24 = vmul.f32 %v10425_v57, %v10425_v57  ;;  %v10430_v10 = vpop.f32.mrb[14].mxu1 }
 0x740   :  { %v6548_v32 = vadd.f32 %v6547_v60, %v6523_v33  ;;  %v6475_v16 = vadd.f32 %v6474_v43, %v10430_v10  ;;  %v6525_v52 = vmul.f32 %v10430_v10, %v10430_v10  ;;  %v10435_v3 = vpop.f32.mrb[15].mxu1 }
 0x741   :  { %v6569_v54 = vadd.f32 %v6568_v62, %v6524_v24  ;;  %v6496_v9 = vadd.f32 %v6495_v6, %v10435_v3  ;;  %v6526_v21 = vmul.f32 %v10435_v3, %v10435_v3 }
 0x742   :  { %v6549_v1 = vadd.f32 %v6548_v32, %v6525_v52 }
 0x743   :  { %v6570_v30 = vadd.f32 %v6569_v54, %v6526_v21 }
 0x745   :  { %v10440_v15 = vpop.f32.mrb[16].mxu1 }
 0x746   :  { %v6476_v37 = vadd.f32 %v6475_v16, %v10440_v15  ;;  %v6527_v5 = vmul.f32 %v10440_v15, %v10440_v15  ;;  %v10445_v59 = vpop.f32.mrb[17].mxu1 }
 0x747   :  { %v6497_v35 = vadd.f32 %v6496_v9, %v10445_v59  ;;  %v6528_v18 = vmul.f32 %v10445_v59, %v10445_v59  ;;  %v10450_v26 = vpop.f32.mrb[18].mxu1 }
 0x748   :  { %v6550_v25 = vadd.f32 %v6549_v1, %v6527_v5  ;;  %v6477_v36 = vadd.f32 %v6476_v37, %v10450_v26  ;;  %v6529_v51 = vmul.f32 %v10450_v26, %v10450_v26  ;;  %v10455_v14 = vpop.f32.mrb[19].mxu1 }
 0x749   :  { %v6571_v55 = vadd.f32 %v6570_v30, %v6528_v18  ;;  %v6498_v56 = vadd.f32 %v6497_v35, %v10455_v14  ;;  %v6530_v46 = vmul.f32 %v10455_v14, %v10455_v14 }
 0x74a   :  { %v6551_v49 = vadd.f32 %v6550_v25, %v6529_v51 }
 0x74b   :  { %v6572_v63 = vadd.f32 %v6571_v55, %v6530_v46 }
 0x74d   :  { %v10460_v11 = vpop.f32.mrb[20].mxu1 }
 0x74e   :  { %v6478_v61 = vadd.f32 %v6477_v36, %v10460_v11  ;;  %v6531_v22 = vmul.f32 %v10460_v11, %v10460_v11  ;;  %v10465_v50 = vpop.f32.mrb[21].mxu1 }
 0x74f   :  { %v6499_v23 = vadd.f32 %v6498_v56, %v10465_v50  ;;  %v6532_v28 = vmul.f32 %v10465_v50, %v10465_v50  ;;  %v10470_v29 = vpop.f32.mrb[22].mxu1 }
 0x750   :  { %v6552_v47 = vadd.f32 %v6551_v49, %v6531_v22  ;;  %v6479_v7 = vadd.f32 %v6478_v61, %v10470_v29  ;;  %v6533_v34 = vmul.f32 %v10470_v29, %v10470_v29  ;;  %v10475_v12 = vpop.f32.mrb[23].mxu1 }
 0x751   :  { %v6573_v45 = vadd.f32 %v6572_v63, %v6532_v28  ;;  %v6500_v42 = vadd.f32 %v6499_v23, %v10475_v12  ;;  %v6534_v39 = vmul.f32 %v10475_v12, %v10475_v12 }
 0x752   :  { %v6553_v44 = vadd.f32 %v6552_v47, %v6533_v34 }
 0x753   :  { %v6574_v20 = vadd.f32 %v6573_v45, %v6534_v39 }
 0x755   :  { %v10480_v41 = vpop.f32.mrb[24].mxu1 }
 0x756   :  { %v6480_v8 = vadd.f32 %v6479_v7, %v10480_v41  ;;  %v6535_v60 = vmul.f32 %v10480_v41, %v10480_v41  ;;  %v10485_v62 = vpop.f32.mrb[25].mxu1 }
 0x757   :  { %v6501_v43 = vadd.f32 %v6500_v42, %v10485_v62  ;;  %v6536_v33 = vmul.f32 %v10485_v62, %v10485_v62  ;;  %v10490_v6 = vpop.f32.mrb[26].mxu1 }
 0x758   :  { %v6554_v24 = vadd.f32 %v6553_v44, %v6535_v60  ;;  %v6481_v32 = vadd.f32 %v6480_v8, %v10490_v6  ;;  %v6537_v16 = vmul.f32 %v10490_v6, %v10490_v6  ;;  %v10495_v52 = vpop.f32.mrb[27].mxu1 }
 0x759   :  { %v6575_v54 = vadd.f32 %v6574_v20, %v6536_v33  ;;  %v6502_v9 = vadd.f32 %v6501_v43, %v10495_v52  ;;  %v6538_v21 = vmul.f32 %v10495_v52, %v10495_v52 }
 0x75a   :  { %v6555_v1 = vadd.f32 %v6554_v24, %v6537_v16 }
 0x75b   :  { %v6576_v30 = vadd.f32 %v6575_v54, %v6538_v21 }
 0x75d   :  { %v10500_v37 = vpop.f32.mrb[28].mxu1 }
 0x75e   :  { %v6482_v5 = vadd.f32 %v6481_v32, %v10500_v37  ;;  %v6539_v35 = vmul.f32 %v10500_v37, %v10500_v37  ;;  %v10505_v18 = vpop.f32.mrb[29].mxu1 }
 0x75f   :  { %v6503_v25 = vadd.f32 %v6502_v9, %v10505_v18  ;;  %v6540_v36 = vmul.f32 %v10505_v18, %v10505_v18  ;;  %v10510_v51 = vpop.f32.mrb[30].mxu1 }
 0x760   :  { %v6556_v55 = vadd.f32 %v6555_v1, %v6539_v35  ;;  %v6483_v56 = vadd.f32 %v6482_v5, %v10510_v51  ;;  %v6541_v46 = vmul.f32 %v10510_v51, %v10510_v51  ;;  %v10515_v49 = vpop.f32.mrb[31].mxu1 }
 0x761   :  { %v6577_v63 = vadd.f32 %v6576_v30, %v6540_v36  ;;  %v6504_v61 = vadd.f32 %v6503_v25, %v10515_v49  ;;  %v6542_v22 = vmul.f32 %v10515_v49, %v10515_v49 }
 0x762   :  { %v6484_v23 = vrot.slane %v6483_v56, 4  ;;  %v6557_v28 = vadd.f32 %v6556_v55, %v6541_v46 }
 0x763   :  { %v6505_v47 = vrot.slane %v6504_v61, 4  ;;  %v6578_v7 = vadd.f32 %v6577_v63, %v6542_v22 }
 0x764   :  { %v6485_v34 = vadd.f32 %v6484_v23, %v6483_v56  ;;  %v6558_v45 = vrot.slane %v6557_v28, 4 }
 0x765   :  { %v6506_v42 = vadd.f32 %v6505_v47, %v6504_v61  ;;  %v6579_v39 = vrot.slane %v6578_v7, 4 }
 0x766   :  { %v6486_v44 = vrot.slane %v6485_v34, 2  ;;  %v6559_v20 = vadd.f32 %v6558_v45, %v6557_v28 }
 0x767   :  { %v6507_v8 = vrot.slane %v6506_v42, 2  ;;  %v6580_v60 = vadd.f32 %v6579_v39, %v6578_v7 }
 0x768   :  { %v6487_v43 = vadd.f32 %v6486_v44, %v6485_v34  ;;  %v6560_v33 = vrot.slane %v6559_v20, 2 }
 0x769   :  { %v6508_v24 = vadd.f32 %v6507_v8, %v6506_v42  ;;  %v6581_v32 = vrot.slane %v6580_v60, 2 }
 0x76a   :  { %v6488_v16 = vrot.slane %v6487_v43, 1  ;;  %v6561_v54 = vadd.f32 %v6560_v33, %v6559_v20  ;;  %v6611_v20 = vld [vmem:[%s10733_s10] sm:$0x1]  ;;  %v10854_v33 = vld [vmem:[#allocation25_spill] sm:$0xff]  ;;  %s8466_s10 = smov [#allocation17]  }
 0x76b   :  { %v6582_v9 = vadd.f32 %v6581_v32, %v6580_v60  ;;  %v6509_v30 = vrot.slane %v6508_v24, 1 }
 0x76c   :  { %v6489_v21 = vadd.f32 %v6488_v16, %v6487_v43  ;;  %v6562_v1 = vrot.slane %v6561_v54, 1  ;;  %v6615_v43 = vld [vmem:[%s10734_s11] sm:$0x1]  ;;  %s6906_s11 = sshll.u32 %s8466_s10, 4  ;;  %s6907_s11 = int_to_ptr.vmem [resolvable:$true] %s6906_s11 }
 0x76d   :  { %v6583_v35 = vrot.slane %v6582_v9, 1  ;;  %v6510_v25 = vadd.f32 %v6509_v30, %v6508_v24  ;;  %v10536_v30 = vstv %s6922_s2  ;;  %s8419_s29 = scalar_lea.vmem %s6907_s11, 4096  ;;  %p8424_p4 = scmp.lt.s32.totalorder %s6907_s11, %s6907_s11 }
 0x76e   :  { %6586 = vrot.lane.b32.xlu0 %v6489_v21, %s8461_s26  ;;  %v6563_v5 = vadd.f32 %v6562_v1, %v6561_v54  ;;  %p8420_p3 = scmp.ne.s32.totalorder %s6907_s11, %s8419_s29  ;;  %p8425_p5 = scmp.lt.s32.totalorder %s8419_s29, %s8419_s29 }
 0x76f   :  { %v6584_v36 = vadd.f32 %v6583_v35, %v6582_v9 }
 0x770   :  { %6598 = vrot.lane.b32.xlu1 %v6563_v5, %s8461_s26  ;;  %p8426_p6 = por %p8425_p5, %p8424_p4 }
 0x772   :  { %6592 = vrot.lane.b32.xlu0 %v6510_v25, %s8461_s26  ;;  %p8427_p7 = pnand %p8426_p6, %p8420_p3 }
 0x774   :  { %6604 = vrot.lane.b32.xlu1 %v6584_v36, %s8461_s26 }
 0x7e0   :  { %v6587_v55 = vpop.permute.xlu0 %6586 }
 0x7e1   :  { %v6589_v56 = vadd.f32 %v6587_v55, %v6489_v21 }
 0x7e2   :  { %v6599_v46 = vpop.permute.xlu1 %6598 }
 0x7e3   :  { %v6601_v63 = vadd.f32 %v6599_v46, %v6563_v5  ;;  %v6590_v61 = vadd.f32 %v6589_v56, %v6510_v25 }
 0x7e4   :  { %v6593_v22 = vpop.permute.xlu0 %6592 }
 0x7e5   :  { %v6595_v23 = vadd.f32 %v6593_v22, %v6590_v61  ;;  %v6602_v28 = vadd.f32 %v6601_v63, %v6584_v36 }
 0x7e6   :  { %v6605_v47 = vpop.permute.xlu1 %6604 }
 0x7e7   :  { %v6596_v7 = vmul.f32 0.001953125, %v6595_v23  ;;  %v6607_v34 = vadd.f32 %v6605_v47, %v6602_v28 }
 0x7e9   :  { %v6609_v45 = vmul.f32 %v6596_v7, %v6596_v7  ;;  %v6608_v42 = vmul.f32 0.001953125, %v6607_v34 }
 0x7eb   :  { %v6610_v39 = vsub.f32 %v6608_v42, %v6609_v45 }
 0x7ed   :  { %v6612_v44 = vadd.f32 1e-05, %v6610_v39 }
 0x7ef   :  { %8253 = vrsqrt.f32 %v6612_v44 }
 0x7f9   :  { %v8254_v8 = vpop.eup %8253 }
 0x7fa   :  { %v6614_v60 = vmul.f32 %v8254_v8, %v6611_v20  ;;  %v6660_v20 = vld [vmem:[#allocation7] sm:$0xff]  ;;  %v6661_v8 = vld [vmem:[#allocation7 + $0x8] sm:$0xff] }
 0x7fc   :  { %v6622_v24 = vrot.slane %v6614_v60, %v10854_v33  ;;  %v6616_v32 = vmul.f32 %v6614_v60, %v6596_v7 }
 0x7fe   :  { %6623 = vrot.lane.b32.xlu0 %v6622_v24, %s8461_s26  ;;  %v6617_v16 = vsub.f32 %v6615_v43, %v6616_v32  ;;  %v6662_v32 = vld [vmem:[#allocation7 + $0x40] sm:$0xff] }
 0x800   :  { %v6631_v54 = vrot.slane %v6617_v16, %v10854_v33 }
 0x802   :  { %6632 = vrot.lane.b32.xlu1 %v6631_v54, %s8461_s26  ;;  %v6664_v54 = vld [vmem:[#allocation7 + $0x80] sm:$0xff] }
 0x870   :  { %v6624_v9 = vpop.permute.xlu0 %6623 }
 0x871   :  { %v6626_v21 = vsel %vm395_vm3, %v6614_v60, %v6624_v9 }
 0x872   :  { %v6639_v1 = vrot.slane %v6626_v21, %v10854_v33 }
 0x874   :  { %v6640_v5 = vmul.f32 %v6639_v1, %v10360_v27  ;;  %v6641_v35 = vmul.f32 %v6639_v1, %v10362_v53  ;;  %v6642_v25 = vmul.f32 %v6639_v1, %v10364_v13  ;;  %v6643_v36 = vmul.f32 %v6639_v1, %v10372_v2  ;;  %v6633_v23 = vpop.permute.xlu1 %6632 }
 0x875   :  { %v6644_v55 = vmul.f32 %v6639_v1, %v10380_v4  ;;  %v6645_v56 = vmul.f32 %v6639_v1, %v10385_v19  ;;  %v6646_v46 = vmul.f32 %v6639_v1, %v10390_v48  ;;  %v6647_v63 = vmul.f32 %v6639_v1, %v10395_v17 }
 0x876   :  { %v6709_v61 = vmul.f32 %v6639_v1, %v10400_v40  ;;  %v6710_v22 = vmul.f32 %v6639_v1, %v10405_v58  ;;  %v6711_v27 = vmul.f32 %v6639_v1, %v10410_v31  ;;  %v6712_v53 = vmul.f32 %v6639_v1, %v10415_v38 }
 0x877   :  { %v6713_v13 = vmul.f32 %v6639_v1, %v10420_v0  ;;  %v6714_v2 = vmul.f32 %v6639_v1, %v10425_v57  ;;  %v6715_v4 = vmul.f32 %v6639_v1, %v10430_v10  ;;  %v6716_v19 = vmul.f32 %v6639_v1, %v10435_v3 }
 0x878   :  { %v6773_v48 = vmul.f32 %v6639_v1, %v10440_v15  ;;  %v6774_v17 = vmul.f32 %v6639_v1, %v10445_v59  ;;  %v6775_v40 = vmul.f32 %v6639_v1, %v10450_v26  ;;  %v6776_v58 = vmul.f32 %v6639_v1, %v10455_v14 }
 0x879   :  { %v6777_v31 = vmul.f32 %v6639_v1, %v10460_v11  ;;  %v6778_v38 = vmul.f32 %v6639_v1, %v10465_v50  ;;  %v6779_v0 = vmul.f32 %v6639_v1, %v10470_v29  ;;  %v6780_v57 = vmul.f32 %v6639_v1, %v10475_v12 }
 0x87a   :  { %v6837_v10 = vmul.f32 %v6639_v1, %v10480_v41  ;;  %v6635_v3 = vsel %vm395_vm3, %v6617_v16, %v6633_v23  ;;  %v6838_v15 = vmul.f32 %v6639_v1, %v10485_v62  ;;  %v6839_v59 = vmul.f32 %v6639_v1, %v10490_v6  ;;  %v6663_v16 = vld [vmem:[#allocation7 + $0x48] sm:$0xff] }
 0x87b   :  { %v6840_v26 = vmul.f32 %v6639_v1, %v10495_v52  ;;  %v6651_v14 = vrot.slane %v6635_v3, %v10854_v33  ;;  %v6841_v11 = vmul.f32 %v6639_v1, %v10500_v37  ;;  %v6842_v50 = vmul.f32 %v6639_v1, %v10505_v18  ;;  %v6727_v3 = vld [vmem:[#allocation7 + $0x50] sm:$0xff] }
 0x87c   :  { %v6843_v29 = vmul.f32 %v6639_v1, %v10510_v51  ;;  %v6844_v12 = vmul.f32 %v6639_v1, %v10515_v49 }
 0x87d   :  { %v6652_v28 = vadd.f32 %v6651_v14, %v6640_v5  ;;  %v6653_v41 = vadd.f32 %v6651_v14, %v6641_v35  ;;  %v6654_v47 = vadd.f32 %v6651_v14, %v6642_v25  ;;  %v6655_v7 = vadd.f32 %v6651_v14, %v6643_v36  ;;  %v6665_v35 = vld [vmem:[#allocation7 + $0x88] sm:$0xff]  ;;  %v6666_v25 = vld [vmem:[#allocation7 + $0xc0] sm:$0xff] }
 0x87e   :  { %v6656_v34 = vadd.f32 %v6651_v14, %v6644_v55  ;;  %v6657_v62 = vadd.f32 %v6651_v14, %v6645_v56  ;;  %v6658_v45 = vadd.f32 %v6651_v14, %v6646_v46  ;;  %v6659_v6 = vadd.f32 %v6651_v14, %v6647_v63  ;;  %v6667_v36 = vld [vmem:[#allocation7 + $0xc8] sm:$0xff] }
 0x87f   :  { %v10572_v42 = vadd.f32 %v6709_v61, %v6651_v14  ;;  %v10574_v52 = vadd.f32 %v6710_v22, %v6651_v14  ;;  %v10576_v39 = vadd.f32 %v6711_v27, %v6651_v14  ;;  %v10578_v37 = vadd.f32 %v6712_v53, %v6651_v14 }
 0x880   :  { %v10580_v18 = vadd.f32 %v6713_v13, %v6651_v14  ;;  %v10582_v51 = vadd.f32 %v6714_v2, %v6651_v14  ;;  %v10584_v49 = vadd.f32 %v6715_v4, %v6651_v14  ;;  %v10586_v44 = vadd.f32 %v6716_v19, %v6651_v14 }
 0x881   :  { %v10588_v60 = vadd.f32 %v6773_v48, %v6651_v14  ;;  %v10590_v43 = vadd.f32 %v6774_v17, %v6651_v14  ;;  %v10592_v33 = vadd.f32 %v6775_v40, %v6651_v14  ;;  %v10594_v24 = vadd.f32 %v6776_v58, %v6651_v14  ;;  %v6725_v58 = vld [vmem:[#allocation7 + $0x10] sm:$0xff] }
 0x882   :  { %v10596_v9 = vadd.f32 %v6777_v31, %v6651_v14  ;;  %v10598_v21 = vadd.f32 %v6778_v38, %v6651_v14  ;;  %v10600_v1 = vadd.f32 %v6779_v0, %v6651_v14  ;;  %v10602_v5 = vadd.f32 %v6780_v57, %v6651_v14  ;;  %v6726_v31 = vld [vmem:[#allocation7 + $0x18] sm:$0xff] }
 0x883   :  { %v10604_v55 = vadd.f32 %v6837_v10, %v6651_v14  ;;  %v10606_v56 = vadd.f32 %v6838_v15, %v6651_v14  ;;  %v10608_v46 = vadd.f32 %v6839_v59, %v6651_v14  ;;  %v10610_v63 = vadd.f32 %v6840_v26, %v6651_v14  ;;  %v6728_v15 = vld [vmem:[#allocation7 + $0x58] sm:$0xff]  ;;  %v6729_v59 = vld [vmem:[#allocation7 + $0x90] sm:$0xff] }
 0x884   :  { %v10612_v61 = vadd.f32 %v6841_v11, %v6651_v14  ;;  %v10614_v22 = vadd.f32 %v6842_v50, %v6651_v14  ;;  %v10616_v27 = vadd.f32 %v6843_v29, %v6651_v14  ;;  %v10618_v53 = vadd.f32 %v6844_v12, %v6651_v14  ;;  %v6730_v29 = vld [vmem:[#allocation7 + $0x98] sm:$0xff]  ;;  %v6731_v12 = vld [vmem:[#allocation7 + $0xd0] sm:$0xff] }
 0x885   :  { %v6668_v13 = vadd.f32 %v6660_v20, %v6652_v28  ;;  %v6669_v2 = vadd.f32 %v6661_v8, %v6653_v41  ;;  %v6670_v23 = vadd.f32 %v6662_v32, %v6654_v47  ;;  %v6671_v4 = vadd.f32 %v6663_v16, %v6655_v7  ;;  %v6732_v28 = vld [vmem:[#allocation7 + $0xd8] sm:$0xff] }
 0x886   :  { %v6672_v19 = vadd.f32 %v6664_v54, %v6656_v34  ;;  %v6673_v48 = vadd.f32 %v6665_v35, %v6657_v62  ;;  %v6674_v17 = vadd.f32 %v6666_v25, %v6658_v45  ;;  %v6675_v40 = vadd.f32 %v6667_v36, %v6659_v6 }
 0x887   :  { %vm6676_vm0 = vcmp.ge.f32.partialorder %v6668_v13, 0.0  ;;  %vm6677_vm3 = vcmp.ge.f32.partialorder %v6669_v2, 0.0  ;;  %vm6678_vm4 = vcmp.ge.f32.partialorder %v6670_v23, 0.0  ;;  %vm6679_vm6 = vcmp.ge.f32.partialorder %v6671_v4, 0.0 }
 0x888   :  { %vm6680_vm9 = vcmp.ge.f32.partialorder %v6672_v19, 0.0  ;;  %vm6681_vm8 = vcmp.ge.f32.partialorder %v6673_v48, 0.0  ;;  %vm6682_vm10 = vcmp.ge.f32.partialorder %v6674_v17, 0.0  ;;  %vm6683_vm11 = vcmp.ge.f32.partialorder %v6675_v40, 0.0 }
 0x889   :  { %v6685_v38 = vmul.f32 %v10536_v30, %v6668_v13  ;;  %v6686_v0 = vmul.f32 %v10536_v30, %v6669_v2  ;;  %v6687_v57 = vmul.f32 %v10536_v30, %v6670_v23  ;;  %v6688_v10 = vmul.f32 %v10536_v30, %v6671_v4 }
 0x88a   :  { %v6689_v26 = vmul.f32 %v10536_v30, %v6672_v19  ;;  %v6690_v14 = vmul.f32 %v10536_v30, %v6673_v48  ;;  %v6691_v11 = vmul.f32 %v10536_v30, %v6674_v17  ;;  %v6692_v50 = vmul.f32 %v10536_v30, %v6675_v40 }
 0x88b   :  { %v6693_v41 = vsel %vm6676_vm0, %v6668_v13, %v6685_v38  ;;  %v6694_v47 = vsel %vm6677_vm3, %v6669_v2, %v6686_v0  ;;  %v6695_v7 = vsel %vm6678_vm4, %v6670_v23, %v6687_v57  ;;  %v6696_v34 = vsel %vm6679_vm6, %v6671_v4, %v6688_v10  ;;  %v6793_v2 = vld [vmem:[#allocation7 + $0xa0] sm:$0xff] }
 0x88c   :  { %v6697_v62 = vsel %vm6680_vm9, %v6672_v19, %v6689_v26  ;;  %v6698_v45 = vsel %vm6681_vm8, %v6673_v48, %v6690_v14  ;;  %v6699_v6 = vsel %vm6682_vm10, %v6674_v17, %v6691_v11  ;;  %v6700_v20 = vsel %vm6683_vm11, %v6675_v40, %v6692_v50  ;;  %6701 = vst [vmem:[#allocation17] sm:$0xff] %v6693_v41  ;;  %v6794_v17 = vld [vmem:[#allocation7 + $0xa8] sm:$0xff]  ;;  %v6795_v40 = vld [vmem:[#allocation7 + $0xe0] sm:$0xff] }
 0x88d   :  { %6702 = vst [vmem:[#allocation17 + $0x8] sm:$0xff] %v6694_v47  ;;  %6703 = vst [vmem:[#allocation17 + $0x40] sm:$0xff] %v6695_v7  ;;  %v6733_v8 = vadd.f32 %v6725_v58, %v10572_v42  ;;  %v6734_v32 = vadd.f32 %v6726_v31, %v10574_v52  ;;  %v6735_v16 = vadd.f32 %v6727_v3, %v10576_v39  ;;  %v6789_v42 = vld [vmem:[#allocation7 + $0x20] sm:$0xff]  ;;  %v6790_v52 = vld [vmem:[#allocation7 + $0x28] sm:$0xff] }
 0x88e   :  { %6704 = vst [vmem:[#allocation17 + $0x48] sm:$0xff] %v6696_v34  ;;  %6705 = vst [vmem:[#allocation17 + $0x80] sm:$0xff] %v6697_v62  ;;  %v6736_v54 = vadd.f32 %v6728_v15, %v10578_v37  ;;  %v6737_v35 = vadd.f32 %v6729_v59, %v10580_v18  ;;  %v6738_v25 = vadd.f32 %v6730_v29, %v10582_v51  ;;  %v6796_v58 = vld [vmem:[#allocation7 + $0xe8] sm:$0xff]  ;;  %v6857_v47 = vld [vmem:[#allocation7 + $0xb0] sm:$0xff] }
 0x88f   :  { %6706 = vst [vmem:[#allocation17 + $0x88] sm:$0xff] %v6698_v45  ;;  %6707 = vst [vmem:[#allocation17 + $0xc0] sm:$0xff] %v6699_v6  ;;  %v6739_v36 = vadd.f32 %v6731_v12, %v10584_v49  ;;  %v6740_v13 = vadd.f32 %v6732_v28, %v10586_v44  ;;  %vm6741_vm12 = vcmp.ge.f32.partialorder %v6733_v8, 0.0  ;;  %vm6742_vm13 = vcmp.ge.f32.partialorder %v6734_v32, 0.0  ;;  %v6791_v49 = vld [vmem:[#allocation7 + $0x60] sm:$0xff]  ;;  %v6792_v44 = vld [vmem:[#allocation7 + $0x68] sm:$0xff] }
 0x890   :  { %6708 = vst [vmem:[#allocation17 + $0xc8] sm:$0xff] %v6700_v20  ;;  %vm6743_vm14 = vcmp.ge.f32.partialorder %v6735_v16, 0.0  ;;  %vm6744_vm15 = vcmp.ge.f32.partialorder %v6736_v54, 0.0  ;;  %vm6745_vm2 = vcmp.ge.f32.partialorder %v6737_v35, 0.0  ;;  %vm6746_vm1 = vcmp.ge.f32.partialorder %v6738_v25, 0.0  ;;  %v6858_v6 = vld [vmem:[#allocation7 + $0xb8] sm:$0xff] }
 0x891   :  { %vm6747_vm5 = vcmp.ge.f32.partialorder %v6739_v36, 0.0  ;;  %vm6748_vm7 = vcmp.ge.f32.partialorder %v6740_v13, 0.0  ;;  %v6749_v39 = vmul.f32 %v6733_v8, %v10536_v30  ;;  %v6750_v37 = vmul.f32 %v6734_v32, %v10536_v30  ;;  %v6859_v20 = vld [vmem:[#allocation7 + $0xf0] sm:$0xff] }
 0x892   :  { %v6751_v18 = vmul.f32 %v6735_v16, %v10536_v30  ;;  %v6752_v51 = vmul.f32 %v6736_v54, %v10536_v30  ;;  %v6753_v23 = vmul.f32 %v6737_v35, %v10536_v30  ;;  %v6754_v4 = vmul.f32 %v6738_v25, %v10536_v30 }
 0x893   :  { %v6755_v19 = vmul.f32 %v6739_v36, %v10536_v30  ;;  %v6756_v48 = vmul.f32 %v6740_v13, %v10536_v30  ;;  %v6757_v31 = vsel %vm6741_vm12, %v6733_v8, %v6749_v39  ;;  %v6758_v38 = vsel %vm6742_vm13, %v6734_v32, %v6750_v37  ;;  %v6860_v8 = vld [vmem:[#allocation7 + $0xf8] sm:$0xff] }
 0x894   :  { %v6759_v0 = vsel %vm6743_vm14, %v6735_v16, %v6751_v18  ;;  %v6760_v57 = vsel %vm6744_vm15, %v6736_v54, %v6752_v51  ;;  %v6761_v10 = vsel %vm6745_vm2, %v6737_v35, %v6753_v23  ;;  %v6762_v3 = vsel %vm6746_vm1, %v6738_v25, %v6754_v4  ;;  %6765 = vst [vmem:[#allocation17 + $0x10] sm:$0xff] %v6757_v31 }
 0x895   :  { %v6763_v15 = vsel %vm6747_vm5, %v6739_v36, %v6755_v19  ;;  %v6764_v59 = vsel %vm6748_vm7, %v6740_v13, %v6756_v48  ;;  %6766 = vst [vmem:[#allocation17 + $0x18] sm:$0xff] %v6758_v38  ;;  %6767 = vst [vmem:[#allocation17 + $0x50] sm:$0xff] %v6759_v0  ;;  %v6797_v26 = vadd.f32 %v6789_v42, %v10588_v60  ;;  %v6853_v60 = vld [vmem:[#allocation7 + $0x30] sm:$0xff] }
 0x896   :  { %6768 = vst [vmem:[#allocation17 + $0x58] sm:$0xff] %v6760_v57  ;;  %6769 = vst [vmem:[#allocation17 + $0x90] sm:$0xff] %v6761_v10  ;;  %v6798_v14 = vadd.f32 %v6790_v52, %v10590_v43  ;;  %v6799_v11 = vadd.f32 %v6791_v49, %v10592_v33  ;;  %v6800_v50 = vadd.f32 %v6792_v44, %v10594_v24  ;;  %v6854_v43 = vld [vmem:[#allocation7 + $0x38] sm:$0xff] }
 0x897   :  { %6770 = vst [vmem:[#allocation17 + $0x98] sm:$0xff] %v6762_v3  ;;  %6771 = vst [vmem:[#allocation17 + $0xd0] sm:$0xff] %v6763_v15  ;;  %v6801_v29 = vadd.f32 %v6793_v2, %v10596_v9  ;;  %v6802_v12 = vadd.f32 %v6794_v17, %v10598_v21  ;;  %v6803_v28 = vadd.f32 %v6795_v40, %v10600_v1  ;;  %vm6805_vm0 = vcmp.ge.f32.partialorder %v6797_v26, 0.0  ;;  %v6855_v1 = vld [vmem:[#allocation7 + $0x70] sm:$0xff] }
 0x898   :  { %6772 = vst [vmem:[#allocation17 + $0xd8] sm:$0xff] %v6764_v59  ;;  %v6804_v41 = vadd.f32 %v6796_v58, %v10602_v5  ;;  %vm6806_vm3 = vcmp.ge.f32.partialorder %v6798_v14, 0.0  ;;  %vm6807_vm4 = vcmp.ge.f32.partialorder %v6799_v11, 0.0  ;;  %vm6808_vm6 = vcmp.ge.f32.partialorder %v6800_v50, 0.0  ;;  %v6856_v5 = vld [vmem:[#allocation7 + $0x78] sm:$0xff] }
 0x899   :  { %vm6809_vm9 = vcmp.ge.f32.partialorder %v6801_v29, 0.0  ;;  %vm6810_vm8 = vcmp.ge.f32.partialorder %v6802_v12, 0.0  ;;  %vm6811_vm10 = vcmp.ge.f32.partialorder %v6803_v28, 0.0  ;;  %v6813_v33 = vmul.f32 %v6797_v26, %v10536_v30 }
 0x89a   :  { %vm6812_vm11 = vcmp.ge.f32.partialorder %v6804_v41, 0.0  ;;  %v6814_v24 = vmul.f32 %v6798_v14, %v10536_v30  ;;  %v6815_v9 = vmul.f32 %v6799_v11, %v10536_v30  ;;  %v6816_v21 = vmul.f32 %v6800_v50, %v10536_v30 }
 0x89b   :  { %v6817_v7 = vmul.f32 %v6801_v29, %v10536_v30  ;;  %v6818_v34 = vmul.f32 %v6802_v12, %v10536_v30  ;;  %v6819_v62 = vmul.f32 %v6803_v28, %v10536_v30  ;;  %v6820_v45 = vmul.f32 %v6804_v41, %v10536_v30 }
 0x89c   :  { %v6821_v32 = vsel %vm6805_vm0, %v6797_v26, %v6813_v33  ;;  %v6822_v16 = vsel %vm6806_vm3, %v6798_v14, %v6814_v24  ;;  %v6823_v54 = vsel %vm6807_vm4, %v6799_v11, %v6815_v9  ;;  %v6824_v35 = vsel %vm6808_vm6, %v6800_v50, %v6816_v21 }
 0x89d   :  { %v6825_v25 = vsel %vm6809_vm9, %v6801_v29, %v6817_v7  ;;  %v6826_v36 = vsel %vm6810_vm8, %v6802_v12, %v6818_v34  ;;  %v6827_v13 = vsel %vm6811_vm10, %v6803_v28, %v6819_v62  ;;  %v6828_v42 = vsel %vm6812_vm11, %v6804_v41, %v6820_v45  ;;  %6829 = vst [vmem:[#allocation17 + $0x20] sm:$0xff] %v6821_v32 }
 0x89e   :  { %6830 = vst [vmem:[#allocation17 + $0x28] sm:$0xff] %v6822_v16  ;;  %6831 = vst [vmem:[#allocation17 + $0x60] sm:$0xff] %v6823_v54  ;;  %v6861_v52 = vadd.f32 %v6853_v60, %v10604_v55  ;;  %v6862_v39 = vadd.f32 %v6854_v43, %v10606_v56  ;;  %v6863_v37 = vadd.f32 %v6855_v1, %v10608_v46 }
 0x89f   :  { %6832 = vst [vmem:[#allocation17 + $0x68] sm:$0xff] %v6824_v35  ;;  %6833 = vst [vmem:[#allocation17 + $0xa0] sm:$0xff] %v6825_v25  ;;  %v6864_v18 = vadd.f32 %v6856_v5, %v10610_v63  ;;  %v6865_v51 = vadd.f32 %v6857_v47, %v10612_v61  ;;  %v6866_v49 = vadd.f32 %v6858_v6, %v10614_v22 }
 0x8a0   :  { %6834 = vst [vmem:[#allocation17 + $0xa8] sm:$0xff] %v6826_v36  ;;  %6835 = vst [vmem:[#allocation17 + $0xe0] sm:$0xff] %v6827_v13  ;;  %v6867_v44 = vadd.f32 %v6859_v20, %v10616_v27  ;;  %v6868_v2 = vadd.f32 %v6860_v8, %v10618_v53  ;;  %vm6869_vm12 = vcmp.ge.f32.partialorder %v6861_v52, 0.0  ;;  %vm6870_vm13 = vcmp.ge.f32.partialorder %v6862_v39, 0.0 }
 0x8a1   :  { %6836 = vst [vmem:[#allocation17 + $0xe8] sm:$0xff] %v6828_v42  ;;  %vm6871_vm14 = vcmp.ge.f32.partialorder %v6863_v37, 0.0  ;;  %vm6872_vm15 = vcmp.ge.f32.partialorder %v6864_v18, 0.0  ;;  %vm6873_vm2 = vcmp.ge.f32.partialorder %v6865_v51, 0.0  ;;  %vm6874_vm1 = vcmp.ge.f32.partialorder %v6866_v49, 0.0 }
 0x8a2   :  { %vm6875_vm5 = vcmp.ge.f32.partialorder %v6867_v44, 0.0  ;;  %vm6876_vm7 = vcmp.ge.f32.partialorder %v6868_v2, 0.0  ;;  %v6877_v55 = vmul.f32 %v6861_v52, %v10536_v30  ;;  %v6878_v56 = vmul.f32 %v6862_v39, %v10536_v30 }
 0x8a3   :  { %v6879_v46 = vmul.f32 %v6863_v37, %v10536_v30  ;;  %v6880_v63 = vmul.f32 %v6864_v18, %v10536_v30  ;;  %v6881_v61 = vmul.f32 %v6865_v51, %v10536_v30  ;;  %v6882_v22 = vmul.f32 %v6866_v49, %v10536_v30 }
 0x8a4   :  { %v6883_v27 = vmul.f32 %v6867_v44, %v10536_v30  ;;  %v6884_v53 = vmul.f32 %v6868_v2, %v10536_v30  ;;  %v6885_v23 = vsel %vm6869_vm12, %v6861_v52, %v6877_v55  ;;  %v6886_v4 = vsel %vm6870_vm13, %v6862_v39, %v6878_v56 }
 0x8a5   :  { %v6887_v19 = vsel %vm6871_vm14, %v6863_v37, %v6879_v46  ;;  %v6888_v48 = vsel %vm6872_vm15, %v6864_v18, %v6880_v63  ;;  %v6889_v17 = vsel %vm6873_vm2, %v6865_v51, %v6881_v61  ;;  %v6890_v40 = vsel %vm6874_vm1, %v6866_v49, %v6882_v22  ;;  %6893 = vst [vmem:[#allocation17 + $0x30] sm:$0xff] %v6885_v23 }
 0x8a6   :  { %v6891_v58 = vsel %vm6875_vm5, %v6867_v44, %v6883_v27  ;;  %v6892_v31 = vsel %vm6876_vm7, %v6868_v2, %v6884_v53  ;;  %6894 = vst [vmem:[#allocation17 + $0x38] sm:$0xff] %v6886_v4  ;;  %6895 = vst [vmem:[#allocation17 + $0x70] sm:$0xff] %v6887_v19 }
 0x8a7   :  { %6896 = vst [vmem:[#allocation17 + $0x78] sm:$0xff] %v6888_v48  ;;  %6897 = vst [vmem:[#allocation17 + $0xb0] sm:$0xff] %v6889_v17 }
 0x8a8   :  { %6898 = vst [vmem:[#allocation17 + $0xb8] sm:$0xff] %v6890_v40  ;;  %6899 = vst [vmem:[#allocation17 + $0xf0] sm:$0xff] %v6891_v58 }
 0x8a9   :  { %6900 = vst [vmem:[#allocation17 + $0xf8] sm:$0xff] %v6892_v31 }
 0x8aa   :  { %8430 = shalt.err (!%p8427_p7)
}
 0x8ab   :  { %s8431_s22 = scalar_lea.hbm %s10735_s12, 4096 }
 0x8ac   :  { %p8432_p8 = scmp.ne.s32.totalorder %s10735_s12, %s8431_s22  ;;  %p8435_p9 = scmp.lt.u32.totalorder %s8431_s22, %s10735_s12 }
 0x8ae   :  { %p8437_p10 = pnand %p8435_p9, %p8432_p8 }
 0x8b0   :  { %8440 = shalt.err (!%p8437_p10)
}
 0x8b1   :  { %6912 = dma.vmem_to_hbm [thread:$0]  %s6907_s11, 4096, %s10735_s12, [#allocation5], %s8460_s0, %s8460_s0, %s8461_s26  }
 0x8b2   :  { %8451 = dma.done.wait [#allocation5], 4096  }
 0x8b3   :  { %8452 = vsyncadd [#allocation5], 4294963200 }
 0x8b4   :  { %6916 = vsyncpa [#allocation4], 1 }
 0x8b5   :  { %6917 = vsyncpa [#allocation9], 1 }
 0x8b6   :  { %6918 = vsyncpa [#allocation12], 1 }
 0x8b7   :  { %6919 = vsyncpa [#allocation15], 1 }
 0x8b8   :  { %6920 = vsyncpa [#allocation5], 1 }
 0x8b9   :  { %6921 = vsyncpa [#allocation6], 1 }

</bundles_post_ra>
